<compile_context>
chip_gen: v5e
topology: v5e:2x2
jax: 0.10.0
libtpu: 0.0.40
codegen_flags: <defaults>
</compile_context>

<pallas_src>
import jax
import jax.numpy as jnp
from jax.experimental import pallas as pl
from jax.experimental.pallas import tpu as pltpu

NUM_PIECES = 5
IN_DIM = 784                   # 1 * 28 * 28 (logical)
IN_PAD = 896                   # 7 * 128, lane-dense padded input width
H_DIM = 240                    # logical hidden width (PyTorch)
H_PAD = 256                    # lane-aligned hidden width used inside the kernel
CAT_DIM = NUM_PIECES * H_PAD   # 1280


def _round_up(n, m):
    return ((n + m - 1) // m) * m


def _discriminator_kernel(x_ref, w0_ref, b0_ref, w1_ref, b1_ref, wy_ref, by_ref, o_ref):
    """One batch tile of the full forward pass.

    x_ref : (TB, 896)        bf16  (batch tile, pipelined)
    w0_ref: (896, 1280)      bf16  b0_ref: (1, 1280) f32   (resident)
    w1_ref: (256, 1280)      bf16  b1_ref: (1, 1280) f32   (resident)
    wy_ref: (1, 256)         f32   by_ref: (1, 1)    f32   (resident)
    o_ref : (TB, 1)          f32
    """
    x = x_ref[...]

    # ---- Maxout layer 0: single bf16 (TB,896)@(896,1280) matmul, f32 acc, max over 5 chunks ----
    z0 = jnp.dot(x, w0_ref[...], preferred_element_type=jnp.float32) + b0_ref[...]
    h0 = z0[:, 0:H_PAD]
    for p in range(1, NUM_PIECES):
        h0 = jnp.maximum(h0, z0[:, p * H_PAD:(p + 1) * H_PAD])

    # ---- Maxout layer 1: single bf16 (TB,256)@(256,1280) matmul, f32 acc, max over 5 chunks ----
    z1 = jnp.dot(h0.astype(jnp.bfloat16), w1_ref[...],
                 preferred_element_type=jnp.float32) + b1_ref[...]
    h1 = z1[:, 0:H_PAD]
    for p in range(1, NUM_PIECES):
        h1 = jnp.maximum(h1, z1[:, p * H_PAD:(p + 1) * H_PAD])

    # ---- Output head: Linear(240->1) as f32 VPU multiply + lane reduce, then sigmoid ----
    logit = jnp.sum(h1 * wy_ref[...], axis=-1, keepdims=True) + by_ref[...]
    o_ref[...] = (1.0 / (1.0 + jnp.exp(-logit))).astype(o_ref.dtype)


def prepare_params(pt_params):
    """Rearrange PyTorch-layout params into the kernel's padded, concatenated layout.

    PyTorch layout:
      w0_pt: (1200, 784)  b0_pt: (1200,)      # Linear(784, 240*5)
      w1_pt: (1200, 240)  b1_pt: (1200,)      # Linear(240, 240*5)
      wy_pt: (1, 240)     by_pt: (1,)         # Linear(240, 1)

    Maxout semantics: z.view(B, 240, 5).max(2) -> piece p uses rows o*5+p of w_pt.
    Big weight matrices are stored in bf16 (MXU inputs); biases / head stay f32.
    """
    w0_pt, b0_pt, w1_pt, b1_pt, wy_pt, by_pt = pt_params
    f32 = jnp.float32

    def maxout_cat(w_pt, b_pt, in_dim, in_pad):
        # (240*5, in) -> (240, 5, in) -> per-piece (in, 240) -> zero-pad -> concat (in_pad, 5*256)
        w = w_pt.reshape(H_DIM, NUM_PIECES, in_dim).astype(f32)
        b = b_pt.reshape(H_DIM, NUM_PIECES).astype(f32)
        w_pieces, b_pieces = [], []
        for p in range(NUM_PIECES):
            wp = jnp.transpose(w[:, p, :], (1, 0))                        # (in_dim, 240)
            wp = jnp.pad(wp, ((0, in_pad - in_dim), (0, H_PAD - H_DIM)))  # zero-pad K & N
            bp = jnp.pad(b[:, p], (0, H_PAD - H_DIM))                     # (256,)
            w_pieces.append(wp)
            b_pieces.append(bp)
        w_cat = jnp.concatenate(w_pieces, axis=1).astype(jnp.bfloat16)    # (in_pad, 1280) bf16
        b_cat = jnp.concatenate(b_pieces, axis=0).reshape(1, CAT_DIM)     # (1, 1280) f32
        return w_cat, b_cat

    w0, b0 = maxout_cat(w0_pt, b0_pt, IN_DIM, IN_PAD)   # (896, 1280) bf16, (1, 1280) f32
    w1, b1 = maxout_cat(w1_pt, b1_pt, H_DIM, H_PAD)     # (256, 1280) bf16, (1, 1280) f32

    wy = jnp.pad(wy_pt.astype(f32), ((0, 0), (0, H_PAD - H_DIM)))         # (1, 256) f32, zero pad
    by = by_pt.astype(f32).reshape(1, 1)                                  # (1, 1) f32
    return (w0, b0, w1, b1, wy, by)


def discriminator_forward(x_nchw, kernel_params, *, tb=512):
    """x_nchw: (B, 1, 28, 28) float32. Returns (B, 1) float32 in [0, 1]."""
    B = x_nchw.shape[0]
    x = x_nchw.reshape(B, -1).astype(jnp.float32)            # row-major flatten == torch .view
    x = jnp.pad(x, ((0, 0), (0, IN_PAD - IN_DIM)))           # lane-dense 784 -> 896 (zeros)

    # Batch tile: multiple of 8 (sublane). For B >= 16 pick TB so the grid has at
    # least 2 steps (v7x megacore sharding); cap at `tb` to bound live activations.
    if B >= 16:
        TB = min(tb, _round_up((B + 1) // 2, 8))
    else:
        TB = _round_up(max(B, 1), 8)
    B_pad = _round_up(B, TB)
    if B_pad != B:
        x = jnp.pad(x, ((0, B_pad - B), (0, 0)))
    x = x.astype(jnp.bfloat16)                               # stream x as bf16

    w0, b0, w1, b1, wy, by = kernel_params

    grid = (pl.cdiv(B_pad, TB),)

    # VMEM budget: resident weights + double-buffered x/out tiles + live activations.
    weight_bytes = sum(int(a.size) * a.dtype.itemsize for a in (w0, b0, w1, b1, wy, by))
    xio_bytes = 2 * (TB * IN_PAD * 2 + TB * 4)               # bf16 x tile + f32 out, 2 buffers
    act_bytes = 2 * TB * CAT_DIM * 4 + 4 * TB * H_PAD * 4    # z0/z1 f32 + h0/h1 (+ bf16 copies)
    vmem_limit = min(int(weight_bytes + xio_bytes + act_bytes) + (16 << 20), 100 << 20)

    out = pl.pallas_call(
        _discriminator_kernel,
        out_shape=jax.ShapeDtypeStruct((B_pad, 1), jnp.float32),
        grid=grid,
        in_specs=[
            pl.BlockSpec((TB, IN_PAD), lambda i: (i, 0)),          # x tile (pipelined, bf16)
            pl.BlockSpec((IN_PAD, CAT_DIM), lambda i: (0, 0)),     # w0 (resident, bf16)
            pl.BlockSpec((1, CAT_DIM), lambda i: (0, 0)),          # b0 (f32)
            pl.BlockSpec((H_PAD, CAT_DIM), lambda i: (0, 0)),      # w1 (resident, bf16)
            pl.BlockSpec((1, CAT_DIM), lambda i: (0, 0)),          # b1 (f32)
            pl.BlockSpec((1, H_PAD), lambda i: (0, 0)),            # wy (f32)
            pl.BlockSpec((1, 1), lambda i: (0, 0)),                # by (f32)
        ],
        out_specs=pl.BlockSpec((TB, 1), lambda i: (i, 0)),
        compiler_params=pltpu.CompilerParams(
            dimension_semantics=("parallel",),
            vmem_limit_bytes=vmem_limit,
        ),
    )(x, w0, b0, w1, b1, wy, by)
    return out[:B]


def _uniform(key, shape, fan_in):
    # PyTorch nn.Linear default init: U(-1/sqrt(fan_in), 1/sqrt(fan_in))
    bound = 1.0 / float(fan_in) ** 0.5
    return jax.random.uniform(key, shape, jnp.float32, -bound, bound)


def init_pt_params(key):
    """Parameters in the original PyTorch layouts."""
    ks = jax.random.split(key, 6)
    w0_pt = _uniform(ks[0], (H_DIM * NUM_PIECES, IN_DIM), IN_DIM)
    b0_pt = _uniform(ks[1], (H_DIM * NUM_PIECES,), IN_DIM)
    w1_pt = _uniform(ks[2], (H_DIM * NUM_PIECES, H_DIM), H_DIM)
    b1_pt = _uniform(ks[3], (H_DIM * NUM_PIECES,), H_DIM)
    wy_pt = _uniform(ks[4], (1, H_DIM), H_DIM)
    by_pt = _uniform(ks[5], (1,), H_DIM)
    return (w0_pt, b0_pt, w1_pt, b1_pt, wy_pt, by_pt)


def _reference_forward(x_nchw, pt_params):
    """Pure-JAX f32 mirror of the PyTorch forward (for correctness check)."""
    w0, b0, w1, b1, wy, by = pt_params
    B = x_nchw.shape[0]
    x = x_nchw.reshape(B, -1).astype(jnp.float32)

    def maxout(h, w_pt, b_pt):
        z = h @ w_pt.T + b_pt                      # (B, 240*5)
        z = z.reshape(B, H_DIM, NUM_PIECES)        # == torch .view(B, 240, 5)
        return z.max(axis=2)

    h0 = maxout(x, w0, b0)
    h1 = maxout(h0, w1, b1)
    return jax.nn.sigmoid(h1 @ wy.T + by)


if __name__ == "__main__":
    key = jax.random.PRNGKey(0)
    k_x, k_p = jax.random.split(key)

    # Small deterministic input consistent with the module: batch=2, NCHW (2, 1, 28, 28).
    x = jax.random.normal(k_x, (2, 1, 28, 28), jnp.float32)
    pt_params = init_pt_params(k_p)
    kernel_params = prepare_params(pt_params)

    out = discriminator_forward(x, kernel_params)
    out = jax.block_until_ready(out)

    ref = _reference_forward(x, pt_params)
    assert out.shape == (2, 1), out.shape
    # bf16 matmul inputs -> relaxed tolerance vs. the pure-f32 reference.
    assert jnp.allclose(out, ref, atol=2e-2, rtol=2e-2), (out, ref)

    print("KERNEL_OK")
</pallas_src>

<mosaic_0001>
module attributes {stable_mosaic.version = 11 : i64} {
  func.func @_discriminator_kernel(%arg0: i32, %arg1: memref<8x896xbf16, #tpu.memory_space<vmem>>, %arg2: memref<896x1280xbf16, #tpu.memory_space<vmem>>, %arg3: memref<1x1280xf32, #tpu.memory_space<vmem>>, %arg4: memref<256x1280xbf16, #tpu.memory_space<vmem>>, %arg5: memref<1x1280xf32, #tpu.memory_space<vmem>>, %arg6: memref<1x256xf32, #tpu.memory_space<vmem>>, %arg7: memref<1x1xf32, #tpu.memory_space<vmem>>, %arg8: memref<8x1xf32, #tpu.memory_space<vmem>>) attributes {dimension_semantics = [#tpu.dimension_semantics<parallel>], iteration_bounds = array<i64: 1>, scalar_prefetch = 0 : i64, scratch_operands = 0 : i64, tpu.core_type = #tpu.core_type<tc>, window_params = [{transform_indices = @transform_0, window_bounds = array<i64: 8, 896>}, {pipeline_mode = #tpu.pipeline_mode<synchronous>, transform_indices = @transform_1, window_bounds = array<i64: 896, 1280>}, {pipeline_mode = #tpu.pipeline_mode<synchronous>, transform_indices = @transform_2, window_bounds = array<i64: 1, 1280>}, {pipeline_mode = #tpu.pipeline_mode<synchronous>, transform_indices = @transform_3, window_bounds = array<i64: 256, 1280>}, {pipeline_mode = #tpu.pipeline_mode<synchronous>, transform_indices = @transform_4, window_bounds = array<i64: 1, 1280>}, {pipeline_mode = #tpu.pipeline_mode<synchronous>, transform_indices = @transform_5, window_bounds = array<i64: 1, 256>}, {pipeline_mode = #tpu.pipeline_mode<synchronous>, transform_indices = @transform_6, window_bounds = array<i64: 1, 1>}, {transform_indices = @transform_7, window_bounds = array<i64: 8, 1>}]} {
    %c0 = arith.constant 0 : index
    %c0_0 = arith.constant 0 : index
    %0 = vector.load %arg1[%c0, %c0_0] : memref<8x896xbf16, #tpu.memory_space<vmem>>, vector<8x896xbf16>
    %c0_1 = arith.constant 0 : index
    %c0_2 = arith.constant 0 : index
    %1 = vector.load %arg2[%c0_1, %c0_2] : memref<896x1280xbf16, #tpu.memory_space<vmem>>, vector<896x1280xbf16>
    %cst = arith.constant dense<0.000000e+00> : vector<8x1280xf32>
    %2 = tpu.matmul %0, %1, %cst {dimension_numbers = #tpu.dot_dimension_numbers<[1], [0], [0], [1], [0, 0, 1, 1], [], []>} : vector<8x896xbf16>, vector<896x1280xbf16>, vector<8x1280xf32> -> vector<8x1280xf32>
    %c0_3 = arith.constant 0 : index
    %c0_4 = arith.constant 0 : index
    %3 = vector.load %arg3[%c0_3, %c0_4] : memref<1x1280xf32, #tpu.memory_space<vmem>>, vector<1x1280xf32>
    %4 = vector.broadcast %3 : vector<1x1280xf32> to vector<8x1280xf32>
    %5 = arith.addf %2, %4 : vector<8x1280xf32>
    %6 = vector.extract_strided_slice %5 {offsets = [0, 0], sizes = [8, 256], strides = [1, 1]} : vector<8x1280xf32> to vector<8x256xf32>
    %7 = vector.extract_strided_slice %5 {offsets = [0, 256], sizes = [8, 256], strides = [1, 1]} : vector<8x1280xf32> to vector<8x256xf32>
    %8 = arith.maximumf %6, %7 : vector<8x256xf32>
    %9 = vector.extract_strided_slice %5 {offsets = [0, 512], sizes = [8, 256], strides = [1, 1]} : vector<8x1280xf32> to vector<8x256xf32>
    %10 = arith.maximumf %8, %9 : vector<8x256xf32>
    %11 = vector.extract_strided_slice %5 {offsets = [0, 768], sizes = [8, 256], strides = [1, 1]} : vector<8x1280xf32> to vector<8x256xf32>
    %12 = arith.maximumf %10, %11 : vector<8x256xf32>
    %13 = vector.extract_strided_slice %5 {offsets = [0, 1024], sizes = [8, 256], strides = [1, 1]} : vector<8x1280xf32> to vector<8x256xf32>
    %14 = arith.maximumf %12, %13 : vector<8x256xf32>
    %15 = arith.truncf %14 : vector<8x256xf32> to vector<8x256xbf16>
    %c0_5 = arith.constant 0 : index
    %c0_6 = arith.constant 0 : index
    %16 = vector.load %arg4[%c0_5, %c0_6] : memref<256x1280xbf16, #tpu.memory_space<vmem>>, vector<256x1280xbf16>
    %cst_7 = arith.constant dense<0.000000e+00> : vector<8x1280xf32>
    %17 = tpu.matmul %15, %16, %cst_7 {dimension_numbers = #tpu.dot_dimension_numbers<[1], [0], [0], [1], [0, 0, 1, 1], [], []>} : vector<8x256xbf16>, vector<256x1280xbf16>, vector<8x1280xf32> -> vector<8x1280xf32>
    %c0_8 = arith.constant 0 : index
    %c0_9 = arith.constant 0 : index
    %18 = vector.load %arg5[%c0_8, %c0_9] : memref<1x1280xf32, #tpu.memory_space<vmem>>, vector<1x1280xf32>
    %19 = vector.broadcast %18 : vector<1x1280xf32> to vector<8x1280xf32>
    %20 = arith.addf %17, %19 : vector<8x1280xf32>
    %21 = vector.extract_strided_slice %20 {offsets = [0, 0], sizes = [8, 256], strides = [1, 1]} : vector<8x1280xf32> to vector<8x256xf32>
    %22 = vector.extract_strided_slice %20 {offsets = [0, 256], sizes = [8, 256], strides = [1, 1]} : vector<8x1280xf32> to vector<8x256xf32>
    %23 = arith.maximumf %21, %22 : vector<8x256xf32>
    %24 = vector.extract_strided_slice %20 {offsets = [0, 512], sizes = [8, 256], strides = [1, 1]} : vector<8x1280xf32> to vector<8x256xf32>
    %25 = arith.maximumf %23, %24 : vector<8x256xf32>
    %26 = vector.extract_strided_slice %20 {offsets = [0, 768], sizes = [8, 256], strides = [1, 1]} : vector<8x1280xf32> to vector<8x256xf32>
    %27 = arith.maximumf %25, %26 : vector<8x256xf32>
    %28 = vector.extract_strided_slice %20 {offsets = [0, 1024], sizes = [8, 256], strides = [1, 1]} : vector<8x1280xf32> to vector<8x256xf32>
    %29 = arith.maximumf %27, %28 : vector<8x256xf32>
    %c0_10 = arith.constant 0 : index
    %c0_11 = arith.constant 0 : index
    %30 = vector.load %arg6[%c0_10, %c0_11] : memref<1x256xf32, #tpu.memory_space<vmem>>, vector<1x256xf32>
    %31 = vector.broadcast %30 : vector<1x256xf32> to vector<8x256xf32>
    %32 = arith.mulf %29, %31 : vector<8x256xf32>
    %cst_12 = arith.constant dense<0.000000e+00> : vector<8xf32>
    %33 = vector.multi_reduction <add>, %32, %cst_12 [1] : vector<8x256xf32> to vector<8xf32>
    %34 = vector.shape_cast %33 : vector<8xf32> to vector<8x1xf32>
    %c0_13 = arith.constant 0 : index
    %c0_14 = arith.constant 0 : index
    %35 = vector.load %arg7[%c0_13, %c0_14] : memref<1x1xf32, #tpu.memory_space<vmem>>, vector<1x1xf32>
    %36 = vector.broadcast %35 : vector<1x1xf32> to vector<8x1xf32>
    %37 = arith.addf %34, %36 : vector<8x1xf32>
    %cst_15 = arith.constant 0.000000e+00 : f32
    %38 = vector.broadcast %cst_15 : f32 to vector<8x1xf32>
    %39 = arith.subf %38, %37 : vector<8x1xf32>
    %40 = math.exp %39 : vector<8x1xf32>
    %cst_16 = arith.constant 1.000000e+00 : f32
    %41 = vector.broadcast %cst_16 : f32 to vector<8x1xf32>
    %42 = arith.addf %41, %40 : vector<8x1xf32>
    %cst_17 = arith.constant 1.000000e+00 : f32
    %43 = vector.broadcast %cst_17 : f32 to vector<8x1xf32>
    %44 = arith.divf %43, %42 : vector<8x1xf32>
    %c0_18 = arith.constant 0 : index
    %c0_19 = arith.constant 0 : index
    %45 = vector.load %arg8[%c0_18, %c0_19] : memref<8x1xf32, #tpu.memory_space<vmem>>, vector<8x1xf32>
    tpu.vector_store %arg8[%c0_18, %c0_19], %44 {strides = array<i32>} : memref<8x1xf32, #tpu.memory_space<vmem>>, vector<8x1xf32>,
    return
  }
  func.func @transform_0(%arg0: i32) -> (i32, i32) {
    %c0_i32 = arith.constant 0 : i32
    %c0_i32_0 = arith.constant 0 : i32
    return %arg0, %c0_i32 : i32, i32
  }
  func.func @transform_1(%arg0: i32) -> (i32, i32) {
    %c0_i32 = arith.constant 0 : i32
    %c0_i32_0 = arith.constant 0 : i32
    %c0_i32_1 = arith.constant 0 : i32
    return %c0_i32, %c0_i32_0 : i32, i32
  }
  func.func @transform_2(%arg0: i32) -> (i32, i32) {
    %c0_i32 = arith.constant 0 : i32
    %c0_i32_0 = arith.constant 0 : i32
    %c0_i32_1 = arith.constant 0 : i32
    return %c0_i32, %c0_i32_0 : i32, i32
  }
  func.func @transform_3(%arg0: i32) -> (i32, i32) {
    %c0_i32 = arith.constant 0 : i32
    %c0_i32_0 = arith.constant 0 : i32
    %c0_i32_1 = arith.constant 0 : i32
    return %c0_i32, %c0_i32_0 : i32, i32
  }
  func.func @transform_4(%arg0: i32) -> (i32, i32) {
    %c0_i32 = arith.constant 0 : i32
    %c0_i32_0 = arith.constant 0 : i32
    %c0_i32_1 = arith.constant 0 : i32
    return %c0_i32, %c0_i32_0 : i32, i32
  }
  func.func @transform_5(%arg0: i32) -> (i32, i32) {
    %c0_i32 = arith.constant 0 : i32
    %c0_i32_0 = arith.constant 0 : i32
    %c0_i32_1 = arith.constant 0 : i32
    return %c0_i32, %c0_i32_0 : i32, i32
  }
  func.func @transform_6(%arg0: i32) -> (i32, i32) {
    %c0_i32 = arith.constant 0 : i32
    %c0_i32_0 = arith.constant 0 : i32
    %c0_i32_1 = arith.constant 0 : i32
    return %c0_i32, %c0_i32_0 : i32, i32
  }
  func.func @transform_7(%arg0: i32) -> (i32, i32) {
    %c0_i32 = arith.constant 0 : i32
    %c0_i32_0 = arith.constant 0 : i32
    return %arg0, %c0_i32 : i32, i32
  }
}

</mosaic_0001>

<bundles_post_ra>
// kernel: tpu_custom_call.1
= control target key start
LH: loop header
LB: loop body
LE: loop exit
PB: predicated region body
PF: predicated region fallthrough
CT: control target
= control target key end

     0   :  { %s9784_s0 = inlined_call_operand.hbm [shape: bf16[8,896], index: 0, kind: input, shape index: {}]   ;;  %s9785_s1 = inlined_call_operand.hbm [shape: bf16[896,1280], index: 1, kind: input, shape index: {}]   ;;  %s9786_s2 = inlined_call_operand.hbm [shape: f32[1,1280], index: 2, kind: input, shape index: {}]   ;;  %s9787_s3 = inlined_call_operand.hbm [shape: bf16[256,1280], index: 3, kind: input, shape index: {}]   ;;  %s9788_s4 = inlined_call_operand.hbm [shape: f32[1,1280], index: 4, kind: input, shape index: {}]   ;;  %s9789_s5 = inlined_call_operand.hbm [shape: f32[1,256], index: 5, kind: input, shape index: {}]   ;;  %s9790_s6 = inlined_call_operand.<no memory space> [shape: f32[1,1], index: 6, kind: input, shape index: {}]   ;;  %s9791_s7 = inlined_call_operand.vmem [shape: f32[8,1], index: 7, kind: output, shape index: {}]  }
   0x1   :  { %v12_v0 = vstv %s9790_s6 }
   0x2   :  { %13 = vst [vmem:[#allocation2] sm:$0x1] %v12_v0 }
   0x3   :  { %14 = vsyncpa [#allocation4], 0 }
   0x4   :  { %15 = vsyncpa [#allocation6], 0 }
   0x5   :  { %16 = vsyncpa [#allocation9], 0  ;;  %s33_s28 = sshll.u32 %s9785_s1, 4  ;;  %s34_s28 = int_to_ptr.hbm [resolvable:$true] %s33_s28 }
   0x6   :  { %17 = vsyncpa [#allocation12], 0  ;;  %s9511_s29 = smov [#allocation5]   ;;  %s57_s10 = sshll.u32 %s9787_s3, 4  ;;  %s58_s10 = int_to_ptr.hbm [resolvable:$true] %s57_s10 }
   0x7   :  { %s35_s30 = sshll.u32 %s9511_s29, 4  ;;  %s9512_s11 = smov 640   ;;  %s36_s30 = int_to_ptr.vmem [resolvable:$true] %s35_s30 }
   0x8   :  { %s9513_s12 = smov 40   ;;  %s9514_s6 = smov [#allocation8]  }
   0x9   :  { %41 = dma.hbm_to_vmem [thread:$0]  %s34_s28, 71680, %s36_s30, [#allocation6], %s9512_s11, %s9512_s11, %s9513_s12  }
   0xa   :  { %s59_s13 = sshll.u32 %s9514_s6, 4  ;;  %s23_s16 = sshll.u32 %s9784_s0, 4  ;;  %s60_s13 = int_to_ptr.vmem [resolvable:$true] %s59_s13  ;;  %s24_s16 = int_to_ptr.hbm [resolvable:$true] %s23_s16 }
   0xb   :  { %65 = dma.hbm_to_vmem [thread:$0]  %s58_s10, 20480, %s60_s13, [#allocation9], %s9512_s11, %s9512_s11, %s9513_s12  }
   0xc   :  { %s47_s18 = sshll.u32 %s9786_s2, 4  ;;  %s9515_s19 = smov [#allocation3]   ;;  %s48_s18 = int_to_ptr.hbm [resolvable:$true] %s47_s18 }
   0xd   :  { %s25_s20 = sshll.u32 %s9515_s19, 4  ;;  %s9516_s3 = smov [#allocation7]   ;;  %s26_s20 = int_to_ptr.vmem [resolvable:$true] %s25_s20 }
   0xe   :  { %28 = dma.hbm_to_vmem [thread:$0]  %s24_s16, 448, %s26_s20, [#allocation4]  }
   0xf   :  { %s49_s21 = sshll.u32 %s9516_s3, 4  ;;  %s71_s24 = sshll.u32 %s9788_s4, 4  ;;  %s50_s21 = int_to_ptr.vmem [resolvable:$true] %s49_s21  ;;  %s72_s24 = int_to_ptr.hbm [resolvable:$true] %s71_s24 }
  0x10   :  { %52 = dma.hbm_to_vmem [thread:$0]  %s48_s18, 160, %s50_s21, [#allocation6]  }
  0x11   :  { %s82_s26 = sshll.u32 %s9789_s5, 4  ;;  %s9517_s27 = smov [#allocation10]   ;;  %s83_s26 = int_to_ptr.hbm [resolvable:$true] %s82_s26 }
  0x12   :  { %s73_s2 = sshll.u32 %s9517_s27, 4  ;;  %s9518_s28 = smov [#allocation11]   ;;  %s74_s2 = int_to_ptr.vmem [resolvable:$true] %s73_s2 }
  0x13   :  { %76 = dma.hbm_to_vmem [thread:$0]  %s72_s24, 160, %s74_s2, [#allocation9]  }
  0x14   :  { %s84_s29 = sshll.u32 %s9518_s28, 4  ;;  %s85_s29 = int_to_ptr.vmem [resolvable:$true] %s84_s29 }
  0x15   :  { %87 = dma.hbm_to_vmem [thread:$0]  %s83_s26, 32, %s85_s29, [#allocation12]  }
  0x16   :  { %9503 = dma.done.wait [#allocation4], 448  }
  0x17   :  { %9504 = vsyncadd [#allocation4], 4294966848 }
  0x18   :  { %9505 = dma.done.wait [#allocation6], 71840  }
  0x19   :  { %9506 = vsyncadd [#allocation6], 4294895456 }
  0x1a   :  { %9507 = dma.done.wait [#allocation9], 20640  }
  0x1b   :  { %9508 = vsyncadd [#allocation9], 4294946656 }
  0x1c   :  { %9509 = dma.done.wait [#allocation12], 32  }
  0x1d   :  { %9510 = vsyncadd [#allocation12], 4294967264  ;;  %v6026_v1 = vld [vmem:[#allocation5 + $0x230] sm:$0xf]  ;;  %v8699_v2 = vld [vmem:[#allocation5 + $0x254] sm:$0xf0] }
  0x1e   :  { %v6346_v3 = vld [vmem:[#allocation5 + $0x4b0] sm:$0xf]  ;;  %v6027_v4 = vor.u32 %v8699_v2, %v6026_v1  ;;  %v8779_v5 = vld [vmem:[#allocation5 + $0x4d4] sm:$0xf0]  ;;  %v5986_v12 = vld [vmem:[#allocation5 + $0x1e0] sm:$0xf] }
  0x1f   :  { %v6666_v6 = vld [vmem:[#allocation5 + $0x730] sm:$0xf]  ;;  %v8859_v7 = vld [vmem:[#allocation5 + $0x754] sm:$0xf0]  ;;  %v6347_v8 = vor.u32 %v8779_v5, %v6346_v3  ;;  %v8689_v14 = vld [vmem:[#allocation5 + $0x204] sm:$0xf0] }
  0x20   :  { %v6667_v9 = vor.u32 %v8859_v7, %v6666_v6  ;;  %v6986_v10 = vld [vmem:[#allocation5 + $0x9b0] sm:$0xf]  ;;  %v8939_v11 = vld [vmem:[#allocation5 + $0x9d4] sm:$0xf0]  ;;  %3527 = vmatpush.bf16.msra.mxu0 %v6027_v4  ;;  %v6306_v15 = vld [vmem:[#allocation5 + $0x460] sm:$0xf]  ;;  %v5987_v17 = vor.u32 %v8689_v14, %v5986_v12 }
  0x21   :  { %v6987_v13 = vor.u32 %v8939_v11, %v6986_v10  ;;  %v8769_v16 = vld [vmem:[#allocation5 + $0x484] sm:$0xf0]  ;;  %3540 = vmatpush.bf16.msra.mxu1 %v6347_v8  ;;  %v6626_v19 = vld [vmem:[#allocation5 + $0x6e0] sm:$0xf]  ;;  %v5946_v24 = vld [vmem:[#allocation5 + $0x190] sm:$0xf] }
  0x22   :  { %3553 = vmatpush.bf16.msra.mxu2 %v6667_v9  ;;  %v6307_v18 = vor.u32 %v8769_v16, %v6306_v15  ;;  %v8849_v20 = vld [vmem:[#allocation5 + $0x704] sm:$0xf0]  ;;  %v6946_v21 = vld [vmem:[#allocation5 + $0x960] sm:$0xf]  ;;  %v8679_v25 = vld [vmem:[#allocation5 + $0x1b4] sm:$0xf0] }
  0x23   :  { %3566 = vmatpush.bf16.msra.mxu3 %v6987_v13  ;;  %v6627_v22 = vor.u32 %v8849_v20, %v6626_v19  ;;  %v8929_v23 = vld [vmem:[#allocation5 + $0x984] sm:$0xf0]  ;;  %v6266_v27 = vld [vmem:[#allocation5 + $0x410] sm:$0xf]  ;;  %v8759_v28 = vld [vmem:[#allocation5 + $0x434] sm:$0xf0]  ;;  %v5947_v30 = vor.u32 %v8679_v25, %v5946_v24 }
  0x24   :  { %v6947_v26 = vor.u32 %v8929_v23, %v6946_v21  ;;  %v6586_v29 = vld [vmem:[#allocation5 + $0x690] sm:$0xf]  ;;  %3528 = vmatpush.bf16.msra.mxu0 %v5987_v17  ;;  %v8839_v31 = vld [vmem:[#allocation5 + $0x6b4] sm:$0xf0]  ;;  %v6267_v34 = vor.u32 %v8759_v28, %v6266_v27  ;;  %v5906_v36 = vld [vmem:[#allocation5 + $0x140] sm:$0xf] }
  0x25   :  { %v6906_v32 = vld [vmem:[#allocation5 + $0x910] sm:$0xf]  ;;  %v8919_v33 = vld [vmem:[#allocation5 + $0x934] sm:$0xf0]  ;;  %3541 = vmatpush.bf16.msra.mxu1 %v6307_v18  ;;  %v6587_v35 = vor.u32 %v8839_v31, %v6586_v29  ;;  %v8669_v37 = vld [vmem:[#allocation5 + $0x164] sm:$0xf0] }
  0x26   :  { %3554 = vmatpush.bf16.msra.mxu2 %v6627_v22  ;;  %v6226_v38 = vld [vmem:[#allocation5 + $0x3c0] sm:$0xf]  ;;  %v6907_v39 = vor.u32 %v8919_v33, %v6906_v32  ;;  %v8749_v40 = vld [vmem:[#allocation5 + $0x3e4] sm:$0xf0]  ;;  %v5907_v45 = vor.u32 %v8669_v37, %v5906_v36  ;;  %v5866_v48 = vld [vmem:[#allocation5 + $0xf0] sm:$0xf] }
  0x27   :  { %3567 = vmatpush.bf16.msra.mxu3 %v6947_v26  ;;  %v6546_v41 = vld [vmem:[#allocation5 + $0x640] sm:$0xf]  ;;  %v8829_v42 = vld [vmem:[#allocation5 + $0x664] sm:$0xf0]  ;;  %v6227_v46 = vor.u32 %v8749_v40, %v6226_v38  ;;  %v8659_v49 = vld [vmem:[#allocation5 + $0x114] sm:$0xf0] }
  0x28   :  { %v6866_v43 = vld [vmem:[#allocation5 + $0x8c0] sm:$0xf]  ;;  %v8909_v44 = vld [vmem:[#allocation5 + $0x8e4] sm:$0xf0]  ;;  %3529 = vmatpush.bf16.msra.mxu0 %v5947_v30  ;;  %v6547_v47 = vor.u32 %v8829_v42, %v6546_v41  ;;  %v6186_v50 = vld [vmem:[#allocation5 + $0x370] sm:$0xf]  ;;  %v5867_v57 = vor.u32 %v8659_v49, %v5866_v48 }
  0x29   :  { %3542 = vmatpush.bf16.msra.mxu1 %v6267_v34  ;;  %v6867_v51 = vor.u32 %v8909_v44, %v6866_v43  ;;  %v8739_v52 = vld [vmem:[#allocation5 + $0x394] sm:$0xf0]  ;;  %v6506_v53 = vld [vmem:[#allocation5 + $0x5f0] sm:$0xf]  ;;  %v5826_v60 = vld [vmem:[#allocation5 + $0xa0] sm:$0xf] }
  0x2a   :  { %3555 = vmatpush.bf16.msra.mxu2 %v6587_v35  ;;  %v8819_v54 = vld [vmem:[#allocation5 + $0x614] sm:$0xf0]  ;;  %v6826_v55 = vld [vmem:[#allocation5 + $0x870] sm:$0xf]  ;;  %v6187_v58 = vor.u32 %v8739_v52, %v6186_v50  ;;  %v8649_v61 = vld [vmem:[#allocation5 + $0xc4] sm:$0xf0] }
  0x2b   :  { %3568 = vmatpush.bf16.msra.mxu3 %v6907_v39  ;;  %v8899_v56 = vld [vmem:[#allocation5 + $0x894] sm:$0xf0]  ;;  %v6507_v59 = vor.u32 %v8819_v54, %v6506_v53  ;;  %v6146_v62 = vld [vmem:[#allocation5 + $0x320] sm:$0xf]  ;;  %v8729_v0 = vld [vmem:[#allocation5 + $0x344] sm:$0xf0]  ;;  %v5827_v5 = vor.u32 %v8649_v61, %v5826_v60 }
  0x2c   :  { %3530 = vmatpush.bf16.msra.mxu0 %v5907_v45  ;;  %v6827_v63 = vor.u32 %v8899_v56, %v6826_v55  ;;  %v6466_v1 = vld [vmem:[#allocation5 + $0x5a0] sm:$0xf]  ;;  %v8809_v2 = vld [vmem:[#allocation5 + $0x5c4] sm:$0xf0]  ;;  %v6147_v6 = vor.u32 %v8729_v0, %v6146_v62  ;;  %v5786_v8 = vld [vmem:[#allocation5 + $0x50] sm:$0xf] }
  0x2d   :  { %3543 = vmatpush.bf16.msra.mxu1 %v6227_v46  ;;  %v6786_v3 = vld [vmem:[#allocation5 + $0x820] sm:$0xf]  ;;  %v8889_v4 = vld [vmem:[#allocation5 + $0x844] sm:$0xf0]  ;;  %v6467_v7 = vor.u32 %v8809_v2, %v6466_v1  ;;  %v8639_v9 = vld [vmem:[#allocation5 + $0x74] sm:$0xf0] }
  0x2e   :  { %3556 = vmatpush.bf16.msra.mxu2 %v6547_v47  ;;  %v6106_v10 = vld [vmem:[#allocation5 + $0x2d0] sm:$0xf]  ;;  %v6787_v11 = vor.u32 %v8889_v4, %v6786_v3  ;;  %v8719_v12 = vld [vmem:[#allocation5 + $0x2f4] sm:$0xf0]  ;;  %v5787_v17 = vor.u32 %v8639_v9, %v5786_v8  ;;  %v5746_v18 = vld [vmem:[#allocation5] sm:$0xf] }
  0x2f   :  { %3569 = vmatpush.bf16.msra.mxu3 %v6867_v51  ;;  %v6426_v13 = vld [vmem:[#allocation5 + $0x550] sm:$0xf]  ;;  %v8799_v14 = vld [vmem:[#allocation5 + $0x574] sm:$0xf0]  ;;  %v8629_v19 = vld [vmem:[#allocation5 + $0x24] sm:$0xf0]  ;;  %v6107_v20 = vor.u32 %v8719_v12, %v6106_v10 }
  0x30   :  { %3531 = vmatpush.bf16.msra.mxu0 %v5867_v57  ;;  %v6746_v15 = vld [vmem:[#allocation5 + $0x7d0] sm:$0xf]  ;;  %v8879_v16 = vld [vmem:[#allocation5 + $0x7f4] sm:$0xf0]  ;;  %v6427_v21 = vor.u32 %v8799_v14, %v6426_v13  ;;  %v6066_v22 = vld [vmem:[#allocation5 + $0x280] sm:$0xf]  ;;  %v5747_v32 = vor.u32 %v8629_v19, %v5746_v18 }
  0x31   :  { %3544 = vmatpush.bf16.msra.mxu1 %v6187_v58  ;;  %v8709_v23 = vld [vmem:[#allocation5 + $0x2a4] sm:$0xf0]  ;;  %v6386_v24 = vld [vmem:[#allocation5 + $0x500] sm:$0xf]  ;;  %v6747_v25 = vor.u32 %v8879_v16, %v6746_v15  ;;  %v7306_v27 = vld [vmem:[#allocation5 + $0xc30] sm:$0xf] }
  0x32   :  { %3557 = vmatpush.bf16.msra.mxu2 %v6507_v59  ;;  %v8789_v26 = vld [vmem:[#allocation5 + $0x524] sm:$0xf0]  ;;  %v9019_v28 = vld [vmem:[#allocation5 + $0xc54] sm:$0xf0]  ;;  %v7626_v29 = vld [vmem:[#allocation5 + $0xeb0] sm:$0xf]  ;;  %v6067_v36 = vor.u32 %v8709_v23, %v6066_v22 }
  0x33   :  { %3570 = vmatpush.bf16.msra.mxu3 %v6827_v63  ;;  %v9099_v30 = vld [vmem:[#allocation5 + $0xed4] sm:$0xf0]  ;;  %v7946_v31 = vld [vmem:[#allocation5 + $0x1130] sm:$0xf]  ;;  %v6706_v34 = vld [vmem:[#allocation5 + $0x780] sm:$0xf]  ;;  %v6387_v37 = vor.u32 %v8789_v26, %v6386_v24  ;;  %v7307_v40 = vor.u32 %v9019_v28, %v7306_v27 }
  0x34   :  { %3532 = vmatpush.bf16.msra.mxu0 %v5827_v5  ;;  %v9179_v33 = vld [vmem:[#allocation5 + $0x1154] sm:$0xf0]  ;;  %v8869_v35 = vld [vmem:[#allocation5 + $0x7a4] sm:$0xf0]  ;;  %v8694_v38 = vld [vmem:[#allocation5 + $0x234] sm:$0xf]  ;;  %v7627_v41 = vor.u32 %v9099_v30, %v7626_v29 }
  0x35   :  { %3545 = vmatpush.bf16.msra.mxu1 %v6147_v6  ;;  %v6028_v39 = vld [vmem:[#allocation5 + $0x258] sm:$0xf0]  ;;  %v7266_v42 = vld [vmem:[#allocation5 + $0xbe0] sm:$0xf]  ;;  %v7947_v43 = vor.u32 %v9179_v33, %v7946_v31  ;;  %v6707_v44 = vor.u32 %v8869_v35, %v6706_v34  ;;  %v9009_v45 = vld [vmem:[#allocation5 + $0xc04] sm:$0xf0] }
  0x36   :  { %3558 = vmatpush.bf16.msra.mxu2 %v6467_v7  ;;  %v7586_v46 = vld [vmem:[#allocation5 + $0xe60] sm:$0xf]  ;;  %v9089_v47 = vld [vmem:[#allocation5 + $0xe84] sm:$0xf0]  ;;  %v6031_v48 = vor.u32 %v8694_v38, %v6028_v39  ;;  %v8684_v51 = vld [vmem:[#allocation5 + $0x1e4] sm:$0xf]  ;;  %v7267_v53 = vor.u32 %v9009_v45, %v7266_v42 }
  0x37   :  { %3571 = vmatpush.bf16.msra.mxu3 %v6787_v11  ;;  %v7906_v49 = vld [vmem:[#allocation5 + $0x10e0] sm:$0xf]  ;;  %v9169_v50 = vld [vmem:[#allocation5 + $0x1104] sm:$0xf0]  ;;  %v5988_v52 = vld [vmem:[#allocation5 + $0x208] sm:$0xf0]  ;;  %v7587_v54 = vor.u32 %v9089_v47, %v7586_v46 }
  0x38   :  { %3533 = vmatpush.bf16.msra.mxu0 %v5787_v17  ;;  %v7226_v55 = vld [vmem:[#allocation5 + $0xb90] sm:$0xf]  ;;  %v8999_v56 = vld [vmem:[#allocation5 + $0xbb4] sm:$0xf0]  ;;  %v7907_v57 = vor.u32 %v9169_v50, %v7906_v49  ;;  %v5991_v61 = vor.u32 %v8684_v51, %v5988_v52  ;;  %v8674_v2 = vld [vmem:[#allocation5 + $0x194] sm:$0xf] }
  0x39   :  { %3546 = vmatpush.bf16.msra.mxu1 %v6107_v20  ;;  %v7546_v58 = vld [vmem:[#allocation5 + $0xe10] sm:$0xf]  ;;  %v9079_v59 = vld [vmem:[#allocation5 + $0xe34] sm:$0xf0]  ;;  %v5948_v3 = vld [vmem:[#allocation5 + $0x1b8] sm:$0xf0]  ;;  %v7227_v4 = vor.u32 %v8999_v56, %v7226_v55 }
  0x3a   :  { %3559 = vmatpush.bf16.msra.mxu2 %v6427_v21  ;;  %v115_v60 = vld [vmem:[#allocation3 + $0x8] sm:$0xff]  ;;  %v9159_v63 = vld [vmem:[#allocation5 + $0x10b4] sm:$0xf0]  ;;  %v7547_v5 = vor.u32 %v9079_v59, %v7546_v58  ;;  %v7186_v6 = vld [vmem:[#allocation5 + $0xb40] sm:$0xf]  ;;  %v5951_v16 = vor.u32 %v8674_v2, %v5948_v3  ;;  %vm5734_vm3 = vcmask 7168  }
  0x3b   :  { %3572 = vmatpush.bf16.msra.mxu3 %v6747_v25  ;;  %v7866_v62 = vld [vmem:[#allocation5 + $0x1090] sm:$0xf]  ;;  %v708_v0 = vunpack.c.l.b16 %v115_v60  ;;  %v709_v1 = vunpack.c.h.b16 %v115_v60  ;;  %v114_v8 = vld [vmem:[#allocation3] sm:$0xff]  ;;  %v7506_v11 = vld [vmem:[#allocation5 + $0xdc0] sm:$0xf] }
  0x3c   :  { %3534 = vmatpush.bf16.msra.mxu0 %v5747_v32  ;;  %v7867_v9 = vor.u32 %v9159_v63, %v7866_v62  ;;  %v8989_v10 = vld [vmem:[#allocation5 + $0xb64] sm:$0xf0]  ;;  %v706_v13 = vunpack.c.l.b16 %v114_v8  ;;  %v707_v14 = vunpack.c.h.b16 %v114_v8  ;;  %v7826_v17 = vld [vmem:[#allocation5 + $0x1040] sm:$0xf]  ;;  %v8664_v19 = vld [vmem:[#allocation5 + $0x144] sm:$0xf] }
  0x3d   :  { %3547 = vmatpush.bf16.msra.mxu1 %v6067_v36  ;;  %v9580_v7 = vpack.c.b16 %v708_v0, %v708_v0  ;;  %v9069_v12 = vld [vmem:[#allocation5 + $0xde4] sm:$0xf0]  ;;  %v9582_v15 = vpack.c.b16 %v709_v1, %v709_v1  ;;  %v5908_v20 = vld [vmem:[#allocation5 + $0x168] sm:$0xf0]  ;;  %v7187_v23 = vor.u32 %v8989_v10, %v7186_v6  ;;  %v7146_v25 = vld [vmem:[#allocation5 + $0xaf0] sm:$0xf] }
  0x3e   :  { %3560 = vmatpush.bf16.msra.mxu2 %v6387_v37  ;;  %v9149_v18 = vld [vmem:[#allocation5 + $0x1064] sm:$0xf0]  ;;  %v9585_v21 = vpack.c.b16 %v706_v13, %v706_v13  ;;  %v9587_v22 = vpack.c.b16 %v707_v14, %v707_v14  ;;  %v7507_v24 = vor.u32 %v9069_v12, %v7506_v11  ;;  %v8979_v27 = vld [vmem:[#allocation5 + $0xb14] sm:$0xf0]  ;;  %v7466_v28 = vld [vmem:[#allocation5 + $0xd70] sm:$0xf]  ;;  %v5911_v30 = vor.u32 %v8664_v19, %v5908_v20 }
  0x3f   :  { %3573 = vmatpush.bf16.msra.mxu3 %v6707_v44  ;;  %v7827_v26 = vor.u32 %v9149_v18, %v7826_v17  ;;  %v9059_v29 = vld [vmem:[#allocation5 + $0xd94] sm:$0xf0]  ;;  %v7786_v31 = vld [vmem:[#allocation5 + $0xff0] sm:$0xf]  ;;  %v8654_v33 = vld [vmem:[#allocation5 + $0xf4] sm:$0xf]  ;;  %v7147_v35 = vor.u32 %v8979_v27, %v7146_v25 }
  0x40   :  { %3579 = vmatpush.bf16.msrb.mxu0 %v7307_v40  ;;  %v9139_v32 = vld [vmem:[#allocation5 + $0x1014] sm:$0xf0]  ;;  %3548 = vmatmul.bf16.vlgmr.msra.gmra.mxu1 %v9587_v22  ;;  %v5868_v34 = vld [vmem:[#allocation5 + $0x118] sm:$0xf0]  ;;  %v7467_v36 = vor.u32 %v9059_v29, %v7466_v28  ;;  %v7106_v37 = vld [vmem:[#allocation5 + $0xaa0] sm:$0xf] }
  0x41   :  { %3592 = vmatpush.bf16.msrb.mxu1 %v7627_v41  ;;  %3561 = vmatmul.bf16.vlgmr.msra.gmra.mxu2 %v9580_v7  ;;  %v7787_v38 = vor.u32 %v9139_v32, %v7786_v31  ;;  %v8969_v39 = vld [vmem:[#allocation5 + $0xac4] sm:$0xf0]  ;;  %v7426_v40 = vld [vmem:[#allocation5 + $0xd20] sm:$0xf]  ;;  %v5871_v42 = vor.u32 %v8654_v33, %v5868_v34  ;;  %v8644_v45 = vld [vmem:[#allocation5 + $0xa4] sm:$0xf] }
  0x42   :  { %3605 = vmatpush.bf16.msrb.mxu2 %v7947_v43  ;;  %3574 = vmatmul.bf16.vlgmr.msra.gmra.mxu3 %v9582_v15  ;;  %v9049_v41 = vld [vmem:[#allocation5 + $0xd44] sm:$0xf0]  ;;  %v7746_v43 = vld [vmem:[#allocation5 + $0xfa0] sm:$0xf]  ;;  %v5828_v46 = vld [vmem:[#allocation5 + $0xc8] sm:$0xf0]  ;;  %v7107_v47 = vor.u32 %v8969_v39, %v7106_v37 }
  0x43   :  { %3618 = vmatpush.bf16.msrb.mxu3 %v6031_v48  ;;  %3535 = vmatmul.bf16.vlgmr.msra.gmra.mxu0 %v9585_v21  ;;  %v9129_v44 = vld [vmem:[#allocation5 + $0xfc4] sm:$0xf0]  ;;  %v7427_v48 = vor.u32 %v9049_v41, %v7426_v40  ;;  %v7066_v49 = vld [vmem:[#allocation5 + $0xa50] sm:$0xf]  ;;  %v8959_v51 = vld [vmem:[#allocation5 + $0xa74] sm:$0xf0] }
  0x44   :  { %3580 = vmatpush.bf16.msrb.mxu0 %v7267_v53  ;;  %v7747_v50 = vor.u32 %v9129_v44, %v7746_v43  ;;  %v7386_v52 = vld [vmem:[#allocation5 + $0xcd0] sm:$0xf]  ;;  %v9039_v53 = vld [vmem:[#allocation5 + $0xcf4] sm:$0xf0]  ;;  %v5788_v58 = vld [vmem:[#allocation5 + $0x78] sm:$0xf0] }
  0x45   :  { %3593 = vmatpush.bf16.msrb.mxu1 %v7587_v54  ;;  %v5831_v54 = vor.u32 %v8644_v45, %v5828_v46  ;;  %v7706_v55 = vld [vmem:[#allocation5 + $0xf50] sm:$0xf]  ;;  %v9119_v56 = vld [vmem:[#allocation5 + $0xf74] sm:$0xf0]  ;;  %v7026_v59 = vld [vmem:[#allocation5 + $0xa00] sm:$0xf]  ;;  %v7387_v62 = vor.u32 %v9039_v53, %v7386_v52 }
  0x46   :  { %3606 = vmatpush.bf16.msrb.mxu2 %v7907_v57  ;;  %v8634_v57 = vld [vmem:[#allocation5 + $0x54] sm:$0xf]  ;;  %v8949_v60 = vld [vmem:[#allocation5 + $0xa24] sm:$0xf0]  ;;  %v7346_v63 = vld [vmem:[#allocation5 + $0xc80] sm:$0xf]  ;;  %v7707_v2 = vor.u32 %v9119_v56, %v7706_v55 }
  0x47   :  { %3619 = vmatpush.bf16.msrb.mxu3 %v5991_v61  ;;  %v7067_v61 = vor.u32 %v8959_v51, %v7066_v49  ;;  %v9029_v0 = vld [vmem:[#allocation5 + $0xca4] sm:$0xf0]  ;;  %v116_v1 = vld [vmem:[#allocation3 + $0x10] sm:$0xff]  ;;  %v7666_v3 = vld [vmem:[#allocation5 + $0xf00] sm:$0xf]  ;;  %v5791_v6 = vor.u32 %v8634_v57, %v5788_v58 }
  0x48   :  { %3581 = vmatpush.bf16.msrb.mxu0 %v7227_v4  ;;  %v9109_v4 = vld [vmem:[#allocation5 + $0xf24] sm:$0xf0]  ;;  %v8774_v8 = vld [vmem:[#allocation5 + $0x4b4] sm:$0xf]  ;;  %v6668_v11 = vld [vmem:[#allocation5 + $0x758] sm:$0xf0]  ;;  %v710_v14 = vunpack.c.l.b16 %v116_v1  ;;  %v7347_v17 = vor.u32 %v9029_v0, %v7346_v63  ;;  %v711_v27 = vunpack.c.h.b16 %v116_v1 }
  0x49   :  { %3594 = vmatpush.bf16.msrb.mxu1 %v7547_v5  ;;  %v117_v5 = vld [vmem:[#allocation3 + $0x18] sm:$0xf]  ;;  %v8854_v10 = vld [vmem:[#allocation5 + $0x734] sm:$0xf]  ;;  %v8624_v18 = vld [vmem:[#allocation5 + $0x4] sm:$0xf] }
  0x4a   :  { %3607 = vmatpush.bf16.msrb.mxu2 %v7867_v9  ;;  %v6348_v9 = vld [vmem:[#allocation5 + $0x4d8] sm:$0xf0]  ;;  %v8934_v12 = vld [vmem:[#allocation5 + $0x9b4] sm:$0xf]  ;;  %v5748_v19 = vld [vmem:[#allocation5 + $0x28] sm:$0xf0]  ;;  %v712_v20 = vunpack.c.l.b16 %v117_v5  ;;  %v6671_v28 = vor.u32 %v8854_v10, %v6668_v11  ;;  %v9592_v37 = vpack.c.b16 %v710_v14, %v710_v14  ;;  %v9596_v43 = vpack.c.b16 %v711_v27, %v711_v27 }
  0x4b   :  { %3620 = vmatpush.bf16.msrb.mxu3 %v5951_v16  ;;  %v6988_v13 = vld [vmem:[#allocation5 + $0x9d8] sm:$0xf0]  ;;  %v7027_v16 = vor.u32 %v8949_v60, %v7026_v59  ;;  %v9014_v25 = vld [vmem:[#allocation5 + $0xc34] sm:$0xf]  ;;  %v6308_v31 = vld [vmem:[#allocation5 + $0x488] sm:$0xf0]  ;;  %v5751_v33 = vor.u32 %v8624_v18, %v5748_v19 }
  0x4c   :  { %3582 = vmatpush.bf16.msrb.mxu0 %v7187_v23  ;;  %v7667_v23 = vor.u32 %v9109_v4, %v7666_v3  ;;  %v6991_v29 = vor.u32 %v8934_v12, %v6988_v13  ;;  %v8844_v32 = vld [vmem:[#allocation5 + $0x6e4] sm:$0xf]  ;;  %v6628_v34 = vld [vmem:[#allocation5 + $0x708] sm:$0xf0]  ;;  %v9594_v39 = vpack.c.b16 %v712_v20, %v712_v20  ;;  %v8754_v46 = vld [vmem:[#allocation5 + $0x414] sm:$0xf] }
  0x4d   :  { %3595 = vmatpush.bf16.msrb.mxu1 %v7507_v24  ;;  %v6351_v24 = vor.u32 %v8774_v8, %v6348_v9  ;;  %v9004_v41 = vld [vmem:[#allocation5 + $0xbe4] sm:$0xf]  ;;  %v6631_v44 = vor.u32 %v8844_v32, %v6628_v34  ;;  %v6588_v49 = vld [vmem:[#allocation5 + $0x6b8] sm:$0xf0]  ;;  %v6228_v59 = vld [vmem:[#allocation5 + $0x3e8] sm:$0xf0] }
  0x4e   :  { %3608 = vmatpush.bf16.msrb.mxu2 %v7827_v26  ;;  %v7308_v26 = vld [vmem:[#allocation5 + $0xc58] sm:$0xf0]  ;;  %v8744_v58 = vld [vmem:[#allocation5 + $0x3c4] sm:$0xf]  ;;  %v6868_v63 = vld [vmem:[#allocation5 + $0x8e8] sm:$0xf0] }
  0x4f   :  { %3621 = vmatpush.bf16.msrb.mxu3 %v5911_v30  ;;  %v8764_v30 = vld [vmem:[#allocation5 + $0x464] sm:$0xf]  ;;  %v6908_v51 = vld [vmem:[#allocation5 + $0x938] sm:$0xf0]  ;;  %v6231_v1 = vor.u32 %v8744_v58, %v6228_v59  ;;  %v7188_v3 = vld [vmem:[#allocation5 + $0xb68] sm:$0xf0] }
  0x50   :  { %3583 = vmatpush.bf16.msrb.mxu0 %v7147_v35  ;;  %v8924_v35 = vld [vmem:[#allocation5 + $0x964] sm:$0xf]  ;;  %v6311_v40 = vor.u32 %v8764_v30, %v6308_v31  ;;  %v7228_v55 = vld [vmem:[#allocation5 + $0xbb8] sm:$0xf0]  ;;  %v8814_v9 = vld [vmem:[#allocation5 + $0x5f4] sm:$0xf] }
  0x51   :  { %3596 = vmatpush.bf16.msrb.mxu1 %v7467_v36  ;;  %v6948_v36 = vld [vmem:[#allocation5 + $0x988] sm:$0xf0]  ;;  %v8824_v60 = vld [vmem:[#allocation5 + $0x644] sm:$0xf]  ;;  %v6188_v8 = vld [vmem:[#allocation5 + $0x398] sm:$0xf0] }
  0x52   :  { %3609 = vmatpush.bf16.msrb.mxu2 %v7787_v38  ;;  %v7311_v38 = vor.u32 %v9014_v25, %v7308_v26  ;;  %v6951_v45 = vor.u32 %v8924_v35, %v6948_v36  ;;  %v6508_v10 = vld [vmem:[#allocation5 + $0x618] sm:$0xf0]  ;;  %v8894_v11 = vld [vmem:[#allocation5 + $0x874] sm:$0xf]  ;;  %v8724_v20 = vld [vmem:[#allocation5 + $0x324] sm:$0xf] }
  0x53   :  { %3622 = vmatpush.bf16.msrb.mxu3 %v5871_v42  ;;  %v7268_v42 = vld [vmem:[#allocation5 + $0xc08] sm:$0xf0]  ;;  %v6828_v12 = vld [vmem:[#allocation5 + $0x898] sm:$0xf0]  ;;  %v6511_v18 = vor.u32 %v8814_v9, %v6508_v10  ;;  %v8884_v26 = vld [vmem:[#allocation5 + $0x824] sm:$0xf] }
  0x54   :  { %3584 = vmatpush.bf16.msrb.mxu0 %v7107_v47  ;;  %v6268_v47 = vld [vmem:[#allocation5 + $0x438] sm:$0xf0]  ;;  %v7271_v52 = vor.u32 %v9004_v41, %v7268_v42  ;;  %v6831_v19 = vor.u32 %v8894_v11, %v6828_v12  ;;  %v6468_v25 = vld [vmem:[#allocation5 + $0x5c8] sm:$0xf0]  ;;  %v8964_v30 = vld [vmem:[#allocation5 + $0xaa4] sm:$0xf] }
  0x55   :  { %3597 = vmatpush.bf16.msrb.mxu1 %v7427_v48  ;;  %v8834_v48 = vld [vmem:[#allocation5 + $0x694] sm:$0xf]  ;;  %v6271_v53 = vor.u32 %v8754_v46, %v6268_v47  ;;  %v6788_v27 = vld [vmem:[#allocation5 + $0x848] sm:$0xf0]  ;;  %v6108_v35 = vld [vmem:[#allocation5 + $0x2f8] sm:$0xf0] }
  0x56   :  { %3610 = vmatpush.bf16.msrb.mxu2 %v7747_v50  ;;  %v8914_v50 = vld [vmem:[#allocation5 + $0x914] sm:$0xf]  ;;  %v6591_v56 = vor.u32 %v8834_v48, %v6588_v49  ;;  %v7108_v31 = vld [vmem:[#allocation5 + $0xac8] sm:$0xf0]  ;;  %v6748_v41 = vld [vmem:[#allocation5 + $0x7f8] sm:$0xf0] }
  0x57   :  { %3623 = vmatpush.bf16.msrb.mxu3 %v5831_v54  ;;  %v8994_v54 = vld [vmem:[#allocation5 + $0xb94] sm:$0xf]  ;;  %v6911_v57 = vor.u32 %v8914_v50, %v6908_v51  ;;  %v7111_v42 = vor.u32 %v8964_v30, %v7108_v31  ;;  %v7068_v46 = vld [vmem:[#allocation5 + $0xa78] sm:$0xf0]  ;;  %v8704_v47 = vld [vmem:[#allocation5 + $0x284] sm:$0xf] }
  0x58   :  { %3585 = vmatpush.bf16.msrb.mxu0 %v7067_v61  ;;  %v6548_v61 = vld [vmem:[#allocation5 + $0x668] sm:$0xf0]  ;;  %v7231_v0 = vor.u32 %v8994_v54, %v7228_v55  ;;  %v8714_v34 = vld [vmem:[#allocation5 + $0x2d4] sm:$0xf]  ;;  %v8784_v51 = vld [vmem:[#allocation5 + $0x504] sm:$0xf] }
  0x59   :  { %3598 = vmatpush.bf16.msrb.mxu1 %v7387_v62  ;;  %v8904_v62 = vld [vmem:[#allocation5 + $0x8c4] sm:$0xf]  ;;  %v6551_v4 = vor.u32 %v8824_v60, %v6548_v61  ;;  %v8794_v36 = vld [vmem:[#allocation5 + $0x554] sm:$0xf]  ;;  %v6068_v48 = vld [vmem:[#allocation5 + $0x2a8] sm:$0xf0] }
  0x5a   :  { %3611 = vmatpush.bf16.msrb.mxu2 %v7707_v2  ;;  %v8984_v2 = vld [vmem:[#allocation5 + $0xb44] sm:$0xf]  ;;  %v6871_v5 = vor.u32 %v8904_v62, %v6868_v63  ;;  %v6708_v54 = vld [vmem:[#allocation5 + $0x7a8] sm:$0xf0]  ;;  %v9094_v55 = vld [vmem:[#allocation5 + $0xeb4] sm:$0xf]  ;;  %v6071_v61 = vor.u32 %v8704_v47, %v6068_v48 }
  0x5b   :  { %3624 = vmatpush.bf16.msrb.mxu3 %v5791_v6  ;;  %v8734_v6 = vld [vmem:[#allocation5 + $0x374] sm:$0xf]  ;;  %v7191_v13 = vor.u32 %v8984_v2, %v7188_v3  ;;  %v7948_v59 = vld [vmem:[#allocation5 + $0x1158] sm:$0xf0]  ;;  %v6034_v60 = vld [vmem:[#allocation5 + $0x238] sm:$0xf] }
  0x5c   :  { %3586 = vmatpush.bf16.msrb.mxu0 %v7027_v16  ;;  %v6191_v14 = vor.u32 %v8734_v6, %v6188_v8  ;;  %v8974_v16 = vld [vmem:[#allocation5 + $0xaf4] sm:$0xf]  ;;  %v8700_v62 = vld [vmem:[#allocation5 + $0x25c] sm:$0xf0]  ;;  %v8944_v63 = vld [vmem:[#allocation5 + $0xa04] sm:$0xf] }
  0x5d   :  { %3599 = vmatpush.bf16.msrb.mxu1 %v7347_v17  ;;  %v7148_v17 = vld [vmem:[#allocation5 + $0xb18] sm:$0xf0]  ;;  %v9174_v58 = vld [vmem:[#allocation5 + $0x1134] sm:$0xf]  ;;  %v6354_v3 = vld [vmem:[#allocation5 + $0x4b8] sm:$0xf]  ;;  %v6035_v9 = vor.u32 %v8700_v62, %v6034_v60 }
  0x5e   :  { %3612 = vmatpush.bf16.msrb.mxu2 %v7667_v23  ;;  %v6148_v23 = vld [vmem:[#allocation5 + $0x348] sm:$0xf0]  ;;  %v7951_v6 = vor.u32 %v9174_v58, %v7948_v59  ;;  %v9084_v8 = vld [vmem:[#allocation5 + $0xe64] sm:$0xf]  ;;  %v5954_v30 = vld [vmem:[#allocation5 + $0x198] sm:$0xf] }
  0x5f   :  { %3625 = vmatpush.bf16.msrb.mxu3 %v5751_v33  ;;  %3587 = vmatmul.bf16.vlgmr.msrb.gmra.mxu0 %v9592_v37  ;;  %v6791_v33 = vor.u32 %v8884_v26, %v6788_v27  ;;  %v7588_v11 = vld [vmem:[#allocation5 + $0xe88] sm:$0xf0]  ;;  %v9164_v12 = vld [vmem:[#allocation5 + $0x10e4] sm:$0xf]  ;;  %v7548_v26 = vld [vmem:[#allocation5 + $0xe38] sm:$0xf0] }
  0x60   :  { %3631 = vmatpush.bf16.msra.mxu0 %v6351_v24  ;;  %3600 = vmatmul.bf16.vlgmr.msrb.gmra.mxu1 %v9596_v43  ;;  %v8804_v24 = vld [vmem:[#allocation5 + $0x5a4] sm:$0xf]  ;;  %v9154_v27 = vld [vmem:[#allocation5 + $0x1094] sm:$0xf]  ;;  %v8680_v31 = vld [vmem:[#allocation5 + $0x1bc] sm:$0xf0] }
  0x61   :  { %3644 = vmatpush.bf16.msra.mxu1 %v6671_v28  ;;  %3613 = vmatmul.bf16.vlgmr.msrb.gmra.mxu2 %v9594_v39  ;;  %v7151_v28 = vor.u32 %v8974_v16, %v7148_v17  ;;  %v6471_v32 = vor.u32 %v8804_v24, %v6468_v25  ;;  %v5994_v16 = vld [vmem:[#allocation5 + $0x1e8] sm:$0xf]  ;;  %v8690_v17 = vld [vmem:[#allocation5 + $0x20c] sm:$0xf0]  ;;  %v9074_v24 = vld [vmem:[#allocation5 + $0xe14] sm:$0xf] }
  0x62   :  { %3657 = vmatpush.bf16.msra.mxu2 %v6991_v29  ;;  %3626 = vmatmul.bf16.vlgmr.msrb.gmra.mxu3 %v9585_v21  ;;  %v6151_v29 = vor.u32 %v8724_v20, %v6148_v23  ;;  %v7591_v20 = vor.u32 %v9084_v8, %v7588_v11  ;;  %v5995_v25 = vor.u32 %v8690_v17, %v5994_v16  ;;  %v6234_v47 = vld [vmem:[#allocation5 + $0x3c8] sm:$0xf]  ;;  %v8750_v48 = vld [vmem:[#allocation5 + $0x3ec] sm:$0xf0]  ;;  %v8660_v58 = vld [vmem:[#allocation5 + $0x11c] sm:$0xf0] }
  0x63   :  { %3670 = vmatpush.bf16.msra.mxu3 %v7311_v38  ;;  %v6428_v38 = vld [vmem:[#allocation5 + $0x578] sm:$0xf0]  ;;  %v6194_v59 = vld [vmem:[#allocation5 + $0x378] sm:$0xf]  ;;  %v8740_v60 = vld [vmem:[#allocation5 + $0x39c] sm:$0xf0] }
  0x64   :  { %3632 = vmatpush.bf16.msra.mxu0 %v6311_v40  ;;  %v8874_v40 = vld [vmem:[#allocation5 + $0x7d4] sm:$0xf]  ;;  %v6431_v49 = vor.u32 %v8794_v36, %v6428_v38  ;;  %v9064_v36 = vld [vmem:[#allocation5 + $0xdc4] sm:$0xf]  ;;  %v5955_v38 = vor.u32 %v8680_v31, %v5954_v30  ;;  %v6154_v8 = vld [vmem:[#allocation5 + $0x328] sm:$0xf] }
  0x65   :  { %3645 = vmatpush.bf16.msra.mxu1 %v6631_v44  ;;  %v8954_v44 = vld [vmem:[#allocation5 + $0xa54] sm:$0xf]  ;;  %v6751_v50 = vor.u32 %v8874_v40, %v6748_v41  ;;  %v7508_v40 = vld [vmem:[#allocation5 + $0xde8] sm:$0xf0]  ;;  %v9144_v41 = vld [vmem:[#allocation5 + $0x1044] sm:$0xf] }
  0x66   :  { %3658 = vmatpush.bf16.msra.mxu2 %v6951_v45  ;;  %v6111_v45 = vor.u32 %v8714_v34, %v6108_v35  ;;  %v7551_v34 = vor.u32 %v9074_v24, %v7548_v26  ;;  %v9114_v16 = vld [vmem:[#allocation5 + $0xf54] sm:$0xf]  ;;  %v7708_v17 = vld [vmem:[#allocation5 + $0xf78] sm:$0xf0]  ;;  %v8720_v24 = vld [vmem:[#allocation5 + $0x2fc] sm:$0xf0] }
  0x67   :  { %3671 = vmatpush.bf16.msra.mxu3 %v7271_v52  ;;  %v6388_v52 = vld [vmem:[#allocation5 + $0x528] sm:$0xf0]  ;;  %v7711_v26 = vor.u32 %v9114_v16, %v7708_v17  ;;  %v6554_v17 = vld [vmem:[#allocation5 + $0x648] sm:$0xf] }
  0x68   :  { %3633 = vmatpush.bf16.msra.mxu0 %v6271_v53  ;;  %v8864_v53 = vld [vmem:[#allocation5 + $0x784] sm:$0xf]  ;;  %v7668_v31 = vld [vmem:[#allocation5 + $0xf28] sm:$0xf0] }
  0x69   :  { %3646 = vmatpush.bf16.msra.mxu1 %v6591_v56  ;;  %v7628_v56 = vld [vmem:[#allocation5 + $0xed8] sm:$0xf0]  ;;  %v6711_v2 = vor.u32 %v8864_v53, %v6708_v54  ;;  %v9134_v54 = vld [vmem:[#allocation5 + $0xff4] sm:$0xf] }
  0x6a   :  { %3659 = vmatpush.bf16.msra.mxu2 %v6911_v57  ;;  %v7071_v57 = vor.u32 %v8954_v44, %v7068_v46  ;;  %v8670_v46 = vld [vmem:[#allocation5 + $0x16c] sm:$0xf0]  ;;  %v7468_v53 = vld [vmem:[#allocation5 + $0xd98] sm:$0xf0] }
  0x6b   :  { %3672 = vmatpush.bf16.msra.mxu3 %v7231_v0  ;;  %v7028_v0 = vld [vmem:[#allocation5 + $0xa28] sm:$0xf0] }
  0x6c   :  { %3634 = vmatpush.bf16.msra.mxu0 %v6231_v1  ;;  %v6391_v1 = vor.u32 %v8784_v51, %v6388_v52  ;;  %v7031_v10 = vor.u32 %v8944_v63, %v7028_v0  ;;  %v9054_v51 = vld [vmem:[#allocation5 + $0xd74] sm:$0xf]  ;;  %v9044_v63 = vld [vmem:[#allocation5 + $0xd24] sm:$0xf] }
  0x6d   :  { %3647 = vmatpush.bf16.msra.mxu1 %v6551_v4  ;;  %v8780_v4 = vld [vmem:[#allocation5 + $0x4dc] sm:$0xf0] }
  0x6e   :  { %3660 = vmatpush.bf16.msra.mxu2 %v6871_v5  ;;  %v7631_v5 = vor.u32 %v9094_v55, %v7628_v56  ;;  %v7788_v55 = vld [vmem:[#allocation5 + $0x1018] sm:$0xf0]  ;;  %v6235_v56 = vor.u32 %v8750_v48, %v6234_v47  ;;  %v8710_v47 = vld [vmem:[#allocation5 + $0x2ac] sm:$0xf0] }
  0x6f   :  { %3673 = vmatpush.bf16.msra.mxu3 %v7191_v13  ;;  %v7908_v13 = vld [vmem:[#allocation5 + $0x1108] sm:$0xf0]  ;;  %v7791_v62 = vor.u32 %v9134_v54, %v7788_v55  ;;  %v6634_v54 = vld [vmem:[#allocation5 + $0x6e8] sm:$0xf]  ;;  %v8850_v55 = vld [vmem:[#allocation5 + $0x70c] sm:$0xf0] }
  0x70   :  { %3635 = vmatpush.bf16.msra.mxu0 %v6191_v14  ;;  %v6355_v14 = vor.u32 %v8780_v4, %v6354_v3  ;;  %v7911_v23 = vor.u32 %v9164_v12, %v7908_v13  ;;  %v7748_v3 = vld [vmem:[#allocation5 + $0xfc8] sm:$0xf0]  ;;  %v6195_v4 = vor.u32 %v8740_v60, %v6194_v59  ;;  %v9034_v12 = vld [vmem:[#allocation5 + $0xcd4] sm:$0xf]  ;;  %v7274_v59 = vld [vmem:[#allocation5 + $0xbe8] sm:$0xf] }
  0x71   :  { %3648 = vmatpush.bf16.msra.mxu1 %v6511_v18  ;;  %v6314_v18 = vld [vmem:[#allocation5 + $0x468] sm:$0xf]  ;;  %v9010_v60 = vld [vmem:[#allocation5 + $0xc0c] sm:$0xf0] }
  0x72   :  { %3661 = vmatpush.bf16.msra.mxu2 %v6831_v19  ;;  %v8770_v19 = vld [vmem:[#allocation5 + $0x48c] sm:$0xf0] }
  0x73   :  { %3674 = vmatpush.bf16.msra.mxu3 %v7151_v28  ;;  %v7868_v28 = vld [vmem:[#allocation5 + $0x10b8] sm:$0xf0] }
  0x74   :  { %3636 = vmatpush.bf16.msra.mxu0 %v6151_v29  ;;  %v6315_v29 = vor.u32 %v8770_v19, %v6314_v18  ;;  %v7871_v35 = vor.u32 %v9154_v27, %v7868_v28  ;;  %v5794_v19 = vld [vmem:[#allocation5 + $0x58] sm:$0xf]  ;;  %v9024_v27 = vld [vmem:[#allocation5 + $0xc84] sm:$0xf]  ;;  %v7348_v28 = vld [vmem:[#allocation5 + $0xca8] sm:$0xf0] }
  0x75   :  { %3649 = vmatpush.bf16.msra.mxu1 %v6471_v32  ;;  %v6274_v32 = vld [vmem:[#allocation5 + $0x418] sm:$0xf] }
  0x76   :  { %3662 = vmatpush.bf16.msra.mxu2 %v6791_v33  ;;  %v8760_v33 = vld [vmem:[#allocation5 + $0x43c] sm:$0xf0] }
  0x77   :  { %3675 = vmatpush.bf16.msra.mxu3 %v7111_v42  ;;  %v7828_v42 = vld [vmem:[#allocation5 + $0x1068] sm:$0xf0]  ;;  %v6275_v44 = vor.u32 %v8760_v33, %v6274_v32  ;;  %v5754_v32 = vld [vmem:[#allocation5 + $0x8] sm:$0xf]  ;;  %v8630_v33 = vld [vmem:[#allocation5 + $0x2c] sm:$0xf0] }
  0x78   :  { %3637 = vmatpush.bf16.msra.mxu0 %v6111_v45  ;;  %v5914_v45 = vld [vmem:[#allocation5 + $0x148] sm:$0xf]  ;;  %v5755_v48 = vor.u32 %v8630_v33, %v5754_v32  ;;  %v8820_v32 = vld [vmem:[#allocation5 + $0x61c] sm:$0xf0]  ;;  %v6834_v33 = vld [vmem:[#allocation5 + $0x878] sm:$0xf] }
  0x79   :  { %3650 = vmatpush.bf16.msra.mxu1 %v6431_v49  ;;  %v7511_v49 = vor.u32 %v9064_v36, %v7508_v40  ;;  %v5915_v52 = vor.u32 %v8670_v46, %v5914_v45  ;;  %v8860_v36 = vld [vmem:[#allocation5 + $0x75c] sm:$0xf0]  ;;  %v6074_v46 = vld [vmem:[#allocation5 + $0x288] sm:$0xf] }
  0x7a   :  { %3663 = vmatpush.bf16.msra.mxu2 %v6751_v50  ;;  %v7831_v50 = vor.u32 %v9144_v41, %v7828_v42  ;;  %v8940_v40 = vld [vmem:[#allocation5 + $0x9dc] sm:$0xf0]  ;;  %v7314_v41 = vld [vmem:[#allocation5 + $0xc38] sm:$0xf] }
  0x7b   :  { %3676 = vmatpush.bf16.msra.mxu3 %v7071_v57  ;;  %v5874_v57 = vld [vmem:[#allocation5 + $0xf8] sm:$0xf]  ;;  %v9020_v42 = vld [vmem:[#allocation5 + $0xc5c] sm:$0xf0] }
  0x7c   :  { %3638 = vmatpush.bf16.msra.mxu0 %v6071_v61  ;;  %v7471_v61 = vor.u32 %v9054_v51, %v7468_v53  ;;  %v5875_v0 = vor.u32 %v8660_v58, %v5874_v57  ;;  %v9100_v51 = vld [vmem:[#allocation5 + $0xedc] sm:$0xf0]  ;;  %v7315_v53 = vor.u32 %v9020_v42, %v7314_v41  ;;  %v6075_v57 = vor.u32 %v8710_v47, %v6074_v46  ;;  %v8930_v58 = vld [vmem:[#allocation5 + $0x98c] sm:$0xf0]  ;;  %v7474_v41 = vld [vmem:[#allocation5 + $0xd78] sm:$0xf] }
  0x7d   :  { %3651 = vmatpush.bf16.msra.mxu1 %v6391_v1  ;;  %v7428_v1 = vld [vmem:[#allocation5 + $0xd48] sm:$0xf0]  ;;  %v9060_v42 = vld [vmem:[#allocation5 + $0xd9c] sm:$0xf0]  ;;  %v6474_v46 = vld [vmem:[#allocation5 + $0x5a8] sm:$0xf] }
  0x7e   :  { %3664 = vmatpush.bf16.msra.mxu2 %v6711_v2  ;;  %v9124_v2 = vld [vmem:[#allocation5 + $0xfa4] sm:$0xf]  ;;  %v8810_v47 = vld [vmem:[#allocation5 + $0x5cc] sm:$0xf0] }
  0x7f   :  { %3677 = vmatpush.bf16.msra.mxu3 %v7031_v10  ;;  %3639 = vmatmul.bf16.vlgmr.msra.gmra.mxu0 %v9587_v22  ;;  %v7431_v10 = vor.u32 %v9044_v63, %v7428_v1  ;;  %v7751_v11 = vor.u32 %v9124_v2, %v7748_v3  ;;  %v7594_v63 = vld [vmem:[#allocation5 + $0xe68] sm:$0xf]  ;;  %v7275_v2 = vor.u32 %v9010_v60, %v7274_v59  ;;  %v6594_v3 = vld [vmem:[#allocation5 + $0x698] sm:$0xf]  ;;  %v8800_v59 = vld [vmem:[#allocation5 + $0x57c] sm:$0xf0] }
  0x80   :  { %3683 = vmatpush.bf16.msrb.mxu0 %v7631_v5  ;;  %3652 = vmatmul.bf16.vlgmr.msra.gmra.mxu1 %v9580_v7  ;;  %v5834_v5 = vld [vmem:[#allocation5 + $0xa8] sm:$0xf]  ;;  %v6754_v60 = vld [vmem:[#allocation5 + $0x7d8] sm:$0xf] }
  0x81   :  { %3696 = vmatpush.bf16.msrb.mxu1 %v7951_v6  ;;  %3665 = vmatmul.bf16.vlgmr.msra.gmra.mxu2 %v9582_v15  ;;  %v8650_v6 = vld [vmem:[#allocation5 + $0xcc] sm:$0xf0] }
  0x82   :  { %3709 = vmatpush.bf16.msrb.mxu2 %v6035_v9  ;;  %3678 = vmatmul.bf16.vlgmr.msra.gmra.mxu3 %v9592_v37  ;;  %v8730_v9 = vld [vmem:[#allocation5 + $0x34c] sm:$0xf0]  ;;  %v5835_v13 = vor.u32 %v8650_v6, %v5834_v5  ;;  %v6914_v5 = vld [vmem:[#allocation5 + $0x918] sm:$0xf]  ;;  %v8920_v6 = vld [vmem:[#allocation5 + $0x93c] sm:$0xf0] }
  0x83   :  { %3722 = vmatpush.bf16.msrb.mxu3 %v6355_v14  ;;  %v7388_v14 = vld [vmem:[#allocation5 + $0xcf8] sm:$0xf0]  ;;  %v6155_v18 = vor.u32 %v8730_v9, %v6154_v8  ;;  %v7234_v8 = vld [vmem:[#allocation5 + $0xb98] sm:$0xf]  ;;  %v9000_v9 = vld [vmem:[#allocation5 + $0xbbc] sm:$0xf0] }
  0x84   :  { %3684 = vmatpush.bf16.msrb.mxu0 %v7591_v20  ;;  %v8640_v20 = vld [vmem:[#allocation5 + $0x7c] sm:$0xf0]  ;;  %v7235_v16 = vor.u32 %v9000_v9, %v7234_v8  ;;  %v6714_v9 = vld [vmem:[#allocation5 + $0x788] sm:$0xf] }
  0x85   :  { %3697 = vmatpush.bf16.msrb.mxu1 %v7911_v23  ;;  %v6114_v23 = vld [vmem:[#allocation5 + $0x2d8] sm:$0xf]  ;;  %v5795_v30 = vor.u32 %v8640_v20, %v5794_v19  ;;  %v6874_v19 = vld [vmem:[#allocation5 + $0x8c8] sm:$0xf]  ;;  %v8910_v20 = vld [vmem:[#allocation5 + $0x8ec] sm:$0xf0] }
  0x86   :  { %3710 = vmatpush.bf16.msrb.mxu2 %v5995_v25  ;;  %v7391_v25 = vor.u32 %v9034_v12, %v7388_v14  ;;  %v7554_v12 = vld [vmem:[#allocation5 + $0xe18] sm:$0xf]  ;;  %v6915_v14 = vor.u32 %v8920_v6, %v6914_v5  ;;  %v8790_v5 = vld [vmem:[#allocation5 + $0x52c] sm:$0xf0] }
  0x87   :  { %3723 = vmatpush.bf16.msrb.mxu3 %v6315_v29  ;;  %v9104_v29 = vld [vmem:[#allocation5 + $0xf04] sm:$0xf] }
  0x88   :  { %3685 = vmatpush.bf16.msrb.mxu0 %v7551_v34  ;;  %v6115_v34 = vor.u32 %v8720_v24, %v6114_v23  ;;  %v7671_v45 = vor.u32 %v9104_v29, %v7668_v31  ;;  %v7194_v23 = vld [vmem:[#allocation5 + $0xb48] sm:$0xf]  ;;  %v8990_v24 = vld [vmem:[#allocation5 + $0xb6c] sm:$0xf0]  ;;  %v6875_v29 = vor.u32 %v8910_v20, %v6874_v19  ;;  %v6514_v31 = vld [vmem:[#allocation5 + $0x5f8] sm:$0xf] }
  0x89   :  { %3698 = vmatpush.bf16.msrb.mxu1 %v7871_v35  ;;  %v6674_v35 = vld [vmem:[#allocation5 + $0x738] sm:$0xf]  ;;  %v8775_v19 = vld [vmem:[#allocation5 + $0x4bc] sm:$0xf] }
  0x8a   :  { %3711 = vmatpush.bf16.msrb.mxu2 %v5955_v38  ;;  %v6994_v38 = vld [vmem:[#allocation5 + $0x9b8] sm:$0xf] }
  0x8b   :  { %3724 = vmatpush.bf16.msrb.mxu3 %v6275_v44  ;;  %v7351_v44 = vor.u32 %v9024_v27, %v7348_v28  ;;  %v7514_v27 = vld [vmem:[#allocation5 + $0xdc8] sm:$0xf]  ;;  %v9070_v28 = vld [vmem:[#allocation5 + $0xdec] sm:$0xf0] }
  0x8c   :  { %3686 = vmatpush.bf16.msrb.mxu0 %v7511_v49  ;;  %v6675_v49 = vor.u32 %v8860_v36, %v6674_v35  ;;  %v7154_v35 = vld [vmem:[#allocation5 + $0xaf8] sm:$0xf]  ;;  %v8980_v36 = vld [vmem:[#allocation5 + $0xb1c] sm:$0xf0] }
  0x8d   :  { %3699 = vmatpush.bf16.msrb.mxu1 %v7831_v50  ;;  %v7634_v50 = vld [vmem:[#allocation5 + $0xeb8] sm:$0xf] }
  0x8e   :  { %3712 = vmatpush.bf16.msrb.mxu2 %v5915_v52  ;;  %v6995_v52 = vor.u32 %v8940_v40, %v6994_v38  ;;  %v7515_v38 = vor.u32 %v9070_v28, %v7514_v27  ;;  %v6515_v40 = vor.u32 %v8820_v32, %v6514_v31  ;;  %v8855_v28 = vld [vmem:[#allocation5 + $0x73c] sm:$0xf]  ;;  %v7914_v32 = vld [vmem:[#allocation5 + $0x10e8] sm:$0xf] }
  0x8f   :  { %3725 = vmatpush.bf16.msrb.mxu3 %v6235_v56  ;;  %v6954_v56 = vld [vmem:[#allocation5 + $0x968] sm:$0xf] }
  0x90   :  { %3687 = vmatpush.bf16.msrb.mxu0 %v7471_v61  ;;  %v7635_v61 = vor.u32 %v9100_v51, %v7634_v50  ;;  %v6955_v1 = vor.u32 %v8930_v58, %v6954_v56  ;;  %v7114_v50 = vld [vmem:[#allocation5 + $0xaa8] sm:$0xf]  ;;  %v8970_v51 = vld [vmem:[#allocation5 + $0xacc] sm:$0xf0]  ;;  %v6434_v58 = vld [vmem:[#allocation5 + $0x558] sm:$0xf] }
  0x91   :  { %3700 = vmatpush.bf16.msrb.mxu1 %v7791_v62  ;;  %v6635_v62 = vor.u32 %v8850_v55, %v6634_v54  ;;  %v7434_v54 = vld [vmem:[#allocation5 + $0xd28] sm:$0xf]  ;;  %v9050_v55 = vld [vmem:[#allocation5 + $0xd4c] sm:$0xf0] }
  0x92   :  { %3713 = vmatpush.bf16.msrb.mxu2 %v5875_v0  ;;  %v9090_v0 = vld [vmem:[#allocation5 + $0xe8c] sm:$0xf0] }
  0x93   :  { %3726 = vmatpush.bf16.msrb.mxu3 %v6195_v4  ;;  %v8840_v4 = vld [vmem:[#allocation5 + $0x6bc] sm:$0xf0] }
  0x94   :  { %3688 = vmatpush.bf16.msrb.mxu0 %v7431_v10  ;;  %v7595_v10 = vor.u32 %v9090_v0, %v7594_v63  ;;  %v8960_v63 = vld [vmem:[#allocation5 + $0xa7c] sm:$0xf0]  ;;  %v7435_v0 = vor.u32 %v9050_v55, %v7434_v54  ;;  %v8755_v54 = vld [vmem:[#allocation5 + $0x41c] sm:$0xf]  ;;  %v6276_v55 = vld [vmem:[#allocation5 + $0x440] sm:$0xf0] }
  0x95   :  { %3701 = vmatpush.bf16.msrb.mxu1 %v7751_v11  ;;  %v6595_v11 = vor.u32 %v8840_v4, %v6594_v3  ;;  %v9040_v3 = vld [vmem:[#allocation5 + $0xcfc] sm:$0xf0]  ;;  %v6394_v4 = vld [vmem:[#allocation5 + $0x508] sm:$0xf] }
  0x96   :  { %3714 = vmatpush.bf16.msrb.mxu2 %v5835_v13  ;;  %v9080_v13 = vld [vmem:[#allocation5 + $0xe3c] sm:$0xf0]  ;;  %v6395_v20 = vor.u32 %v8790_v5, %v6394_v4  ;;  %v8825_v4 = vld [vmem:[#allocation5 + $0x64c] sm:$0xf]  ;;  %v6556_v5 = vld [vmem:[#allocation5 + $0x670] sm:$0xf0] }
  0x97   :  { %3727 = vmatpush.bf16.msrb.mxu3 %v6155_v18  ;;  %v8830_v18 = vld [vmem:[#allocation5 + $0x66c] sm:$0xf0] }
  0x98   :  { %3689 = vmatpush.bf16.msrb.mxu0 %v7391_v25  ;;  %v7555_v25 = vor.u32 %v9080_v13, %v7554_v12  ;;  %v8950_v12 = vld [vmem:[#allocation5 + $0xa2c] sm:$0xf0]  ;;  %v7954_v13 = vld [vmem:[#allocation5 + $0x1138] sm:$0xf] }
  0x99   :  { %3702 = vmatpush.bf16.msrb.mxu1 %v7711_v26  ;;  %v6555_v26 = vor.u32 %v8830_v18, %v6554_v17  ;;  %v8695_v17 = vld [vmem:[#allocation5 + $0x23c] sm:$0xf]  ;;  %v6036_v18 = vld [vmem:[#allocation5 + $0x260] sm:$0xf0] }
  0x9a   :  { %3715 = vmatpush.bf16.msrb.mxu2 %v5795_v30  ;;  %v7195_v30 = vor.u32 %v8990_v24, %v7194_v23  ;;  %v6356_v23 = vld [vmem:[#allocation5 + $0x4e0] sm:$0xf0]  ;;  %v7354_v24 = vld [vmem:[#allocation5 + $0xc88] sm:$0xf]  ;;  %v6039_v31 = vor.u32 %v8695_v17, %v6036_v18 }
  0x9b   :  { %3728 = vmatpush.bf16.msrb.mxu3 %v6115_v34  ;;  %v8900_v34 = vld [vmem:[#allocation5 + $0x89c] sm:$0xf0]  ;;  %v6196_v17 = vld [vmem:[#allocation5 + $0x3a0] sm:$0xf0] }
  0x9c   :  { %3690 = vmatpush.bf16.msrb.mxu0 %v7351_v44  ;;  %v6835_v44 = vor.u32 %v8900_v34, %v6834_v33  ;;  %v6359_v33 = vor.u32 %v8775_v19, %v6356_v23  ;;  %v9614_v18 = vld [vmem:[#allocation7] sm:$0xff]  ;;  %v8815_v19 = vld [vmem:[#allocation5 + $0x5fc] sm:$0xf] }
  0x9d   :  { %3703 = vmatpush.bf16.msrb.mxu1 %v7671_v45  ;;  %v7155_v45 = vor.u32 %v8980_v36, %v7154_v35  ;;  %v9170_v35 = vld [vmem:[#allocation5 + $0x110c] sm:$0xf0]  ;;  %v8685_v36 = vld [vmem:[#allocation5 + $0x1ec] sm:$0xf] }
  0x9e   :  { %3716 = vmatpush.bf16.msrb.mxu2 %v5755_v48  ;;  %v6794_v48 = vld [vmem:[#allocation5 + $0x828] sm:$0xf] }
  0x9f   :  { %3729 = vmatpush.bf16.msrb.mxu3 %v6075_v57  ;;  %3691 = vmatmul.bf16.vlgmr.msrb.gmra.mxu0 %v9596_v43  ;;  %v7115_v57 = vor.u32 %v8970_v51, %v7114_v50  ;;  %v9160_v50 = vld [vmem:[#allocation5 + $0x10bc] sm:$0xf0]  ;;  %v8675_v51 = vld [vmem:[#allocation5 + $0x19c] sm:$0xf] }
  0xa0   :  { %3735 = vmatpush.bf16.msra.mxu0 %v6675_v49  ;;  %3704 = vmatmul.bf16.vlgmr.msrb.gmra.mxu1 %v9594_v39  ;;  %v8890_v49 = vld [vmem:[#allocation5 + $0x84c] sm:$0xf0] }
  0xa1   :  { %3748 = vmatpush.bf16.msra.mxu1 %v6995_v52  ;;  %3717 = vmatmul.bf16.vlgmr.msrb.gmra.mxu2 %v9585_v21  ;;  %v7475_v52 = vor.u32 %v9060_v42, %v7474_v41  ;;  %v6795_v56 = vor.u32 %v8890_v49, %v6794_v48  ;;  %v8765_v41 = vld [vmem:[#allocation5 + $0x46c] sm:$0xf]  ;;  %v6316_v42 = vld [vmem:[#allocation5 + $0x490] sm:$0xf0]  ;;  %v7874_v48 = vld [vmem:[#allocation5 + $0x1098] sm:$0xf] }
  0xa2   :  { %3761 = vmatpush.bf16.msra.mxu2 %v7315_v53  ;;  %3730 = vmatmul.bf16.vlgmr.msrb.gmra.mxu3 %v9587_v22  ;;  %v6475_v53 = vor.u32 %v8810_v47, %v6474_v46  ;;  %v7915_v46 = vor.u32 %v9170_v35, %v7914_v32  ;;  %v6319_v49 = vor.u32 %v8765_v41, %v6316_v42  ;;  %v8725_v32 = vld [vmem:[#allocation5 + $0x32c] sm:$0xf]  ;;  %v6476_v35 = vld [vmem:[#allocation5 + $0x5d0] sm:$0xf0] }
  0xa3   :  { %3774 = vmatpush.bf16.msra.mxu3 %v7635_v61  ;;  %v8880_v61 = vld [vmem:[#allocation5 + $0x7fc] sm:$0xf0] }
  0xa4   :  { %3736 = vmatpush.bf16.msra.mxu0 %v6635_v62  ;;  %v7074_v62 = vld [vmem:[#allocation5 + $0xa58] sm:$0xf]  ;;  %v6755_v6 = vor.u32 %v8880_v61, %v6754_v60  ;;  %v7834_v60 = vld [vmem:[#allocation5 + $0x1048] sm:$0xf]  ;;  %v6279_v61 = vor.u32 %v8755_v54, %v6276_v55 }
  0xa5   :  { %3749 = vmatpush.bf16.msra.mxu1 %v6955_v1  ;;  %v7394_v1 = vld [vmem:[#allocation5 + $0xcd8] sm:$0xf]  ;;  %v7075_v8 = vor.u32 %v8960_v63, %v7074_v62  ;;  %v9150_v62 = vld [vmem:[#allocation5 + $0x106c] sm:$0xf0]  ;;  %v8665_v63 = vld [vmem:[#allocation5 + $0x14c] sm:$0xf] }
  0xa6   :  { %3762 = vmatpush.bf16.msra.mxu2 %v7275_v2  ;;  %v6435_v2 = vor.u32 %v8800_v59, %v6434_v58  ;;  %v7875_v58 = vor.u32 %v9160_v50, %v7874_v48  ;;  %v8715_v50 = vld [vmem:[#allocation5 + $0x2dc] sm:$0xf] }
  0xa7   :  { %3775 = vmatpush.bf16.msra.mxu3 %v7595_v10  ;;  %v8870_v10 = vld [vmem:[#allocation5 + $0x7ac] sm:$0xf0] }
  0xa8   :  { %3737 = vmatpush.bf16.msra.mxu0 %v6595_v11  ;;  %v7034_v11 = vld [vmem:[#allocation5 + $0xa08] sm:$0xf] }
  0xa9   :  { %3750 = vmatpush.bf16.msra.mxu1 %v6915_v14  ;;  %v9180_v14 = vld [vmem:[#allocation5 + $0x115c] sm:$0xf0]  ;;  %v7035_v27 = vor.u32 %v8950_v12, %v7034_v11  ;;  %v8655_v12 = vld [vmem:[#allocation5 + $0xfc] sm:$0xf] }
  0xaa   :  { %3763 = vmatpush.bf16.msra.mxu2 %v7235_v16  ;;  %v7395_v16 = vor.u32 %v9040_v3, %v7394_v1  ;;  %v6236_v3 = vld [vmem:[#allocation5 + $0x3f0] sm:$0xf0]  ;;  %v9140_v11 = vld [vmem:[#allocation5 + $0x101c] sm:$0xf0] }
  0xab   :  { %3776 = vmatpush.bf16.msra.mxu3 %v7555_v25  ;;  %v9030_v25 = vld [vmem:[#allocation5 + $0xcac] sm:$0xf0] }
  0xac   :  { %3738 = vmatpush.bf16.msra.mxu0 %v6555_v26  ;;  %v6715_v26 = vor.u32 %v8870_v10, %v6714_v9  ;;  %v7355_v34 = vor.u32 %v9030_v25, %v7354_v24  ;;  %v7794_v9 = vld [vmem:[#allocation5 + $0xff8] sm:$0xf]  ;;  %v7754_v25 = vld [vmem:[#allocation5 + $0xfa8] sm:$0xf] }
  0xad   :  { %3751 = vmatpush.bf16.msra.mxu1 %v6875_v29  ;;  %v6676_v29 = vld [vmem:[#allocation5 + $0x760] sm:$0xf0]  ;;  %v7795_v23 = vor.u32 %v9140_v11, %v7794_v9  ;;  %v9095_v9 = vld [vmem:[#allocation5 + $0xebc] sm:$0xf] }
  0xae   :  { %3764 = vmatpush.bf16.msra.mxu2 %v7195_v30  ;;  %v7955_v30 = vor.u32 %v9180_v14, %v7954_v13  ;;  %v5876_v13 = vld [vmem:[#allocation5 + $0x120] sm:$0xf0]  ;;  %v6559_v14 = vor.u32 %v8825_v4, %v6556_v5  ;;  %v8935_v4 = vld [vmem:[#allocation5 + $0x9bc] sm:$0xf] }
  0xaf   :  { %3777 = vmatpush.bf16.msra.mxu3 %v7515_v38  ;;  %v5996_v38 = vld [vmem:[#allocation5 + $0x210] sm:$0xf0]  ;;  %v5879_v24 = vor.u32 %v8655_v12, %v5876_v13  ;;  %v6996_v5 = vld [vmem:[#allocation5 + $0x9e0] sm:$0xf0] }
  0xb0   :  { %3739 = vmatpush.bf16.msra.mxu0 %v6515_v40  ;;  %v6679_v40 = vor.u32 %v8855_v28, %v6676_v29  ;;  %v5999_v47 = vor.u32 %v8685_v36, %v5996_v38  ;;  %v8645_v28 = vld [vmem:[#allocation5 + $0xac] sm:$0xf]  ;;  %v5836_v29 = vld [vmem:[#allocation5 + $0xd0] sm:$0xf0] }
  0xb1   :  { %3752 = vmatpush.bf16.msra.mxu1 %v6835_v44  ;;  %v8845_v44 = vld [vmem:[#allocation5 + $0x6ec] sm:$0xf]  ;;  %v5839_v38 = vor.u32 %v8645_v28, %v5836_v29  ;;  %v6956_v29 = vld [vmem:[#allocation5 + $0x990] sm:$0xf0] }
  0xb2   :  { %3765 = vmatpush.bf16.msra.mxu2 %v7155_v45  ;;  %v6636_v45 = vld [vmem:[#allocation5 + $0x710] sm:$0xf0]  ;;  %v8925_v28 = vld [vmem:[#allocation5 + $0x96c] sm:$0xf] }
  0xb3   :  { %3778 = vmatpush.bf16.msra.mxu3 %v7475_v52  ;;  %v5956_v52 = vld [vmem:[#allocation5 + $0x1c0] sm:$0xf0] }
  0xb4   :  { %3740 = vmatpush.bf16.msra.mxu0 %v6475_v53  ;;  %v6639_v53 = vor.u32 %v8845_v44, %v6636_v45  ;;  %v5959_v59 = vor.u32 %v8675_v51, %v5956_v52  ;;  %v9120_v44 = vld [vmem:[#allocation5 + $0xf7c] sm:$0xf0]  ;;  %v8635_v45 = vld [vmem:[#allocation5 + $0x5c] sm:$0xf]  ;;  %v6116_v51 = vld [vmem:[#allocation5 + $0x300] sm:$0xf0] }
  0xb5   :  { %3753 = vmatpush.bf16.msra.mxu1 %v6795_v56  ;;  %v8835_v56 = vld [vmem:[#allocation5 + $0x69c] sm:$0xf] }
  0xb6   :  { %3766 = vmatpush.bf16.msra.mxu2 %v7115_v57  ;;  %v6596_v57 = vld [vmem:[#allocation5 + $0x6c0] sm:$0xf0]  ;;  %v8795_v52 = vld [vmem:[#allocation5 + $0x55c] sm:$0xf] }
  0xb7   :  { %3779 = vmatpush.bf16.msra.mxu3 %v7435_v0  ;;  %v5916_v0 = vld [vmem:[#allocation5 + $0x170] sm:$0xf0]  ;;  %v6599_v1 = vor.u32 %v8835_v56, %v6596_v57 }
  0xb8   :  { %3741 = vmatpush.bf16.msra.mxu0 %v6435_v2  ;;  %v8745_v2 = vld [vmem:[#allocation5 + $0x3cc] sm:$0xf] }
  0xb9   :  { %3754 = vmatpush.bf16.msra.mxu1 %v6755_v6  ;;  %v7835_v6 = vor.u32 %v9150_v62, %v7834_v60  ;;  %v6239_v10 = vor.u32 %v8745_v2, %v6236_v3  ;;  %v8625_v60 = vld [vmem:[#allocation5 + $0xc] sm:$0xf]  ;;  %v6119_v62 = vor.u32 %v8715_v50, %v6116_v51  ;;  %v9075_v50 = vld [vmem:[#allocation5 + $0xe1c] sm:$0xf]  ;;  %v7556_v51 = vld [vmem:[#allocation5 + $0xe40] sm:$0xf0] }
  0xba   :  { %3767 = vmatpush.bf16.msra.mxu2 %v7075_v8  ;;  %v5919_v8 = vor.u32 %v8665_v63, %v5916_v0  ;;  %v5756_v63 = vld [vmem:[#allocation5 + $0x30] sm:$0xf0]  ;;  %v8705_v0 = vld [vmem:[#allocation5 + $0x28c] sm:$0xf] }
  0xbb   :  { %3780 = vmatpush.bf16.msra.mxu3 %v7395_v16  ;;  %v8735_v16 = vld [vmem:[#allocation5 + $0x37c] sm:$0xf]  ;;  %v5759_v13 = vor.u32 %v8625_v60, %v5756_v63  ;;  %v8985_v60 = vld [vmem:[#allocation5 + $0xb4c] sm:$0xf]  ;;  %v7516_v63 = vld [vmem:[#allocation5 + $0xdf0] sm:$0xf0] }
  0xbc   :  { %3742 = vmatpush.bf16.msra.mxu0 %v6395_v20  ;;  %v6516_v20 = vld [vmem:[#allocation5 + $0x620] sm:$0xf0] }
  0xbd   :  { %3755 = vmatpush.bf16.msra.mxu1 %v6715_v26  ;;  %v9130_v26 = vld [vmem:[#allocation5 + $0xfcc] sm:$0xf0]  ;;  %v3549_v48 = vpop.f32.mrf.mxu1 }
  0xbe   :  { %3768 = vmatpush.bf16.msra.mxu2 %v7035_v27  ;;  %v6199_v27 = vor.u32 %v8735_v16, %v6196_v17  ;;  %v7755_v36 = vor.u32 %v9130_v26, %v7754_v25  ;;  %v6396_v16 = vld [vmem:[#allocation5 + $0x530] sm:$0xf0] }
  0xbf   :  { %3781 = vmatpush.bf16.msra.mxu3 %v7355_v34  ;;  %3743 = vmatmul.bf16.vlgmr.msra.gmra.mxu0 %v9580_v7  ;;  %v8805_v34 = vld [vmem:[#allocation5 + $0x5ac] sm:$0xf] }
  0xc0   :  { %3787 = vmatpush.bf16.msrb.mxu0 %v7955_v30  ;;  %3756 = vmatmul.bf16.vlgmr.msra.gmra.mxu1 %v9582_v15  ;;  %v682_v30 = vperm.slane %v9614_v18, 0  ;;  %v3536_v41 = vpop.f32.mrf.mxu0 }
  0xc1   :  { %3800 = vmatpush.bf16.msrb.mxu1 %v6039_v31  ;;  %3769 = vmatmul.bf16.vlgmr.msra.gmra.mxu2 %v9592_v37  ;;  %v6519_v31 = vor.u32 %v8815_v19, %v6516_v20  ;;  %v6999_v20 = vor.u32 %v8935_v4, %v6996_v5 }
  0xc2   :  { %3813 = vmatpush.bf16.msrb.mxu2 %v6359_v33  ;;  %3782 = vmatmul.bf16.vlgmr.msra.gmra.mxu3 %v9596_v43  ;;  %v6156_v33 = vld [vmem:[#allocation5 + $0x350] sm:$0xf0] }
  0xc3   :  { %3826 = vmatpush.bf16.msrb.mxu3 %v6679_v40  ;;  %v7714_v40 = vld [vmem:[#allocation5 + $0xf58] sm:$0xf]  ;;  %v6159_v42 = vor.u32 %v8725_v32, %v6156_v33  ;;  %v7276_v32 = vld [vmem:[#allocation5 + $0xc10] sm:$0xf0]  ;;  %v9085_v33 = vld [vmem:[#allocation5 + $0xe6c] sm:$0xf] }
  0xc4   :  { %3788 = vmatpush.bf16.msrb.mxu0 %v7915_v46  ;;  %v5796_v46 = vld [vmem:[#allocation5 + $0x80] sm:$0xf0]  ;;  %v3562_v55 = vpop.f32.mrf.mxu2  ;;  %v7715_v56 = vor.u32 %v9120_v44, %v7714_v40  ;;  %v6959_v40 = vor.u32 %v8925_v28, %v6956_v29  ;;  %v8885_v28 = vld [vmem:[#allocation5 + $0x82c] sm:$0xf]  ;;  %v6796_v29 = vld [vmem:[#allocation5 + $0x850] sm:$0xf0] }
  0xc5   :  { %3801 = vmatpush.bf16.msrb.mxu1 %v5999_v47  ;;  %v3537_v47 = vadd.f32 %v3536_v41, %v682_v30  ;;  %v5799_v57 = vor.u32 %v8635_v45, %v5796_v46  ;;  %v3551_v25 = vpop.f32.mrf.mxu1  ;;  %v9005_v30 = vld [vmem:[#allocation5 + $0xbec] sm:$0xf]  ;;  %v8915_v46 = vld [vmem:[#allocation5 + $0x91c] sm:$0xf] }
  0xc6   :  { %3814 = vmatpush.bf16.msrb.mxu2 %v6319_v49  ;;  %v6479_v49 = vor.u32 %v8805_v34, %v6476_v35  ;;  %v7596_v34 = vld [vmem:[#allocation5 + $0xe90] sm:$0xf0]  ;;  %v9165_v41 = vld [vmem:[#allocation5 + $0x10ec] sm:$0xf]  ;;  %v7279_v44 = vor.u32 %v9005_v30, %v7276_v32 }
  0xc7   :  { %3827 = vmatpush.bf16.msrb.mxu3 %v6639_v53  ;;  %v6436_v53 = vld [vmem:[#allocation5 + $0x580] sm:$0xf0]  ;;  %v3550_v54 = vadd.f32 %v3549_v48, %v3537_v47  ;;  %v7599_v45 = vor.u32 %v9085_v33, %v7596_v34  ;;  %v8995_v48 = vld [vmem:[#allocation5 + $0xb9c] sm:$0xf]  ;;  %v8965_v30 = vld [vmem:[#allocation5 + $0xaac] sm:$0xf]  ;;  %v6799_v34 = vor.u32 %v8885_v28, %v6796_v29 }
  0xc8   :  { %3789 = vmatpush.bf16.msrb.mxu0 %v7875_v58  ;;  %v7674_v58 = vld [vmem:[#allocation5 + $0xf08] sm:$0xf]  ;;  %v6439_v3 = vor.u32 %v8795_v52, %v6436_v53  ;;  %v3538_v17 = vpop.f32.mrf.mxu0  ;;  %v6916_v47 = vld [vmem:[#allocation5 + $0x940] sm:$0xf0]  ;;  %v9045_v32 = vld [vmem:[#allocation5 + $0xd2c] sm:$0xf] }
  0xc9   :  { %3802 = vmatpush.bf16.msrb.mxu1 %v5959_v59  ;;  %v9110_v59 = vld [vmem:[#allocation5 + $0xf2c] sm:$0xf0]  ;;  %v3563_v2 = vadd.f32 %v3562_v55, %v3550_v54  ;;  %v6919_v53 = vor.u32 %v8915_v46, %v6916_v47  ;;  %v9155_v54 = vld [vmem:[#allocation5 + $0x109c] sm:$0xf]  ;;  %v7876_v55 = vld [vmem:[#allocation5 + $0x10c0] sm:$0xf0] }
  0xca   :  { %3815 = vmatpush.bf16.msrb.mxu2 %v6279_v61  ;;  %v3575_v61 = vpop.f32.mrf.mxu3  ;;  %v7675_v12 = vor.u32 %v9110_v59, %v7674_v58  ;;  %v8905_v58 = vld [vmem:[#allocation5 + $0x8cc] sm:$0xf]  ;;  %v6876_v59 = vld [vmem:[#allocation5 + $0x8f0] sm:$0xf0]  ;;  %v8955_v46 = vld [vmem:[#allocation5 + $0xa5c] sm:$0xf] }
  0xcb   :  { %3828 = vmatpush.bf16.msrb.mxu3 %v6599_v1  ;;  %v6076_v1 = vld [vmem:[#allocation5 + $0x2b0] sm:$0xf0]  ;;  %v9617_v11 = vadd.f32 %v3575_v61, %v3563_v2  ;;  %v9145_v2 = vld [vmem:[#allocation5 + $0x104c] sm:$0xf]  ;;  %v6322_v28 = vld [vmem:[#allocation5 + $0x470] sm:$0xf] }
  0xcc   :  { %3790 = vmatpush.bf16.msrb.mxu0 %v7835_v6  ;;  %v9015_v6 = vld [vmem:[#allocation5 + $0xc3c] sm:$0xf]  ;;  %v6079_v19 = vor.u32 %v8705_v0, %v6076_v1  ;;  %v3564_v35 = vpop.f32.mrf.mxu2  ;;  %v7196_v61 = vld [vmem:[#allocation5 + $0xb70] sm:$0xf0]  ;;  %v7879_v0 = vor.u32 %v9155_v54, %v7876_v55  ;;  %v6879_v1 = vor.u32 %v8905_v58, %v6876_v59  ;;  %v7716_v55 = vld [vmem:[#allocation5 + $0xf80] sm:$0xf0] }
  0xcd   :  { %3803 = vmatpush.bf16.msrb.mxu1 %v5919_v8  ;;  %v7316_v8 = vld [vmem:[#allocation5 + $0xc60] sm:$0xf0]  ;;  %v7199_v4 = vor.u32 %v8985_v60, %v7196_v61  ;;  %v7436_v33 = vld [vmem:[#allocation5 + $0xd50] sm:$0xf0]  ;;  %v8945_v60 = vld [vmem:[#allocation5 + $0xa0c] sm:$0xf] }
  0xce   :  { %3816 = vmatpush.bf16.msrb.mxu2 %v6239_v10  ;;  %v7636_v10 = vld [vmem:[#allocation5 + $0xee0] sm:$0xf0]  ;;  %v7319_v26 = vor.u32 %v9015_v6, %v7316_v8  ;;  %v8895_v6 = vld [vmem:[#allocation5 + $0x87c] sm:$0xf]  ;;  %v7036_v61 = vld [vmem:[#allocation5 + $0xa30] sm:$0xf0] }
  0xcf   :  { %3829 = vmatpush.bf16.msrb.mxu3 %v6559_v14  ;;  %v8785_v14 = vld [vmem:[#allocation5 + $0x50c] sm:$0xf]  ;;  %v6836_v8 = vld [vmem:[#allocation5 + $0x8a0] sm:$0xf0] }
  0xd0   :  { %3791 = vmatpush.bf16.msrb.mxu0 %v7795_v23  ;;  %v9175_v23 = vld [vmem:[#allocation5 + $0x113c] sm:$0xf] }
  0xd1   :  { %3804 = vmatpush.bf16.msrb.mxu1 %v5879_v24  ;;  %v7956_v24 = vld [vmem:[#allocation5 + $0x1160] sm:$0xf0] }
  0xd2   :  { %3817 = vmatpush.bf16.msrb.mxu2 %v6199_v27  ;;  %v7639_v27 = vor.u32 %v9095_v9, %v7636_v10  ;;  %v8975_v9 = vld [vmem:[#allocation5 + $0xafc] sm:$0xf] }
  0xd3   :  { %3830 = vmatpush.bf16.msrb.mxu3 %v6519_v31  ;;  %v6399_v31 = vor.u32 %v8785_v14, %v6396_v16  ;;  %v7476_v14 = vld [vmem:[#allocation5 + $0xda0] sm:$0xf0] }
  0xd4   :  { %3792 = vmatpush.bf16.msrb.mxu0 %v7755_v36  ;;  %v7959_v36 = vor.u32 %v9175_v23, %v7956_v24  ;;  %v9135_v23 = vld [vmem:[#allocation5 + $0xffc] sm:$0xf]  ;;  %v7796_v24 = vld [vmem:[#allocation5 + $0x1020] sm:$0xf0] }
  0xd5   :  { %3805 = vmatpush.bf16.msrb.mxu1 %v5839_v38  ;;  %v3577_v38 = vpop.f32.mrf.mxu3 }
  0xd6   :  { %3818 = vmatpush.bf16.msrb.mxu2 %v6159_v42  ;;  %v7916_v42 = vld [vmem:[#allocation5 + $0x1110] sm:$0xf0] }
  0xd7   :  { %3831 = vmatpush.bf16.msrb.mxu3 %v6479_v49  ;;  %v7236_v49 = vld [vmem:[#allocation5 + $0xbc0] sm:$0xf0]  ;;  %v7919_v52 = vor.u32 %v9165_v41, %v7916_v42  ;;  %v7756_v38 = vld [vmem:[#allocation5 + $0xfd0] sm:$0xf0]  ;;  %v7439_v41 = vor.u32 %v9045_v32, %v7436_v33  ;;  %v8851_v32 = vld [vmem:[#allocation5 + $0x714] sm:$0xf0] }
  0xd8   :  { %3793 = vmatpush.bf16.msrb.mxu0 %v7715_v56  ;;  %v7239_v56 = vor.u32 %v8995_v48, %v7236_v49  ;;  %v7076_v48 = vld [vmem:[#allocation5 + $0xa80] sm:$0xf0]  ;;  %v9035_v49 = vld [vmem:[#allocation5 + $0xcdc] sm:$0xf]  ;;  %v6962_v33 = vld [vmem:[#allocation5 + $0x970] sm:$0xf] }
  0xd9   :  { %3806 = vmatpush.bf16.msrb.mxu1 %v5799_v57  ;;  %v7559_v57 = vor.u32 %v9075_v50, %v7556_v51  ;;  %v7396_v50 = vld [vmem:[#allocation5 + $0xd00] sm:$0xf0]  ;;  %v7079_v58 = vor.u32 %v8955_v46, %v7076_v48  ;;  %v6602_v46 = vld [vmem:[#allocation5 + $0x6a0] sm:$0xf]  ;;  %v683_v48 = vperm.slane %v9614_v18, 1 }
  0xda   :  { %3819 = vmatpush.bf16.msrb.mxu2 %v6119_v62  ;;  %v9065_v62 = vld [vmem:[#allocation5 + $0xdcc] sm:$0xf]  ;;  %v7399_v59 = vor.u32 %v9035_v49, %v7396_v50  ;;  %v6922_v50 = vld [vmem:[#allocation5 + $0x920] sm:$0xf] }
  0xdb   :  { %3832 = vmatpush.bf16.msrb.mxu3 %v6439_v3  ;;  %v7836_v3 = vld [vmem:[#allocation5 + $0x1070] sm:$0xf0]  ;;  %v7519_v5 = vor.u32 %v9065_v62, %v7516_v63  ;;  %v9025_v62 = vld [vmem:[#allocation5 + $0xc8c] sm:$0xf] }
  0xdc   :  { %3794 = vmatpush.bf16.msrb.mxu0 %v7675_v12  ;;  %v3588_v10 = vpop.f32.mrf.mxu0  ;;  %v7156_v12 = vld [vmem:[#allocation5 + $0xb20] sm:$0xf0]  ;;  %v7839_v17 = vor.u32 %v9145_v2, %v7836_v3  ;;  %v7356_v63 = vld [vmem:[#allocation5 + $0xcb0] sm:$0xf0]  ;;  %v6362_v3 = vld [vmem:[#allocation5 + $0x4c0] sm:$0xf] }
  0xdd   :  { %3807 = vmatpush.bf16.msrb.mxu1 %v5759_v13  ;;  %v9055_v13 = vld [vmem:[#allocation5 + $0xd7c] sm:$0xf]  ;;  %v3589_v16 = vadd.f32 %v3588_v10, %v9617_v11  ;;  %v7799_v11 = vor.u32 %v9135_v23, %v7796_v24  ;;  %v7676_v10 = vld [vmem:[#allocation5 + $0xf30] sm:$0xf0] }
  0xde   :  { %3820 = vmatpush.bf16.msrb.mxu2 %v6079_v19  ;;  %v3601_v19 = vpop.f32.mrf.mxu1 }
  0xdf   :  { %3833 = vmatpush.bf16.msrb.mxu3 %v6399_v31  ;;  %3795 = vmatmul.bf16.vlgmr.msrb.gmra.mxu0 %v9594_v39  ;;  %v3602_v25 = vadd.f32 %v3601_v19, %v3589_v16  ;;  %v7116_v31 = vld [vmem:[#allocation5 + $0xad0] sm:$0xf0]  ;;  %v7359_v16 = vor.u32 %v9025_v62, %v7356_v63  ;;  %v8941_v19 = vld [vmem:[#allocation5 + $0x9e4] sm:$0xf0]  ;;  %v6882_v63 = vld [vmem:[#allocation5 + $0x8d0] sm:$0xf] }
  0xe0   :  { %3839 = vmatpush.bf16.msra.mxu0 %v6999_v20  ;;  %3808 = vmatmul.bf16.vlgmr.msrb.gmra.mxu1 %v9585_v21  ;;  %v6839_v20 = vor.u32 %v8895_v6, %v6836_v8  ;;  %v8861_v8 = vld [vmem:[#allocation5 + $0x764] sm:$0xf0] }
  0xe1   :  { %3852 = vmatpush.bf16.msra.mxu1 %v7319_v26  ;;  %3821 = vmatmul.bf16.vlgmr.msrb.gmra.mxu2 %v9587_v22  ;;  %v7159_v26 = vor.u32 %v8975_v9, %v7156_v12  ;;  %v9105_v9 = vld [vmem:[#allocation5 + $0xf0c] sm:$0xf] }
  0xe2   :  { %3865 = vmatpush.bf16.msra.mxu2 %v7639_v27  ;;  %3834 = vmatmul.bf16.vlgmr.msrb.gmra.mxu3 %v9580_v7  ;;  %v7479_v27 = vor.u32 %v9055_v13, %v7476_v14  ;;  %v7039_v14 = vor.u32 %v8945_v60, %v7036_v61  ;;  %v6562_v60 = vld [vmem:[#allocation5 + $0x650] sm:$0xf]  ;;  %v8831_v61 = vld [vmem:[#allocation5 + $0x674] sm:$0xf0] }
  0xe3   :  { %3878 = vmatpush.bf16.msra.mxu3 %v7959_v36  ;;  %v9125_v36 = vld [vmem:[#allocation5 + $0xfac] sm:$0xf] }
  0xe4   :  { %3840 = vmatpush.bf16.msra.mxu0 %v6959_v40  ;;  %v3614_v35 = vpop.f32.mrf.mxu2  ;;  %v7119_v40 = vor.u32 %v8965_v30, %v7116_v31  ;;  %v3590_v47 = vpop.f32.mrf.mxu0  ;;  %v7759_v51 = vor.u32 %v9125_v36, %v7756_v38  ;;  %v8771_v30 = vld [vmem:[#allocation5 + $0x494] sm:$0xf0]  ;;  %v6642_v31 = vld [vmem:[#allocation5 + $0x6f0] sm:$0xf] }
  0xe5   :  { %3853 = vmatpush.bf16.msra.mxu1 %v7279_v44  ;;  %v9624_v42 = vadd.f32 %v3614_v35, %v3602_v25  ;;  %v8875_v44 = vld [vmem:[#allocation5 + $0x7dc] sm:$0xf]  ;;  %v3627_v12 = vpop.f32.mrf.mxu3  ;;  %v7679_v25 = vor.u32 %v9105_v9, %v7676_v10  ;;  %v5962_v35 = vld [vmem:[#allocation5 + $0x1a0] sm:$0xf]  ;;  %v6323_v36 = vor.u32 %v8771_v30, %v6322_v28  ;;  %v6643_v38 = vor.u32 %v8851_v32, %v6642_v31  ;;  %v8841_v47 = vld [vmem:[#allocation5 + $0x6c4] sm:$0xf0] }
  0xe6   :  { %3866 = vmatpush.bf16.msra.mxu2 %v7599_v45  ;;  %v6756_v45 = vld [vmem:[#allocation5 + $0x800] sm:$0xf0]  ;;  %v3628_v62 = vadd.f32 %v3627_v12, %v683_v48  ;;  %v8741_v10 = vld [vmem:[#allocation5 + $0x3a4] sm:$0xf0]  ;;  %v6842_v12 = vld [vmem:[#allocation5 + $0x880] sm:$0xf] }
  0xe7   :  { %3879 = vmatpush.bf16.msra.mxu3 %v7919_v52  ;;  %v9115_v52 = vld [vmem:[#allocation5 + $0xf5c] sm:$0xf]  ;;  %v6759_v54 = vor.u32 %v8875_v44, %v6756_v45  ;;  %v8761_v44 = vld [vmem:[#allocation5 + $0x444] sm:$0xf0]  ;;  %v6162_v28 = vld [vmem:[#allocation5 + $0x330] sm:$0xf] }
  0xe8   :  { %3841 = vmatpush.bf16.msra.mxu0 %v6919_v53  ;;  %v3603_v53 = vpop.f32.mrf.mxu1  ;;  %v7719_v2 = vor.u32 %v9115_v52, %v7716_v55  ;;  %v5922_v55 = vld [vmem:[#allocation5 + $0x150] sm:$0xf]  ;;  %v8731_v30 = vld [vmem:[#allocation5 + $0x354] sm:$0xf0]  ;;  %v8721_v48 = vld [vmem:[#allocation5 + $0x304] sm:$0xf0] }
  0xe9   :  { %3854 = vmatpush.bf16.msra.mxu1 %v7239_v56  ;;  %v8865_v56 = vld [vmem:[#allocation5 + $0x78c] sm:$0xf]  ;;  %v6482_v31 = vld [vmem:[#allocation5 + $0x5b0] sm:$0xf]  ;;  %v8811_v32 = vld [vmem:[#allocation5 + $0x5d4] sm:$0xf0] }
  0xea   :  { %3867 = vmatpush.bf16.msra.mxu2 %v7559_v57  ;;  %v6716_v57 = vld [vmem:[#allocation5 + $0x7b0] sm:$0xf0] }
  0xeb   :  { %3880 = vmatpush.bf16.msra.mxu3 %v7879_v0  ;;  %v6042_v0 = vld [vmem:[#allocation5 + $0x240] sm:$0xf]  ;;  %v6719_v6 = vor.u32 %v8865_v56, %v6716_v57  ;;  %v8671_v56 = vld [vmem:[#allocation5 + $0x174] sm:$0xf0]  ;;  %v6242_v57 = vld [vmem:[#allocation5 + $0x3d0] sm:$0xf] }
  0xec   :  { %3842 = vmatpush.bf16.msra.mxu0 %v6879_v1  ;;  %v8701_v1 = vld [vmem:[#allocation5 + $0x264] sm:$0xf0]  ;;  %v3616_v13 = vpop.f32.mrf.mxu2 }
  0xed   :  { %3855 = vmatpush.bf16.msra.mxu1 %v7199_v4  ;;  %v8781_v4 = vld [vmem:[#allocation5 + $0x4e4] sm:$0xf0]  ;;  %v3629_v49 = vpop.f32.mrf.mxu3  ;;  %v6522_v13 = vld [vmem:[#allocation5 + $0x600] sm:$0xf] }
  0xee   :  { %3868 = vmatpush.bf16.msra.mxu2 %v7519_v5  ;;  %v6682_v5 = vld [vmem:[#allocation5 + $0x740] sm:$0xf]  ;;  %v6363_v23 = vor.u32 %v8781_v4, %v6362_v3  ;;  %v6563_v3 = vor.u32 %v8831_v61, %v6562_v60  ;;  %v6082_v61 = vld [vmem:[#allocation5 + $0x290] sm:$0xf] }
  0xef   :  { %3881 = vmatpush.bf16.msra.mxu3 %v7839_v17  ;;  %v7002_v17 = vld [vmem:[#allocation5 + $0x9c0] sm:$0xf]  ;;  %v6683_v24 = vor.u32 %v8861_v8, %v6682_v5  ;;  %v8661_v5 = vld [vmem:[#allocation5 + $0x124] sm:$0xf0] }
  0xf0   :  { %3843 = vmatpush.bf16.msra.mxu0 %v6839_v20  ;;  %v6043_v20 = vor.u32 %v8701_v1, %v6042_v0  ;;  %v7003_v29 = vor.u32 %v8941_v19, %v7002_v17  ;;  %v8911_v0 = vld [vmem:[#allocation5 + $0x8f4] sm:$0xf0]  ;;  %v5923_v1 = vor.u32 %v8671_v56, %v5922_v55  ;;  %v5882_v4 = vld [vmem:[#allocation5 + $0x100] sm:$0xf]  ;;  %v8901_v19 = vld [vmem:[#allocation5 + $0x8a4] sm:$0xf0] }
  0xf1   :  { %3856 = vmatpush.bf16.msra.mxu1 %v7159_v26  ;;  %v6002_v26 = vld [vmem:[#allocation5 + $0x1f0] sm:$0xf]  ;;  %v6883_v9 = vor.u32 %v8911_v0, %v6882_v63  ;;  %v6442_v49 = vld [vmem:[#allocation5 + $0x560] sm:$0xf] }
  0xf2   :  { %3869 = vmatpush.bf16.msra.mxu2 %v7479_v27  ;;  %v8691_v27 = vld [vmem:[#allocation5 + $0x214] sm:$0xf0]  ;;  %v6402_v63 = vld [vmem:[#allocation5 + $0x510] sm:$0xf] }
  0xf3   :  { %3882 = vmatpush.bf16.msra.mxu3 %v7799_v11  ;;  %v8931_v11 = vld [vmem:[#allocation5 + $0x994] sm:$0xf0] }
  0xf4   :  { %3844 = vmatpush.bf16.msra.mxu0 %v6799_v34  ;;  %v6003_v34 = vor.u32 %v8691_v27, %v6002_v26  ;;  %v6963_v45 = vor.u32 %v8931_v11, %v6962_v33  ;;  %v5842_v26 = vld [vmem:[#allocation5 + $0xb0] sm:$0xf]  ;;  %v8651_v27 = vld [vmem:[#allocation5 + $0xd4] sm:$0xf0] }
  0xf5   :  { %3857 = vmatpush.bf16.msra.mxu1 %v7119_v40  ;;  %v8681_v40 = vld [vmem:[#allocation5 + $0x1c4] sm:$0xf0]  ;;  %v6802_v33 = vld [vmem:[#allocation5 + $0x830] sm:$0xf]  ;;  %v8891_v11 = vld [vmem:[#allocation5 + $0x854] sm:$0xf0] }
  0xf6   :  { %3870 = vmatpush.bf16.msra.mxu2 %v7439_v41  ;;  %v6282_v41 = vld [vmem:[#allocation5 + $0x420] sm:$0xf]  ;;  %v5963_v52 = vor.u32 %v8681_v40, %v5962_v35 }
  0xf7   :  { %3883 = vmatpush.bf16.msra.mxu3 %v7759_v51  ;;  %v8921_v51 = vld [vmem:[#allocation5 + $0x944] sm:$0xf0]  ;;  %v6283_v53 = vor.u32 %v8761_v44, %v6282_v41  ;;  %v5802_v40 = vld [vmem:[#allocation5 + $0x60] sm:$0xf] }
  0xf8   :  { %3845 = vmatpush.bf16.msra.mxu0 %v6759_v54  ;;  %v6603_v54 = vor.u32 %v8841_v47, %v6602_v46  ;;  %v8641_v41 = vld [vmem:[#allocation5 + $0x84] sm:$0xf0]  ;;  %v6122_v44 = vld [vmem:[#allocation5 + $0x2e0] sm:$0xf]  ;;  %v6803_v47 = vor.u32 %v8891_v11, %v6802_v33  ;;  %v9171_v33 = vld [vmem:[#allocation5 + $0x1114] sm:$0xf0] }
  0xf9   :  { %3858 = vmatpush.bf16.msra.mxu1 %v7079_v58  ;;  %v6923_v58 = vor.u32 %v8921_v51, %v6922_v50  ;;  %v8801_v50 = vld [vmem:[#allocation5 + $0x584] sm:$0xf0]  ;;  %v5803_v56 = vor.u32 %v8641_v41, %v5802_v40  ;;  %v8686_v11 = vld [vmem:[#allocation5 + $0x1f4] sm:$0xf] }
  0xfa   :  { %3871 = vmatpush.bf16.msra.mxu2 %v7399_v59  ;;  %v8751_v59 = vld [vmem:[#allocation5 + $0x3f4] sm:$0xf0]  ;;  %v6443_v60 = vor.u32 %v8801_v50, %v6442_v49  ;;  %v9001_v41 = vld [vmem:[#allocation5 + $0xbc4] sm:$0xf0]  ;;  %v8676_v49 = vld [vmem:[#allocation5 + $0x1a4] sm:$0xf] }
  0xfb   :  { %3884 = vmatpush.bf16.msra.mxu3 %v7719_v2  ;;  %v6243_v2 = vor.u32 %v8751_v59, %v6242_v57  ;;  %v5762_v57 = vld [vmem:[#allocation5 + $0x10] sm:$0xf]  ;;  %v6123_v59 = vor.u32 %v8721_v48, %v6122_v44  ;;  %v7562_v44 = vld [vmem:[#allocation5 + $0xe20] sm:$0xf]  ;;  %v9161_v48 = vld [vmem:[#allocation5 + $0x10c4] sm:$0xf0] }
  0xfc   :  { %3846 = vmatpush.bf16.msra.mxu0 %v6719_v6  ;;  %v6202_v6 = vld [vmem:[#allocation5 + $0x380] sm:$0xf]  ;;  %v3640_v8 = vpop.f32.mrf.mxu0  ;;  %v5964_v50 = vld [vmem:[#allocation5 + $0x1c8] sm:$0xf0] }
  0xfd   :  { %3859 = vmatpush.bf16.msra.mxu1 %v7039_v14  ;;  %v8821_v14 = vld [vmem:[#allocation5 + $0x624] sm:$0xf0]  ;;  %v3653_v17 = vpop.f32.mrf.mxu1 }
  0xfe   :  { %3872 = vmatpush.bf16.msra.mxu2 %v7359_v16  ;;  %v3641_v16 = vadd.f32 %v3640_v8, %v3628_v62  ;;  %v8711_v62 = vld [vmem:[#allocation5 + $0x2b4] sm:$0xf0] }
  0xff   :  { %3885 = vmatpush.bf16.msra.mxu3 %v7679_v25  ;;  %3847 = vmatmul.bf16.vlgmr.msra.gmra.mxu0 %v9582_v15  ;;  %v6523_v25 = vor.u32 %v8821_v14, %v6522_v13  ;;  %v8871_v13 = vld [vmem:[#allocation5 + $0x7b4] sm:$0xf0] }
 0x100   :  { %3891 = vmatpush.bf16.msrb.mxu0 %v6043_v20  ;;  %3860 = vmatmul.bf16.vlgmr.msra.gmra.mxu1 %v9592_v37  ;;  %v5883_v20 = vor.u32 %v8661_v5, %v5882_v4  ;;  %v7642_v4 = vld [vmem:[#allocation5 + $0xec0] sm:$0xf]  ;;  %v9101_v5 = vld [vmem:[#allocation5 + $0xee4] sm:$0xf0] }
 0x101   :  { %3904 = vmatpush.bf16.msrb.mxu1 %v6363_v23  ;;  %3873 = vmatmul.bf16.vlgmr.msra.gmra.mxu2 %v9596_v43  ;;  %v3654_v23 = vadd.f32 %v3653_v17, %v3641_v16  ;;  %v6083_v16 = vor.u32 %v8711_v62, %v6082_v61  ;;  %v9151_v61 = vld [vmem:[#allocation5 + $0x1074] sm:$0xf0]  ;;  %v8666_v62 = vld [vmem:[#allocation5 + $0x154] sm:$0xf] }
 0x102   :  { %3917 = vmatpush.bf16.msrb.mxu2 %v6683_v24  ;;  %3886 = vmatmul.bf16.vlgmr.msra.gmra.mxu3 %v9594_v39  ;;  %v6203_v24 = vor.u32 %v8741_v10, %v6202_v6  ;;  %v7962_v6 = vld [vmem:[#allocation5 + $0x1140] sm:$0xf]  ;;  %v6722_v10 = vld [vmem:[#allocation5 + $0x790] sm:$0xf] }
 0x103   :  { %3930 = vmatpush.bf16.msrb.mxu3 %v7003_v29  ;;  %v6843_v29 = vor.u32 %v8901_v19, %v6842_v12  ;;  %v8696_v12 = vld [vmem:[#allocation5 + $0x244] sm:$0xf]  ;;  %v6044_v19 = vld [vmem:[#allocation5 + $0x268] sm:$0xf0] }
 0x104   :  { %3892 = vmatpush.bf16.msrb.mxu0 %v6003_v34  ;;  %v5843_v34 = vor.u32 %v8651_v27, %v5842_v26  ;;  %v3666_v35 = vpop.f32.mrf.mxu2  ;;  %v6723_v27 = vor.u32 %v8871_v13, %v6722_v10 }
 0x105   :  { %3905 = vmatpush.bf16.msrb.mxu1 %v6323_v36  ;;  %v6163_v36 = vor.u32 %v8731_v30, %v6162_v28  ;;  %v3667_v46 = vadd.f32 %v3666_v35, %v3654_v23  ;;  %v3655_v51 = vpop.f32.mrf.mxu1  ;;  %v7643_v23 = vor.u32 %v9101_v5, %v7642_v4  ;;  %v9011_v28 = vld [vmem:[#allocation5 + $0xc14] sm:$0xf0]  ;;  %v8981_v5 = vld [vmem:[#allocation5 + $0xb24] sm:$0xf0] }
 0x106   :  { %3918 = vmatpush.bf16.msrb.mxu2 %v6643_v38  ;;  %v6483_v38 = vor.u32 %v8811_v32, %v6482_v31  ;;  %v9091_v30 = vld [vmem:[#allocation5 + $0xe94] sm:$0xf0]  ;;  %v6047_v31 = vor.u32 %v8696_v12, %v6044_v19  ;;  %v7922_v32 = vld [vmem:[#allocation5 + $0x10f0] sm:$0xf]  ;;  %v5884_v12 = vld [vmem:[#allocation5 + $0x128] sm:$0xf0] }
 0x107   :  { %3931 = vmatpush.bf16.msrb.mxu3 %v6963_v45  ;;  %v3642_v45 = vpop.f32.mrf.mxu0  ;;  %v7923_v40 = vor.u32 %v9171_v33, %v7922_v32  ;;  %v5844_v32 = vld [vmem:[#allocation5 + $0xd8] sm:$0xf0] }
 0x108   :  { %3893 = vmatpush.bf16.msrb.mxu0 %v5963_v52  ;;  %v3679_v52 = vpop.f32.mrf.mxu3  ;;  %v9081_v45 = vld [vmem:[#allocation5 + $0xe44] sm:$0xf0] }
 0x109   :  { %3906 = vmatpush.bf16.msrb.mxu1 %v6283_v53  ;;  %v6762_v53 = vld [vmem:[#allocation5 + $0x7e0] sm:$0xf]  ;;  %v9631_v55 = vadd.f32 %v3679_v52, %v3667_v46  ;;  %v7563_v52 = vor.u32 %v9081_v45, %v7562_v44  ;;  %v9041_v45 = vld [vmem:[#allocation5 + $0xd04] sm:$0xf0] }
 0x10a   :  { %3919 = vmatpush.bf16.msrb.mxu2 %v6603_v54  ;;  %v8881_v54 = vld [vmem:[#allocation5 + $0x804] sm:$0xf0]  ;;  %v7402_v44 = vld [vmem:[#allocation5 + $0xce0] sm:$0xf] }
 0x10b   :  { %3932 = vmatpush.bf16.msrb.mxu3 %v6923_v58  ;;  %v8631_v58 = vld [vmem:[#allocation5 + $0x34] sm:$0xf0]  ;;  %v6763_v0 = vor.u32 %v8881_v54, %v6762_v53  ;;  %v7202_v53 = vld [vmem:[#allocation5 + $0xb50] sm:$0xf] }
 0x10c   :  { %3894 = vmatpush.bf16.msrb.mxu0 %v5923_v1  ;;  %v8791_v1 = vld [vmem:[#allocation5 + $0x534] sm:$0xf0]  ;;  %v5763_v8 = vor.u32 %v8631_v58, %v5762_v57  ;;  %v3668_v14 = vpop.f32.mrf.mxu2  ;;  %v7522_v57 = vld [vmem:[#allocation5 + $0xdd0] sm:$0xf] }
 0x10d   :  { %3907 = vmatpush.bf16.msrb.mxu1 %v6243_v2  ;;  %v7322_v2 = vld [vmem:[#allocation5 + $0xc40] sm:$0xf]  ;;  %v6403_v17 = vor.u32 %v8791_v1, %v6402_v63  ;;  %v9071_v58 = vld [vmem:[#allocation5 + $0xdf4] sm:$0xf0]  ;;  %v5924_v63 = vld [vmem:[#allocation5 + $0x178] sm:$0xf0] }
 0x10e   :  { %3920 = vmatpush.bf16.msrb.mxu2 %v6563_v3  ;;  %v9021_v3 = vld [vmem:[#allocation5 + $0xc64] sm:$0xf0]  ;;  %v7523_v1 = vor.u32 %v9071_v58, %v7522_v57  ;;  %v5927_v13 = vor.u32 %v8666_v62, %v5924_v63  ;;  %v7802_v14 = vld [vmem:[#allocation5 + $0x1000] sm:$0xf]  ;;  %v8951_v57 = vld [vmem:[#allocation5 + $0xa34] sm:$0xf0] }
 0x10f   :  { %3933 = vmatpush.bf16.msrb.mxu3 %v6883_v9  ;;  %v9181_v9 = vld [vmem:[#allocation5 + $0x1164] sm:$0xf0]  ;;  %v7362_v58 = vld [vmem:[#allocation5 + $0xc90] sm:$0xf]  ;;  %v9111_v63 = vld [vmem:[#allocation5 + $0xf34] sm:$0xf0] }
 0x110   :  { %3895 = vmatpush.bf16.msrb.mxu0 %v5883_v20  ;;  %v7323_v20 = vor.u32 %v9021_v3, %v7322_v2  ;;  %v7963_v26 = vor.u32 %v9181_v9, %v7962_v6  ;;  %v7162_v2 = vld [vmem:[#allocation5 + $0xb00] sm:$0xf]  ;;  %v7682_v62 = vld [vmem:[#allocation5 + $0xf10] sm:$0xf] }
 0x111   :  { %3908 = vmatpush.bf16.msrb.mxu1 %v6203_v24  ;;  %v7282_v24 = vld [vmem:[#allocation5 + $0xbf0] sm:$0xf]  ;;  %v7482_v6 = vld [vmem:[#allocation5 + $0xd80] sm:$0xf] }
 0x112   :  { %3921 = vmatpush.bf16.msrb.mxu2 %v6523_v25  ;;  %v3681_v25 = vpop.f32.mrf.mxu3  ;;  %v7283_v35 = vor.u32 %v9011_v28, %v7282_v24  ;;  %v7122_v24 = vld [vmem:[#allocation5 + $0xab0] sm:$0xf]  ;;  %v9051_v28 = vld [vmem:[#allocation5 + $0xd54] sm:$0xf0] }
 0x113   :  { %3934 = vmatpush.bf16.msrb.mxu3 %v6843_v29  ;;  %v7602_v29 = vld [vmem:[#allocation5 + $0xe70] sm:$0xf] }
 0x114   :  { %3896 = vmatpush.bf16.msrb.mxu0 %v5843_v34  ;;  %v6004_v34 = vld [vmem:[#allocation5 + $0x218] sm:$0xf0] }
 0x115   :  { %3909 = vmatpush.bf16.msrb.mxu1 %v6163_v36  ;;  %v7603_v36 = vor.u32 %v9091_v30, %v7602_v29  ;;  %v6007_v46 = vor.u32 %v8686_v11, %v6004_v34  ;;  %v7762_v29 = vld [vmem:[#allocation5 + $0xfb0] sm:$0xf]  ;;  %v9131_v30 = vld [vmem:[#allocation5 + $0xfd4] sm:$0xf0]  ;;  %v7082_v34 = vld [vmem:[#allocation5 + $0xa60] sm:$0xf] }
 0x116   :  { %3922 = vmatpush.bf16.msrb.mxu2 %v6483_v38  ;;  %v7242_v38 = vld [vmem:[#allocation5 + $0xba0] sm:$0xf] }
 0x117   :  { %3935 = vmatpush.bf16.msrb.mxu3 %v6803_v47  ;;  %v7882_v47 = vld [vmem:[#allocation5 + $0x10a0] sm:$0xf]  ;;  %v7243_v51 = vor.u32 %v9001_v41, %v7242_v38  ;;  %v8961_v41 = vld [vmem:[#allocation5 + $0xa84] sm:$0xf0] }
 0x118   :  { %3897 = vmatpush.bf16.msrb.mxu0 %v5803_v56  ;;  %v7883_v54 = vor.u32 %v9161_v48, %v7882_v47  ;;  %v8991_v56 = vld [vmem:[#allocation5 + $0xb74] sm:$0xf0]  ;;  %v7722_v48 = vld [vmem:[#allocation5 + $0xf60] sm:$0xf] }
 0x119   :  { %3910 = vmatpush.bf16.msrb.mxu1 %v6123_v59  ;;  %v5967_v59 = vor.u32 %v8676_v49, %v5964_v50  ;;  %v9121_v49 = vld [vmem:[#allocation5 + $0xf84] sm:$0xf0] }
 0x11a   :  { %3923 = vmatpush.bf16.msrb.mxu2 %v6443_v60  ;;  %v7842_v60 = vld [vmem:[#allocation5 + $0x1050] sm:$0xf] }
 0x11b   :  { %3936 = vmatpush.bf16.msrb.mxu3 %v6763_v0  ;;  %v7203_v0 = vor.u32 %v8991_v56, %v7202_v53  ;;  %v7843_v4 = vor.u32 %v9151_v61, %v7842_v60  ;;  %v5804_v53 = vld [vmem:[#allocation5 + $0x88] sm:$0xf0]  ;;  %v7403_v56 = vor.u32 %v9041_v45, %v7402_v44  ;;  %v7723_v60 = vor.u32 %v9121_v49, %v7722_v48  ;;  %v9031_v61 = vld [vmem:[#allocation5 + $0xcb4] sm:$0xf0]  ;;  %v8916_v45 = vld [vmem:[#allocation5 + $0x924] sm:$0xf] }
 0x11c   :  { %3898 = vmatpush.bf16.msrb.mxu0 %v5763_v8  ;;  %v3692_v3 = vpop.f32.mrf.mxu0  ;;  %v9061_v8 = vld [vmem:[#allocation5 + $0xda4] sm:$0xf0]  ;;  %v6604_v44 = vld [vmem:[#allocation5 + $0x6c8] sm:$0xf0]  ;;  %v8996_v49 = vld [vmem:[#allocation5 + $0xba4] sm:$0xf] }
 0x11d   :  { %3911 = vmatpush.bf16.msrb.mxu1 %v6083_v16  ;;  %v3693_v9 = vadd.f32 %v3692_v3, %v9631_v55  ;;  %v3705_v10 = vpop.f32.mrf.mxu1  ;;  %v9141_v16 = vld [vmem:[#allocation5 + $0x1024] sm:$0xf0]  ;;  %v8856_v3 = vld [vmem:[#allocation5 + $0x744] sm:$0xf] }
 0x11e   :  { %3924 = vmatpush.bf16.msrb.mxu2 %v6403_v17  ;;  %v8656_v17 = vld [vmem:[#allocation5 + $0x104] sm:$0xf]  ;;  %v7803_v25 = vor.u32 %v9141_v16, %v7802_v14  ;;  %v7683_v16 = vor.u32 %v9111_v63, %v7682_v62  ;;  %v8986_v62 = vld [vmem:[#allocation5 + $0xb54] sm:$0xf]  ;;  %v7204_v63 = vld [vmem:[#allocation5 + $0xb78] sm:$0xf0] }
 0x11f   :  { %3937 = vmatpush.bf16.msrb.mxu3 %v6723_v27  ;;  %3899 = vmatmul.bf16.vlgmr.msrb.gmra.mxu0 %v9585_v21  ;;  %v9638_v19 = vadd.f32 %v3705_v10, %v3693_v9  ;;  %v7442_v27 = vld [vmem:[#allocation5 + $0xd30] sm:$0xf]  ;;  %v5887_v55 = vor.u32 %v8656_v17, %v5884_v12  ;;  %v7363_v9 = vor.u32 %v9031_v61, %v7362_v58  ;;  %v8626_v10 = vld [vmem:[#allocation5 + $0x14] sm:$0xf]  ;;  %v9016_v12 = vld [vmem:[#allocation5 + $0xc44] sm:$0xf] }
 0x120   :  { %3943 = vmatpush.bf16.msra.mxu0 %v7323_v20  ;;  %3912 = vmatmul.bf16.vlgmr.msrb.gmra.mxu1 %v9587_v22  ;;  %v7163_v20 = vor.u32 %v8981_v5, %v7162_v2  ;;  %v7443_v11 = vor.u32 %v9051_v28, %v7442_v27  ;;  %v6364_v2 = vld [vmem:[#allocation5 + $0x4e8] sm:$0xf0]  ;;  %v8936_v5 = vld [vmem:[#allocation5 + $0x9c4] sm:$0xf]  ;;  %v8846_v27 = vld [vmem:[#allocation5 + $0x6f4] sm:$0xf] }
 0x121   :  { %3956 = vmatpush.bf16.msra.mxu1 %v7643_v23  ;;  %3925 = vmatmul.bf16.vlgmr.msrb.gmra.mxu2 %v9580_v7  ;;  %v7483_v23 = vor.u32 %v9061_v8, %v7482_v6  ;;  %v7004_v6 = vld [vmem:[#allocation5 + $0x9e8] sm:$0xf0]  ;;  %v6884_v58 = vld [vmem:[#allocation5 + $0x8f8] sm:$0xf0] }
 0x122   :  { %3969 = vmatpush.bf16.msra.mxu2 %v7963_v26  ;;  %3938 = vmatmul.bf16.vlgmr.msrb.gmra.mxu3 %v9582_v15  ;;  %v8971_v26 = vld [vmem:[#allocation5 + $0xad4] sm:$0xf0] }
 0x123   :  { %3982 = vmatpush.bf16.msra.mxu3 %v6047_v31  ;;  %v8646_v31 = vld [vmem:[#allocation5 + $0xb4] sm:$0xf]  ;;  %v7123_v33 = vor.u32 %v8971_v26, %v7122_v24  ;;  %v7007_v24 = vor.u32 %v8936_v5, %v7004_v6  ;;  %v6324_v26 = vld [vmem:[#allocation5 + $0x498] sm:$0xf0]  ;;  %v6524_v6 = vld [vmem:[#allocation5 + $0x628] sm:$0xf0] }
 0x124   :  { %3944 = vmatpush.bf16.msra.mxu0 %v7283_v35  ;;  %v3694_v35 = vpop.f32.mrf.mxu0  ;;  %v3718_v38 = vpop.f32.mrf.mxu2  ;;  %v5847_v47 = vor.u32 %v8646_v31, %v5844_v32  ;;  %v6964_v31 = vld [vmem:[#allocation5 + $0x998] sm:$0xf0] }
 0x125   :  { %3957 = vmatpush.bf16.msra.mxu1 %v7603_v36  ;;  %v684_v36 = vperm.slane %v9614_v18, 2  ;;  %v7042_v18 = vld [vmem:[#allocation5 + $0xa10] sm:$0xf] }
 0x126   :  { %3970 = vmatpush.bf16.msra.mxu2 %v7923_v40  ;;  %v7763_v40 = vor.u32 %v9131_v30, %v7762_v29  ;;  %v7043_v8 = vor.u32 %v8951_v57, %v7042_v18  ;;  %v6644_v29 = vld [vmem:[#allocation5 + $0x718] sm:$0xf0]  ;;  %v8926_v30 = vld [vmem:[#allocation5 + $0x974] sm:$0xf] }
 0x127   :  { %3983 = vmatpush.bf16.msra.mxu3 %v6007_v46  ;;  %v3707_v46 = vpop.f32.mrf.mxu1  ;;  %v3719_v50 = vadd.f32 %v3718_v38, %v684_v36  ;;  %v6647_v35 = vor.u32 %v8846_v27, %v6644_v29  ;;  %v6967_v36 = vor.u32 %v8926_v30, %v6964_v31  ;;  %v8756_v38 = vld [vmem:[#allocation5 + $0x424] sm:$0xf]  ;;  %v6564_v18 = vld [vmem:[#allocation5 + $0x678] sm:$0xf0]  ;;  %v8906_v57 = vld [vmem:[#allocation5 + $0x8d4] sm:$0xf] }
 0x128   :  { %3945 = vmatpush.bf16.msra.mxu0 %v7243_v51  ;;  %v3731_v51 = vpop.f32.mrf.mxu3  ;;  %v6924_v46 = vld [vmem:[#allocation5 + $0x948] sm:$0xf0]  ;;  %v8806_v27 = vld [vmem:[#allocation5 + $0x5b4] sm:$0xf]  ;;  %v6804_v29 = vld [vmem:[#allocation5 + $0x858] sm:$0xf0] }
 0x129   :  { %3958 = vmatpush.bf16.msra.mxu1 %v7563_v52  ;;  %v8636_v52 = vld [vmem:[#allocation5 + $0x64] sm:$0xf]  ;;  %v8966_v31 = vld [vmem:[#allocation5 + $0xab4] sm:$0xf] }
 0x12a   :  { %3971 = vmatpush.bf16.msra.mxu2 %v7883_v54  ;;  %v7083_v54 = vor.u32 %v8961_v41, %v7082_v34  ;;  %v7284_v34 = vld [vmem:[#allocation5 + $0xc18] sm:$0xf0]  ;;  %v8836_v41 = vld [vmem:[#allocation5 + $0x6a4] sm:$0xf] }
 0x12b   :  { %3984 = vmatpush.bf16.msra.mxu3 %v5967_v59  ;;  %v9641_v59 = vadd.f32 %v3731_v51, %v3719_v50  ;;  %v7244_v50 = vld [vmem:[#allocation5 + $0xbc8] sm:$0xf0]  ;;  %v6607_v51 = vor.u32 %v8836_v41, %v6604_v44 }
 0x12c   :  { %3946 = vmatpush.bf16.msra.mxu0 %v7203_v0  ;;  %v5807_v0 = vor.u32 %v8636_v52, %v5804_v53  ;;  %v3720_v14 = vpop.f32.mrf.mxu2  ;;  %v6927_v52 = vor.u32 %v8916_v45, %v6924_v46  ;;  %v8746_v53 = vld [vmem:[#allocation5 + $0x3d4] sm:$0xf]  ;;  %v6444_v44 = vld [vmem:[#allocation5 + $0x588] sm:$0xf0]  ;;  %v8876_v45 = vld [vmem:[#allocation5 + $0x7e4] sm:$0xf] }
 0x12d   :  { %3959 = vmatpush.bf16.msra.mxu1 %v7523_v1  ;;  %v8776_v1 = vld [vmem:[#allocation5 + $0x4c4] sm:$0xf]  ;;  %v7207_v14 = vor.u32 %v8986_v62, %v7204_v63  ;;  %v6764_v46 = vld [vmem:[#allocation5 + $0x808] sm:$0xf0]  ;;  %v6724_v62 = vld [vmem:[#allocation5 + $0x7b8] sm:$0xf0] }
 0x12e   :  { %3972 = vmatpush.bf16.msra.mxu2 %v7843_v4  ;;  %v6684_v4 = vld [vmem:[#allocation5 + $0x768] sm:$0xf0]  ;;  %v6367_v17 = vor.u32 %v8776_v1, %v6364_v2  ;;  %v6887_v1 = vor.u32 %v8906_v57, %v6884_v58  ;;  %v8736_v2 = vld [vmem:[#allocation5 + $0x384] sm:$0xf]  ;;  %v6767_v57 = vor.u32 %v8876_v45, %v6764_v46  ;;  %v8786_v58 = vld [vmem:[#allocation5 + $0x514] sm:$0xf] }
 0x12f   :  { %3985 = vmatpush.bf16.msra.mxu3 %v5927_v13  ;;  %v5764_v13 = vld [vmem:[#allocation5 + $0x38] sm:$0xf0]  ;;  %v9096_v63 = vld [vmem:[#allocation5 + $0xec4] sm:$0xf]  ;;  %v8682_v45 = vld [vmem:[#allocation5 + $0x1cc] sm:$0xf0] }
 0x130   :  { %3947 = vmatpush.bf16.msra.mxu0 %v7163_v20  ;;  %v7324_v20 = vld [vmem:[#allocation5 + $0xc68] sm:$0xf0]  ;;  %v3733_v28 = vpop.f32.mrf.mxu3  ;;  %v6290_v46 = vld [vmem:[#allocation5 + $0x428] sm:$0xf] }
 0x131   :  { %3960 = vmatpush.bf16.msra.mxu1 %v7483_v23  ;;  %v6687_v23 = vor.u32 %v8856_v3, %v6684_v4  ;;  %v7327_v32 = vor.u32 %v9016_v12, %v7324_v20  ;;  %v6204_v3 = vld [vmem:[#allocation5 + $0x3a8] sm:$0xf0]  ;;  %v8816_v4 = vld [vmem:[#allocation5 + $0x604] sm:$0xf]  ;;  %v6484_v28 = vld [vmem:[#allocation5 + $0x5d8] sm:$0xf0] }
 0x132   :  { %3973 = vmatpush.bf16.msra.mxu2 %v7803_v25  ;;  %v8766_v25 = vld [vmem:[#allocation5 + $0x474] sm:$0xf]  ;;  %v7164_v12 = vld [vmem:[#allocation5 + $0xb28] sm:$0xf0] }
 0x133   :  { %3986 = vmatpush.bf16.msra.mxu3 %v5887_v55  ;;  %v5767_v55 = vor.u32 %v8626_v10, %v5764_v13 }
 0x134   :  { %3948 = vmatpush.bf16.msra.mxu0 %v7123_v33  ;;  %v6327_v33 = vor.u32 %v8766_v25, %v6324_v26  ;;  %v8726_v25 = vld [vmem:[#allocation5 + $0x334] sm:$0xf]  ;;  %v6164_v26 = vld [vmem:[#allocation5 + $0x358] sm:$0xf0] }
 0x135   :  { %3961 = vmatpush.bf16.msra.mxu1 %v7443_v11  ;;  %v9006_v11 = vld [vmem:[#allocation5 + $0xbf4] sm:$0xf]  ;;  %v6167_v30 = vor.u32 %v8726_v25, %v6164_v26 }
 0x136   :  { %3974 = vmatpush.bf16.msra.mxu2 %v7763_v40  ;;  %v6284_v40 = vld [vmem:[#allocation5 + $0x448] sm:$0xf0] }
 0x137   :  { %3987 = vmatpush.bf16.msra.mxu3 %v5847_v47  ;;  %v7287_v47 = vor.u32 %v9006_v11, %v7284_v34  ;;  %v6287_v48 = vor.u32 %v8756_v38, %v6284_v40  ;;  %v6487_v11 = vor.u32 %v8806_v27, %v6484_v28  ;;  %v8796_v38 = vld [vmem:[#allocation5 + $0x564] sm:$0xf]  ;;  %v7604_v27 = vld [vmem:[#allocation5 + $0xe98] sm:$0xf0]  ;;  %v9166_v28 = vld [vmem:[#allocation5 + $0x10f4] sm:$0xf] }
 0x138   :  { %3949 = vmatpush.bf16.msra.mxu0 %v7083_v54  ;;  %v6244_v54 = vld [vmem:[#allocation5 + $0x3f8] sm:$0xf0] }
 0x139   :  { %3962 = vmatpush.bf16.msra.mxu1 %v7403_v56  ;;  %v8826_v56 = vld [vmem:[#allocation5 + $0x654] sm:$0xf]  ;;  %v6247_v61 = vor.u32 %v8746_v53, %v6244_v54  ;;  %v7084_v53 = vld [vmem:[#allocation5 + $0xa88] sm:$0xf0] }
 0x13a   :  { %3975 = vmatpush.bf16.msra.mxu2 %v7723_v60  ;;  %v7247_v60 = vor.u32 %v8996_v49, %v7244_v50  ;;  %v8956_v50 = vld [vmem:[#allocation5 + $0xa64] sm:$0xf]  ;;  %v8706_v54 = vld [vmem:[#allocation5 + $0x294] sm:$0xf] }
 0x13b   :  { %3988 = vmatpush.bf16.msra.mxu3 %v5807_v0  ;;  %v6567_v0 = vor.u32 %v8826_v56, %v6564_v18  ;;  %v6084_v56 = vld [vmem:[#allocation5 + $0x2b8] sm:$0xf0]  ;;  %v6447_v18 = vor.u32 %v8796_v38, %v6444_v44  ;;  %v9156_v38 = vld [vmem:[#allocation5 + $0x10a4] sm:$0xf]  ;;  %v5970_v44 = vld [vmem:[#allocation5 + $0x1a8] sm:$0xf] }
 0x13c   :  { %3950 = vmatpush.bf16.msra.mxu0 %v7043_v8  ;;  %v3744_v5 = vpop.f32.mrf.mxu0  ;;  %v8896_v8 = vld [vmem:[#allocation5 + $0x884] sm:$0xf] }
 0x13d   :  { %3963 = vmatpush.bf16.msra.mxu1 %v7363_v9  ;;  %v6844_v9 = vld [vmem:[#allocation5 + $0x8a8] sm:$0xf0]  ;;  %v3745_v10 = vadd.f32 %v3744_v5, %v9641_v59  ;;  %v3757_v13 = vpop.f32.mrf.mxu1  ;;  %v6087_v5 = vor.u32 %v8706_v54, %v6084_v56  ;;  %v9146_v54 = vld [vmem:[#allocation5 + $0x1054] sm:$0xf]  ;;  %v7844_v56 = vld [vmem:[#allocation5 + $0x1078] sm:$0xf0] }
 0x13e   :  { %3976 = vmatpush.bf16.msra.mxu2 %v7683_v16  ;;  %v6207_v16 = vor.u32 %v8736_v2, %v6204_v3  ;;  %v9176_v2 = vld [vmem:[#allocation5 + $0x1144] sm:$0xf]  ;;  %v7964_v3 = vld [vmem:[#allocation5 + $0x1168] sm:$0xf0] }
 0x13f   :  { %3989 = vmatpush.bf16.msra.mxu3 %v5767_v55  ;;  %3951 = vmatmul.bf16.vlgmr.msra.gmra.mxu0 %v9592_v37  ;;  %v3758_v20 = vadd.f32 %v3757_v13, %v3745_v10  ;;  %v8886_v55 = vld [vmem:[#allocation5 + $0x834] sm:$0xf] }
 0x140   :  { %3995 = vmatpush.bf16.msrb.mxu0 %v6367_v17  ;;  %3964 = vmatmul.bf16.vlgmr.msra.gmra.mxu1 %v9596_v43  ;;  %v8976_v17 = vld [vmem:[#allocation5 + $0xb04] sm:$0xf]  ;;  %v6807_v34 = vor.u32 %v8886_v55, %v6804_v29  ;;  %v7924_v55 = vld [vmem:[#allocation5 + $0x1118] sm:$0xf0] }
 0x141   :  { %4008 = vmatpush.bf16.msrb.mxu1 %v6687_v23  ;;  %3977 = vmatmul.bf16.vlgmr.msra.gmra.mxu2 %v9594_v39  ;;  %v6527_v23 = vor.u32 %v8816_v4, %v6524_v6  ;;  %v7167_v59 = vor.u32 %v8976_v17, %v7164_v12  ;;  %v6050_v4 = vld [vmem:[#allocation5 + $0x248] sm:$0xf]  ;;  %v8702_v6 = vld [vmem:[#allocation5 + $0x26c] sm:$0xf0] }
 0x142   :  { %4021 = vmatpush.bf16.msrb.mxu2 %v7007_v24  ;;  %3990 = vmatmul.bf16.vlgmr.msra.gmra.mxu3 %v9585_v21  ;;  %v6847_v24 = vor.u32 %v8896_v8, %v6844_v9  ;;  %v8946_v8 = vld [vmem:[#allocation5 + $0xa14] sm:$0xf]  ;;  %v7044_v9 = vld [vmem:[#allocation5 + $0xa38] sm:$0xf0]  ;;  %v8782_v17 = vld [vmem:[#allocation5 + $0x4ec] sm:$0xf0]  ;;  %v6051_v25 = vor.u32 %v8702_v6, %v6050_v4 }
 0x143   :  { %4034 = vmatpush.bf16.msrb.mxu3 %v7327_v32  ;;  %v7124_v32 = vld [vmem:[#allocation5 + $0xad8] sm:$0xf0]  ;;  %v7047_v26 = vor.u32 %v8946_v8, %v7044_v9  ;;  %v7484_v6 = vld [vmem:[#allocation5 + $0xda8] sm:$0xf0]  ;;  %v9136_v8 = vld [vmem:[#allocation5 + $0x1004] sm:$0xf] }
 0x144   :  { %3996 = vmatpush.bf16.msrb.mxu0 %v6327_v33  ;;  %v3770_v33 = vpop.f32.mrf.mxu2  ;;  %v3746_v40 = vpop.f32.mrf.mxu0  ;;  %v7127_v49 = vor.u32 %v8966_v31, %v7124_v32  ;;  %v6330_v31 = vld [vmem:[#allocation5 + $0x478] sm:$0xf]  ;;  %v8772_v32 = vld [vmem:[#allocation5 + $0x49c] sm:$0xf0]  ;;  %v7804_v9 = vld [vmem:[#allocation5 + $0x1028] sm:$0xf0] }
 0x145   :  { %4009 = vmatpush.bf16.msrb.mxu1 %v6647_v35  ;;  %v8716_v35 = vld [vmem:[#allocation5 + $0x2e4] sm:$0xf]  ;;  %v3771_v41 = vadd.f32 %v3770_v33, %v3758_v20  ;;  %v7967_v20 = vor.u32 %v9176_v2, %v7964_v3  ;;  %v7884_v40 = vld [vmem:[#allocation5 + $0x10c8] sm:$0xf0] }
 0x146   :  { %4022 = vmatpush.bf16.msrb.mxu2 %v6967_v36  ;;  %v6124_v36 = vld [vmem:[#allocation5 + $0x308] sm:$0xf0]  ;;  %v9654_v2 = vld [vmem:[#allocation7] sm:$0xff] }
 0x147   :  { %4035 = vmatpush.bf16.msrb.mxu3 %v7287_v47  ;;  %v3783_v47 = vpop.f32.mrf.mxu3  ;;  %v685_v3 = vperm.slane %v9654_v2, 3 }
 0x148   :  { %3997 = vmatpush.bf16.msrb.mxu0 %v6287_v48  ;;  %v3759_v48 = vpop.f32.mrf.mxu1 }
 0x149   :  { %4010 = vmatpush.bf16.msrb.mxu1 %v6607_v51  ;;  %v9648_v51 = vadd.f32 %v3783_v47, %v3771_v41  ;;  %v6331_v41 = vor.u32 %v8772_v32, %v6330_v31  ;;  %v8762_v47 = vld [vmem:[#allocation5 + $0x44c] sm:$0xf0]  ;;  %v6170_v31 = vld [vmem:[#allocation5 + $0x338] sm:$0xf]  ;;  %v8732_v32 = vld [vmem:[#allocation5 + $0x35c] sm:$0xf0] }
 0x14a   :  { %4023 = vmatpush.bf16.msrb.mxu2 %v6927_v52  ;;  %v6127_v52 = vor.u32 %v8716_v35, %v6124_v36  ;;  %v7564_v36 = vld [vmem:[#allocation5 + $0xe48] sm:$0xf0] }
 0x14b   :  { %4036 = vmatpush.bf16.msrb.mxu3 %v7247_v60  ;;  %v6404_v60 = vld [vmem:[#allocation5 + $0x538] sm:$0xf0] }
 0x14c   :  { %3998 = vmatpush.bf16.msrb.mxu0 %v6247_v61  ;;  %v8866_v61 = vld [vmem:[#allocation5 + $0x794] sm:$0xf]  ;;  %v3772_v10 = vpop.f32.mrf.mxu2  ;;  %v6407_v13 = vor.u32 %v8786_v58, %v6404_v60  ;;  %v8672_v58 = vld [vmem:[#allocation5 + $0x17c] sm:$0xf0]  ;;  %v6250_v60 = vld [vmem:[#allocation5 + $0x3d8] sm:$0xf] }
 0x14d   :  { %4011 = vmatpush.bf16.msrb.mxu1 %v6567_v0  ;;  %v7644_v0 = vld [vmem:[#allocation5 + $0xee8] sm:$0xf0] }
 0x14e   :  { %4024 = vmatpush.bf16.msrb.mxu2 %v6887_v1  ;;  %v7087_v1 = vor.u32 %v8956_v50, %v7084_v53  ;;  %v7647_v12 = vor.u32 %v9096_v63, %v7644_v0  ;;  %v9066_v50 = vld [vmem:[#allocation5 + $0xdd4] sm:$0xf]  ;;  %v7524_v53 = vld [vmem:[#allocation5 + $0xdf8] sm:$0xf0]  ;;  %v7847_v0 = vor.u32 %v9146_v54, %v7844_v56 }
 0x14f   :  { %4037 = vmatpush.bf16.msrb.mxu3 %v7207_v14  ;;  %v6727_v14 = vor.u32 %v8866_v61, %v6724_v62  ;;  %v8752_v61 = vld [vmem:[#allocation5 + $0x3fc] sm:$0xf0]  ;;  %v7527_v63 = vor.u32 %v9066_v50, %v7524_v53  ;;  %v8722_v53 = vld [vmem:[#allocation5 + $0x30c] sm:$0xf0] }
 0x150   :  { %3999 = vmatpush.bf16.msrb.mxu0 %v6207_v16  ;;  %v6370_v16 = vld [vmem:[#allocation5 + $0x4c8] sm:$0xf]  ;;  %v6251_v10 = vor.u32 %v8752_v61, %v6250_v60  ;;  %v9106_v60 = vld [vmem:[#allocation5 + $0xf14] sm:$0xf] }
 0x151   :  { %4012 = vmatpush.bf16.msrb.mxu1 %v6527_v23  ;;  %v9086_v23 = vld [vmem:[#allocation5 + $0xe74] sm:$0xf]  ;;  %v6371_v29 = vor.u32 %v8782_v17, %v6370_v16 }
 0x152   :  { %4025 = vmatpush.bf16.msrb.mxu2 %v6847_v24  ;;  %v3785_v24 = vpop.f32.mrf.mxu3  ;;  %v7607_v33 = vor.u32 %v9086_v23, %v7604_v27  ;;  %v7444_v27 = vld [vmem:[#allocation5 + $0xd58] sm:$0xf0] }
 0x153   :  { %4038 = vmatpush.bf16.msrb.mxu3 %v7167_v59  ;;  %v6010_v59 = vld [vmem:[#allocation5 + $0x1f8] sm:$0xf]  ;;  %v7807_v24 = vor.u32 %v9136_v8, %v7804_v9  ;;  %v8942_v8 = vld [vmem:[#allocation5 + $0x9ec] sm:$0xf0]  ;;  %v7330_v9 = vld [vmem:[#allocation5 + $0xc48] sm:$0xf] }
 0x154   :  { %4000 = vmatpush.bf16.msrb.mxu0 %v6167_v30  ;;  %v8692_v30 = vld [vmem:[#allocation5 + $0x21c] sm:$0xf0] }
 0x155   :  { %4013 = vmatpush.bf16.msrb.mxu1 %v6487_v11  ;;  %v7927_v11 = vor.u32 %v9166_v28, %v7924_v55  ;;  %v6011_v35 = vor.u32 %v8692_v30, %v6010_v59  ;;  %v9126_v28 = vld [vmem:[#allocation5 + $0xfb4] sm:$0xf]  ;;  %v7764_v55 = vld [vmem:[#allocation5 + $0xfd8] sm:$0xf0]  ;;  %v5850_v59 = vld [vmem:[#allocation5 + $0xb8] sm:$0xf] }
 0x156   :  { %4026 = vmatpush.bf16.msrb.mxu2 %v6807_v34  ;;  %v9076_v34 = vld [vmem:[#allocation5 + $0xe24] sm:$0xf]  ;;  %v8652_v30 = vld [vmem:[#allocation5 + $0xdc] sm:$0xf0] }
 0x157   :  { %4039 = vmatpush.bf16.msrb.mxu3 %v7127_v49  ;;  %v7567_v48 = vor.u32 %v9076_v34, %v7564_v36  ;;  %v7887_v49 = vor.u32 %v9156_v38, %v7884_v40  ;;  %v7767_v34 = vor.u32 %v9126_v28, %v7764_v55  ;;  %v5851_v40 = vor.u32 %v8652_v30, %v5850_v59  ;;  %v6650_v28 = vld [vmem:[#allocation5 + $0x6f8] sm:$0xf]  ;;  %v8852_v55 = vld [vmem:[#allocation5 + $0x71c] sm:$0xf0] }
 0x158   :  { %4001 = vmatpush.bf16.msrb.mxu0 %v6127_v52  ;;  %v5971_v52 = vor.u32 %v8682_v45, %v5970_v44  ;;  %v9116_v44 = vld [vmem:[#allocation5 + $0xf64] sm:$0xf]  ;;  %v7724_v45 = vld [vmem:[#allocation5 + $0xf88] sm:$0xf0] }
 0x159   :  { %4014 = vmatpush.bf16.msrb.mxu1 %v6447_v18  ;;  %v6291_v18 = vor.u32 %v8762_v47, %v6290_v46  ;;  %v6171_v46 = vor.u32 %v8732_v32, %v6170_v31  ;;  %v5810_v47 = vld [vmem:[#allocation5 + $0x68] sm:$0xf]  ;;  %v8932_v31 = vld [vmem:[#allocation5 + $0x99c] sm:$0xf0]  ;;  %v7290_v32 = vld [vmem:[#allocation5 + $0xbf8] sm:$0xf] }
 0x15a   :  { %4027 = vmatpush.bf16.msrb.mxu2 %v6767_v57  ;;  %v5930_v57 = vld [vmem:[#allocation5 + $0x158] sm:$0xf] }
 0x15b   :  { %4040 = vmatpush.bf16.msrb.mxu3 %v7087_v1  ;;  %v9056_v1 = vld [vmem:[#allocation5 + $0xd84] sm:$0xf] }
 0x15c   :  { %4002 = vmatpush.bf16.msrb.mxu0 %v6087_v5  ;;  %v3796_v62 = vpop.f32.mrf.mxu0  ;;  %v5931_v5 = vor.u32 %v8672_v58, %v5930_v57  ;;  %v7487_v23 = vor.u32 %v9056_v1, %v7484_v6  ;;  %v9026_v57 = vld [vmem:[#allocation5 + $0xc94] sm:$0xf]  ;;  %v7364_v58 = vld [vmem:[#allocation5 + $0xcb8] sm:$0xf0]  ;;  %v7010_v6 = vld [vmem:[#allocation5 + $0x9c8] sm:$0xf] }
 0x15d   :  { %4015 = vmatpush.bf16.msrb.mxu1 %v6407_v13  ;;  %v9658_v4 = vadd.f32 %v3796_v62, %v9648_v51  ;;  %v5890_v13 = vld [vmem:[#allocation5 + $0x108] sm:$0xf]  ;;  %v3809_v16 = vpop.f32.mrf.mxu1  ;;  %v9046_v51 = vld [vmem:[#allocation5 + $0xd34] sm:$0xf]  ;;  %v7684_v62 = vld [vmem:[#allocation5 + $0xf38] sm:$0xf0] }
 0x15e   :  { %4028 = vmatpush.bf16.msrb.mxu2 %v6727_v14  ;;  %v8662_v14 = vld [vmem:[#allocation5 + $0x12c] sm:$0xf0] }
 0x15f   :  { %4041 = vmatpush.bf16.msrb.mxu3 %v7047_v26  ;;  %4003 = vmatmul.bf16.vlgmr.msrb.gmra.mxu0 %v9587_v22  ;;  %v4437_v17 = vmax.f32 %v9624_v42, %v9658_v4  ;;  %v5891_v26 = vor.u32 %v8662_v14, %v5890_v13  ;;  %v7367_v14 = vor.u32 %v9026_v57, %v7364_v58  ;;  %v6570_v57 = vld [vmem:[#allocation5 + $0x658] sm:$0xf]  ;;  %v8832_v58 = vld [vmem:[#allocation5 + $0x67c] sm:$0xf0]  ;;  %v9027_v42 = vld [vmem:[#allocation5 + $0xc9c] sm:$0xf] }
 0x160   :  { %4047 = vmatpush.bf16.msra.mxu0 %v7647_v12  ;;  %4016 = vmatmul.bf16.vlgmr.msrb.gmra.mxu1 %v9580_v7  ;;  %v6210_v12 = vld [vmem:[#allocation5 + $0x388] sm:$0xf]  ;;  %v7372_v4 = vld [vmem:[#allocation5 + $0xcc0] sm:$0xf0] }
 0x161   :  { %4060 = vmatpush.bf16.msra.mxu1 %v7967_v20  ;;  %4029 = vmatmul.bf16.vlgmr.msrb.gmra.mxu2 %v9582_v15  ;;  %v8742_v20 = vld [vmem:[#allocation5 + $0x3ac] sm:$0xf0] }
 0x162   :  { %4073 = vmatpush.bf16.msra.mxu2 %v6051_v25  ;;  %4042 = vmatmul.bf16.vlgmr.msrb.gmra.mxu3 %v9592_v37  ;;  %v3810_v25 = vadd.f32 %v3809_v16, %v685_v3  ;;  %v6690_v3 = vld [vmem:[#allocation5 + $0x748] sm:$0xf]  ;;  %v7687_v16 = vor.u32 %v9106_v60, %v7684_v62  ;;  %v6890_v60 = vld [vmem:[#allocation5 + $0x8d8] sm:$0xf] }
 0x163   :  { %4086 = vmatpush.bf16.msra.mxu3 %v6371_v29  ;;  %v6211_v29 = vor.u32 %v8742_v20, %v6210_v12  ;;  %v6090_v12 = vld [vmem:[#allocation5 + $0x298] sm:$0xf]  ;;  %v8712_v20 = vld [vmem:[#allocation5 + $0x2bc] sm:$0xf0] }
 0x164   :  { %4048 = vmatpush.bf16.msra.mxu0 %v7607_v33  ;;  %v3822_v33 = vpop.f32.mrf.mxu2  ;;  %v3798_v38 = vpop.f32.mrf.mxu0  ;;  %v6091_v30 = vor.u32 %v8712_v20, %v6090_v12  ;;  %v7210_v62 = vld [vmem:[#allocation5 + $0xb58] sm:$0xf]  ;;  %v8902_v12 = vld [vmem:[#allocation5 + $0x8ac] sm:$0xf0]  ;;  %v7170_v20 = vld [vmem:[#allocation5 + $0xb08] sm:$0xf] }
 0x165   :  { %4061 = vmatpush.bf16.msra.mxu1 %v7927_v11  ;;  %v7447_v11 = vor.u32 %v9046_v51, %v7444_v27  ;;  %v3823_v36 = vadd.f32 %v3822_v33, %v3810_v25  ;;  %v3811_v50 = vpop.f32.mrf.mxu1  ;;  %v7650_v51 = vld [vmem:[#allocation5 + $0xec8] sm:$0xf]  ;;  %v9102_v25 = vld [vmem:[#allocation5 + $0xeec] sm:$0xf0]  ;;  %v9012_v33 = vld [vmem:[#allocation5 + $0xc1c] sm:$0xf0] }
 0x166   :  { %4074 = vmatpush.bf16.msra.mxu2 %v6011_v35  ;;  %v9036_v35 = vld [vmem:[#allocation5 + $0xce4] sm:$0xf] }
 0x167   :  { %4087 = vmatpush.bf16.msra.mxu3 %v6331_v41  ;;  %v7404_v41 = vld [vmem:[#allocation5 + $0xd08] sm:$0xf0] }
 0x168   :  { %4049 = vmatpush.bf16.msra.mxu0 %v7567_v48  ;;  %v8642_v48 = vld [vmem:[#allocation5 + $0x8c] sm:$0xf0]  ;;  %v7407_v56 = vor.u32 %v9036_v35, %v7404_v41  ;;  %v7610_v35 = vld [vmem:[#allocation5 + $0xe78] sm:$0xf]  ;;  %v6610_v41 = vld [vmem:[#allocation5 + $0x6a8] sm:$0xf] }
 0x169   :  { %4062 = vmatpush.bf16.msra.mxu1 %v7887_v49  ;;  %v3835_v49 = vpop.f32.mrf.mxu3  ;;  %v5811_v61 = vor.u32 %v8642_v48, %v5810_v47  ;;  %v7250_v47 = vld [vmem:[#allocation5 + $0xba8] sm:$0xf]  ;;  %v9002_v48 = vld [vmem:[#allocation5 + $0xbcc] sm:$0xf0] }
 0x16a   :  { %4075 = vmatpush.bf16.msra.mxu2 %v5971_v52  ;;  %v6130_v52 = vld [vmem:[#allocation5 + $0x2e8] sm:$0xf]  ;;  %v9662_v54 = vadd.f32 %v3835_v49, %v3823_v36  ;;  %v9092_v36 = vld [vmem:[#allocation5 + $0xe9c] sm:$0xf0] }
 0x16b   :  { %4088 = vmatpush.bf16.msra.mxu3 %v6291_v18  ;;  %v7727_v18 = vor.u32 %v9116_v44, %v7724_v45  ;;  %v6131_v1 = vor.u32 %v8722_v53, %v6130_v52  ;;  %v8842_v44 = vld [vmem:[#allocation5 + $0x6cc] sm:$0xf0]  ;;  %v6930_v45 = vld [vmem:[#allocation5 + $0x928] sm:$0xf]  ;;  %v7611_v49 = vor.u32 %v9092_v36, %v7610_v35 }
 0x16c   :  { %4050 = vmatpush.bf16.msra.mxu0 %v7527_v63  ;;  %v5770_v63 = vld [vmem:[#allocation5 + $0x18] sm:$0xf]  ;;  %v3824_v13 = vpop.f32.mrf.mxu2  ;;  %v6611_v50 = vor.u32 %v8842_v44, %v6610_v41  ;;  %v7570_v52 = vld [vmem:[#allocation5 + $0xe28] sm:$0xf]  ;;  %v9082_v53 = vld [vmem:[#allocation5 + $0xe4c] sm:$0xf0] }
 0x16d   :  { %4063 = vmatpush.bf16.msra.mxu1 %v7847_v0  ;;  %v8632_v0 = vld [vmem:[#allocation5 + $0x3c] sm:$0xf0]  ;;  %v6850_v13 = vld [vmem:[#allocation5 + $0x888] sm:$0xf] }
 0x16e   :  { %4076 = vmatpush.bf16.msra.mxu2 %v5931_v5  ;;  %v8862_v5 = vld [vmem:[#allocation5 + $0x76c] sm:$0xf0] }
 0x16f   :  { %4089 = vmatpush.bf16.msra.mxu3 %v6251_v10  ;;  %v9022_v10 = vld [vmem:[#allocation5 + $0xc6c] sm:$0xf0] }
 0x170   :  { %4051 = vmatpush.bf16.msra.mxu0 %v7487_v23  ;;  %v5771_v23 = vor.u32 %v8632_v0, %v5770_v63  ;;  %v7331_v27 = vor.u32 %v9022_v10, %v7330_v9  ;;  %v8992_v63 = vld [vmem:[#allocation5 + $0xb7c] sm:$0xf0]  ;;  %v7571_v0 = vor.u32 %v9082_v53, %v7570_v52  ;;  %v6530_v9 = vld [vmem:[#allocation5 + $0x608] sm:$0xf]  ;;  %v8822_v10 = vld [vmem:[#allocation5 + $0x62c] sm:$0xf0] }
 0x171   :  { %4064 = vmatpush.bf16.msra.mxu1 %v7807_v24  ;;  %v6691_v24 = vor.u32 %v8862_v5, %v6690_v3  ;;  %v3837_v59 = vpop.f32.mrf.mxu3  ;;  %v7530_v3 = vld [vmem:[#allocation5 + $0xdd8] sm:$0xf]  ;;  %v9072_v5 = vld [vmem:[#allocation5 + $0xdfc] sm:$0xf0]  ;;  %v7090_v52 = vld [vmem:[#allocation5 + $0xa68] sm:$0xf] }
 0x172   :  { %4077 = vmatpush.bf16.msra.mxu2 %v5891_v26  ;;  %v7011_v26 = vor.u32 %v8942_v8, %v7010_v6  ;;  %v7211_v8 = vor.u32 %v8992_v63, %v7210_v62  ;;  %v6490_v59 = vld [vmem:[#allocation5 + $0x5b8] sm:$0xf]  ;;  %v8962_v53 = vld [vmem:[#allocation5 + $0xa8c] sm:$0xf0] }
 0x173   :  { %4090 = vmatpush.bf16.msra.mxu3 %v6211_v29  ;;  %v6970_v29 = vld [vmem:[#allocation5 + $0x978] sm:$0xf]  ;;  %v9042_v62 = vld [vmem:[#allocation5 + $0xd0c] sm:$0xf0] }
 0x174   :  { %4052 = vmatpush.bf16.msra.mxu0 %v7447_v11  ;;  %v7651_v11 = vor.u32 %v9102_v25, %v7650_v51  ;;  %v6971_v38 = vor.u32 %v8932_v31, %v6970_v29  ;;  %v7531_v51 = vor.u32 %v9072_v5, %v7530_v3  ;;  %v6531_v25 = vor.u32 %v8822_v10, %v6530_v9  ;;  %v6810_v31 = vld [vmem:[#allocation5 + $0x838] sm:$0xf]  ;;  %v8952_v9 = vld [vmem:[#allocation5 + $0xa3c] sm:$0xf0]  ;;  %v7970_v10 = vld [vmem:[#allocation5 + $0x1148] sm:$0xf] }
 0x175   :  { %4065 = vmatpush.bf16.msra.mxu1 %v7767_v34  ;;  %v6651_v34 = vor.u32 %v8852_v55, %v6650_v28  ;;  %v6851_v55 = vor.u32 %v8902_v12, %v6850_v13  ;;  %v6410_v63 = vld [vmem:[#allocation5 + $0x518] sm:$0xf]  ;;  %v7091_v3 = vor.u32 %v8962_v53, %v7090_v52  ;;  %v9182_v13 = vld [vmem:[#allocation5 + $0x116c] sm:$0xf0]  ;;  %v6052_v12 = vld [vmem:[#allocation5 + $0x270] sm:$0xf0] }
 0x176   :  { %4078 = vmatpush.bf16.msra.mxu2 %v5851_v40  ;;  %v7291_v40 = vor.u32 %v9012_v33, %v7290_v32  ;;  %v8892_v32 = vld [vmem:[#allocation5 + $0x85c] sm:$0xf0]  ;;  %v7130_v33 = vld [vmem:[#allocation5 + $0xab8] sm:$0xf]  ;;  %v8677_v52 = vld [vmem:[#allocation5 + $0x1ac] sm:$0xf] }
 0x177   :  { %4091 = vmatpush.bf16.msra.mxu3 %v6171_v46  ;;  %v8922_v46 = vld [vmem:[#allocation5 + $0x94c] sm:$0xf0]  ;;  %v6811_v44 = vor.u32 %v8892_v32, %v6810_v31  ;;  %v6730_v5 = vld [vmem:[#allocation5 + $0x798] sm:$0xf]  ;;  %v5972_v53 = vld [vmem:[#allocation5 + $0x1d0] sm:$0xf0] }
 0x178   :  { %4053 = vmatpush.bf16.msra.mxu0 %v7407_v56  ;;  %v6931_v56 = vor.u32 %v8922_v46, %v6930_v45  ;;  %v6450_v46 = vld [vmem:[#allocation5 + $0x568] sm:$0xf]  ;;  %v7930_v32 = vld [vmem:[#allocation5 + $0x10f8] sm:$0xf] }
 0x179   :  { %4066 = vmatpush.bf16.msra.mxu1 %v7727_v18  ;;  %v7251_v18 = vor.u32 %v9002_v48, %v7250_v47  ;;  %v8802_v47 = vld [vmem:[#allocation5 + $0x58c] sm:$0xf0]  ;;  %v6770_v48 = vld [vmem:[#allocation5 + $0x7e8] sm:$0xf] }
 0x17a   :  { %4079 = vmatpush.bf16.msra.mxu2 %v5811_v61  ;;  %v8912_v61 = vld [vmem:[#allocation5 + $0x8fc] sm:$0xf0] }
 0x17b   :  { %4092 = vmatpush.bf16.msra.mxu3 %v6131_v1  ;;  %v6571_v1 = vor.u32 %v8832_v58, %v6570_v57  ;;  %v6891_v6 = vor.u32 %v8912_v61, %v6890_v60  ;;  %v7410_v58 = vld [vmem:[#allocation5 + $0xce8] sm:$0xf]  ;;  %v6451_v61 = vor.u32 %v8802_v47, %v6450_v46 }
 0x17c   :  { %4054 = vmatpush.bf16.msra.mxu0 %v7367_v14  ;;  %v3848_v14 = vpop.f32.mrf.mxu0  ;;  %v7890_v47 = vld [vmem:[#allocation5 + $0x10a8] sm:$0xf] }
 0x17d   :  { %4067 = vmatpush.bf16.msra.mxu1 %v7687_v16  ;;  %v3861_v16 = vpop.f32.mrf.mxu1 }
 0x17e   :  { %4080 = vmatpush.bf16.msra.mxu2 %v5771_v23  ;;  %v8982_v23 = vld [vmem:[#allocation5 + $0xb2c] sm:$0xf0] }
 0x17f   :  { %4093 = vmatpush.bf16.msra.mxu3 %v6091_v30  ;;  %4055 = vmatmul.bf16.vlgmr.msra.gmra.mxu0 %v9596_v43  ;;  %v7171_v29 = vor.u32 %v8982_v23, %v7170_v20  ;;  %v8812_v30 = vld [vmem:[#allocation5 + $0x5dc] sm:$0xf0]  ;;  %v8777_v20 = vld [vmem:[#allocation5 + $0x4cc] sm:$0xf] }
 0x180   :  { %4099 = vmatpush.bf16.msrb.mxu0 %v6691_v24  ;;  %4068 = vmatmul.bf16.vlgmr.msra.gmra.mxu1 %v9594_v39  ;;  %v3849_v24 = vadd.f32 %v3848_v14, %v9662_v54  ;;  %v6491_v36 = vor.u32 %v8812_v30, %v6490_v59  ;;  %v7411_v14 = vor.u32 %v9042_v62, %v7410_v58  ;;  %v8837_v58 = vld [vmem:[#allocation5 + $0x6ac] sm:$0xf] }
 0x181   :  { %4112 = vmatpush.bf16.msrb.mxu1 %v7011_v26  ;;  %4081 = vmatmul.bf16.vlgmr.msra.gmra.mxu2 %v9585_v21  ;;  %v7490_v26 = vld [vmem:[#allocation5 + $0xd88] sm:$0xf]  ;;  %v7971_v30 = vor.u32 %v9182_v13, %v7970_v10  ;;  %v6252_v10 = vld [vmem:[#allocation5 + $0x400] sm:$0xf0]  ;;  %v8827_v13 = vld [vmem:[#allocation5 + $0x65c] sm:$0xf] }
 0x182   :  { %4125 = vmatpush.bf16.msrb.mxu2 %v7331_v27  ;;  %4094 = vmatmul.bf16.vlgmr.msra.gmra.mxu3 %v9587_v22  ;;  %v9062_v27 = vld [vmem:[#allocation5 + $0xdac] sm:$0xf0]  ;;  %v3862_v28 = vadd.f32 %v3861_v16, %v3849_v24  ;;  %v8697_v16 = vld [vmem:[#allocation5 + $0x24c] sm:$0xf] }
 0x183   :  { %4138 = vmatpush.bf16.msrb.mxu3 %v7651_v11  ;;  %v8972_v11 = vld [vmem:[#allocation5 + $0xadc] sm:$0xf0]  ;;  %v7491_v35 = vor.u32 %v9062_v27, %v7490_v26  ;;  %v6055_v31 = vor.u32 %v8697_v16, %v6052_v12  ;;  %v686_v16 = vperm.slane %v9654_v2, 4 }
 0x184   :  { %4100 = vmatpush.bf16.msrb.mxu0 %v6651_v34  ;;  %v3874_v34 = vpop.f32.mrf.mxu2  ;;  %v7131_v45 = vor.u32 %v8972_v11, %v7130_v33  ;;  %v9032_v26 = vld [vmem:[#allocation5 + $0xcbc] sm:$0xf0] }
 0x185   :  { %4113 = vmatpush.bf16.msrb.mxu1 %v6971_v38  ;;  %v3875_v54 = vadd.f32 %v3874_v34, %v3862_v28  ;;  %v7450_v38 = vld [vmem:[#allocation5 + $0xd38] sm:$0xf]  ;;  %v3887_v41 = vpop.f32.mrf.mxu3  ;;  %v9172_v34 = vld [vmem:[#allocation5 + $0x111c] sm:$0xf0] }
 0x186   :  { %4126 = vmatpush.bf16.msrb.mxu2 %v7291_v40  ;;  %v9052_v40 = vld [vmem:[#allocation5 + $0xd5c] sm:$0xf0] }
 0x187   :  { %4139 = vmatpush.bf16.msrb.mxu3 %v7611_v49  ;;  %v9669_v49 = vadd.f32 %v3887_v41, %v3875_v54  ;;  %v7451_v57 = vor.u32 %v9052_v40, %v7450_v38  ;;  %v6012_v54 = vld [vmem:[#allocation5 + $0x220] sm:$0xf0]  ;;  %v8767_v38 = vld [vmem:[#allocation5 + $0x47c] sm:$0xf] }
 0x188   :  { %4101 = vmatpush.bf16.msrb.mxu0 %v6611_v50  ;;  %v8882_v50 = vld [vmem:[#allocation5 + $0x80c] sm:$0xf0]  ;;  %v6332_v40 = vld [vmem:[#allocation5 + $0x4a0] sm:$0xf0]  ;;  %v8847_v41 = vld [vmem:[#allocation5 + $0x6fc] sm:$0xf] }
 0x189   :  { %4114 = vmatpush.bf16.msrb.mxu1 %v6931_v56  ;;  %v3850_v56 = vpop.f32.mrf.mxu0  ;;  %v4438_v60 = vmax.f32 %v9638_v19, %v9669_v49 }
 0x18a   :  { %4127 = vmatpush.bf16.msrb.mxu2 %v7251_v18  ;;  %v3863_v18 = vpop.f32.mrf.mxu1 }
 0x18b   :  { %4140 = vmatpush.bf16.msrb.mxu3 %v7571_v0  ;;  %v8792_v0 = vld [vmem:[#allocation5 + $0x53c] sm:$0xf0]  ;;  %v8757_v18 = vld [vmem:[#allocation5 + $0x42c] sm:$0xf] }
 0x18c   :  { %4102 = vmatpush.bf16.msrb.mxu0 %v6571_v1  ;;  %v6771_v1 = vor.u32 %v8882_v50, %v6770_v48  ;;  %v3876_v23 = vpop.f32.mrf.mxu2  ;;  %v6411_v24 = vor.u32 %v8792_v0, %v6410_v63  ;;  %v6335_v48 = vor.u32 %v8767_v38, %v6332_v40  ;;  %v9162_v50 = vld [vmem:[#allocation5 + $0x10cc] sm:$0xf0]  ;;  %v5975_v63 = vor.u32 %v8677_v52, %v5972_v53  ;;  %v7850_v0 = vld [vmem:[#allocation5 + $0x1058] sm:$0xf]  ;;  %v7730_v52 = vld [vmem:[#allocation5 + $0xf68] sm:$0xf] }
 0x18d   :  { %4115 = vmatpush.bf16.msrb.mxu1 %v6891_v6  ;;  %v8872_v6 = vld [vmem:[#allocation5 + $0x7bc] sm:$0xf0]  ;;  %v3889_v59 = vpop.f32.mrf.mxu3  ;;  %v7891_v62 = vor.u32 %v9162_v50, %v7890_v47  ;;  %v7810_v23 = vld [vmem:[#allocation5 + $0x1008] sm:$0xf] }
 0x18e   :  { %4128 = vmatpush.bf16.msrb.mxu2 %v7211_v8  ;;  %v7050_v8 = vld [vmem:[#allocation5 + $0xa18] sm:$0xf]  ;;  %v6731_v27 = vor.u32 %v8872_v6, %v6730_v5  ;;  %v8667_v5 = vld [vmem:[#allocation5 + $0x15c] sm:$0xf]  ;;  %v5932_v6 = vld [vmem:[#allocation5 + $0x180] sm:$0xf0] }
 0x18f   :  { %4141 = vmatpush.bf16.msrb.mxu3 %v7531_v51  ;;  %v6372_v51 = vld [vmem:[#allocation5 + $0x4f0] sm:$0xf0]  ;;  %v7051_v28 = vor.u32 %v8952_v9, %v7050_v8  ;;  %v8747_v9 = vld [vmem:[#allocation5 + $0x3dc] sm:$0xf] }
 0x190   :  { %4103 = vmatpush.bf16.msrb.mxu0 %v6531_v25  ;;  %v7370_v25 = vld [vmem:[#allocation5 + $0xc98] sm:$0xf]  ;;  %v6375_v33 = vor.u32 %v8777_v20, %v6372_v51  ;;  %v5935_v20 = vor.u32 %v8667_v5, %v5932_v6  ;;  %v9142_v51 = vld [vmem:[#allocation5 + $0x102c] sm:$0xf0]  ;;  %v6452_v5 = vld [vmem:[#allocation5 + $0x590] sm:$0xf0] }
 0x191   :  { %4116 = vmatpush.bf16.msrb.mxu1 %v6851_v55  ;;  %v8857_v55 = vld [vmem:[#allocation5 + $0x74c] sm:$0xf]  ;;  %v7371_v11 = vor.u32 %v9032_v26, %v7370_v25  ;;  %v5892_v26 = vld [vmem:[#allocation5 + $0x130] sm:$0xf0]  ;;  %v7811_v2 = vor.u32 %v9142_v51, %v7810_v23  ;;  %v8707_v23 = vld [vmem:[#allocation5 + $0x29c] sm:$0xf] }
 0x192   :  { %4129 = vmatpush.bf16.msrb.mxu2 %v7171_v29  ;;  %v6692_v29 = vld [vmem:[#allocation5 + $0x770] sm:$0xf0]  ;;  %v8657_v25 = vld [vmem:[#allocation5 + $0x10c] sm:$0xf] }
 0x193   :  { %4142 = vmatpush.bf16.msrb.mxu3 %v7491_v35  ;;  %v8687_v35 = vld [vmem:[#allocation5 + $0x1fc] sm:$0xf] }
 0x194   :  { %4104 = vmatpush.bf16.msrb.mxu0 %v6491_v36  ;;  %v6695_v36 = vor.u32 %v8857_v55, %v6692_v29  ;;  %v6015_v46 = vor.u32 %v8687_v35, %v6012_v54  ;;  %v6212_v55 = vld [vmem:[#allocation5 + $0x3b0] sm:$0xf0]  ;;  %v9132_v35 = vld [vmem:[#allocation5 + $0xfdc] sm:$0xf0]  ;;  %v8647_v54 = vld [vmem:[#allocation5 + $0xbc] sm:$0xf] }
 0x195   :  { %4117 = vmatpush.bf16.msrb.mxu1 %v6811_v44  ;;  %v6652_v44 = vld [vmem:[#allocation5 + $0x720] sm:$0xf0] }
 0x196   :  { %4130 = vmatpush.bf16.msrb.mxu2 %v7131_v45  ;;  %v7931_v45 = vor.u32 %v9172_v34, %v7930_v32  ;;  %v6655_v56 = vor.u32 %v8847_v41, %v6652_v44  ;;  %v8727_v41 = vld [vmem:[#allocation5 + $0x33c] sm:$0xf]  ;;  %v6172_v44 = vld [vmem:[#allocation5 + $0x360] sm:$0xf0] }
 0x197   :  { %4143 = vmatpush.bf16.msrb.mxu3 %v7451_v57  ;;  %v6292_v57 = vld [vmem:[#allocation5 + $0x450] sm:$0xf0] }
 0x198   :  { %4105 = vmatpush.bf16.msrb.mxu0 %v6451_v61  ;;  %v6612_v61 = vld [vmem:[#allocation5 + $0x6d0] sm:$0xf0] }
 0x199   :  { %4118 = vmatpush.bf16.msrb.mxu1 %v6771_v1  ;;  %v6295_v1 = vor.u32 %v8757_v18, %v6292_v57  ;;  %v6615_v8 = vor.u32 %v8837_v58, %v6612_v61  ;;  %v9122_v18 = vld [vmem:[#allocation5 + $0xf8c] sm:$0xf0]  ;;  %v8637_v57 = vld [vmem:[#allocation5 + $0x6c] sm:$0xf]  ;;  %v5812_v58 = vld [vmem:[#allocation5 + $0x90] sm:$0xf0] }
 0x19a   :  { %4131 = vmatpush.bf16.msrb.mxu2 %v7091_v3  ;;  %v9152_v3 = vld [vmem:[#allocation5 + $0x107c] sm:$0xf0] }
 0x19b   :  { %4144 = vmatpush.bf16.msrb.mxu3 %v7411_v14  ;;  %v6572_v14 = vld [vmem:[#allocation5 + $0x680] sm:$0xf0]  ;;  %v7851_v12 = vor.u32 %v9152_v3, %v7850_v0  ;;  %v8797_v3 = vld [vmem:[#allocation5 + $0x56c] sm:$0xf] }
 0x19c   :  { %4106 = vmatpush.bf16.msrb.mxu0 %v6411_v24  ;;  %v6255_v24 = vor.u32 %v8747_v9, %v6252_v10  ;;  %v3900_v29 = vpop.f32.mrf.mxu0  ;;  %v5815_v9 = vor.u32 %v8637_v57, %v5812_v58  ;;  %v7690_v10 = vld [vmem:[#allocation5 + $0xf18] sm:$0xf]  ;;  %v6455_v51 = vor.u32 %v8797_v3, %v6452_v5  ;;  %v8917_v58 = vld [vmem:[#allocation5 + $0x92c] sm:$0xf] }
 0x19d   :  { %4119 = vmatpush.bf16.msrb.mxu1 %v6731_v27  ;;  %v6575_v27 = vor.u32 %v8827_v13, %v6572_v14  ;;  %v3913_v59 = vpop.f32.mrf.mxu1  ;;  %v3901_v32 = vadd.f32 %v3900_v29, %v686_v16  ;;  %v9112_v13 = vld [vmem:[#allocation5 + $0xf3c] sm:$0xf0]  ;;  %v8627_v14 = vld [vmem:[#allocation5 + $0x1c] sm:$0xf]  ;;  %v7652_v29 = vld [vmem:[#allocation5 + $0xef0] sm:$0xf0] }
 0x19e   :  { %4132 = vmatpush.bf16.msrb.mxu2 %v7051_v28  ;;  %v8737_v28 = vld [vmem:[#allocation5 + $0x38c] sm:$0xf] }
 0x19f   :  { %4145 = vmatpush.bf16.msrb.mxu3 %v7371_v11  ;;  %4107 = vmatmul.bf16.vlgmr.msrb.gmra.mxu0 %v9580_v7  ;;  %v7770_v11 = vld [vmem:[#allocation5 + $0xfb8] sm:$0xf]  ;;  %v6215_v34 = vor.u32 %v8737_v28, %v6212_v55  ;;  %v3914_v38 = vadd.f32 %v3913_v59, %v3901_v32  ;;  %v7332_v28 = vld [vmem:[#allocation5 + $0xc70] sm:$0xf0]  ;;  %v9097_v55 = vld [vmem:[#allocation5 + $0xecc] sm:$0xf] }
 0x1a0   :  { %4151 = vmatpush.bf16.msra.mxu0 %v7971_v30  ;;  %4120 = vmatmul.bf16.vlgmr.msrb.gmra.mxu1 %v9582_v15  ;;  %v8817_v30 = vld [vmem:[#allocation5 + $0x60c] sm:$0xf]  ;;  %v8787_v32 = vld [vmem:[#allocation5 + $0x51c] sm:$0xf] }
 0x1a1   :  { %4164 = vmatpush.bf16.msra.mxu1 %v6055_v31  ;;  %4133 = vmatmul.bf16.vlgmr.msrb.gmra.mxu2 %v9592_v37  ;;  %v6532_v31 = vld [vmem:[#allocation5 + $0x630] sm:$0xf0] }
 0x1a2   :  { %4177 = vmatpush.bf16.msra.mxu2 %v6375_v33  ;;  %4146 = vmatmul.bf16.vlgmr.msrb.gmra.mxu3 %v9596_v43  ;;  %v5895_v33 = vor.u32 %v8657_v25, %v5892_v26  ;;  %v6535_v40 = vor.u32 %v8817_v30, %v6532_v31  ;;  %v8937_v25 = vld [vmem:[#allocation5 + $0x9cc] sm:$0xf]  ;;  %v7012_v26 = vld [vmem:[#allocation5 + $0x9f0] sm:$0xf0]  ;;  %v7691_v30 = vor.u32 %v9112_v13, %v7690_v10  ;;  %v8907_v13 = vld [vmem:[#allocation5 + $0x8dc] sm:$0xf] }
 0x1a3   :  { %4190 = vmatpush.bf16.msra.mxu3 %v6695_v36  ;;  %v5852_v36 = vld [vmem:[#allocation5 + $0xe0] sm:$0xf0] }
 0x1a4   :  { %4152 = vmatpush.bf16.msra.mxu0 %v7931_v45  ;;  %v8807_v45 = vld [vmem:[#allocation5 + $0x5bc] sm:$0xf]  ;;  %v3926_v47 = vpop.f32.mrf.mxu2  ;;  %v5855_v50 = vor.u32 %v8647_v54, %v5852_v36  ;;  %v3902_v0 = vpop.f32.mrf.mxu0  ;;  %v7655_v36 = vor.u32 %v9097_v55, %v7652_v29 }
 0x1a5   :  { %4165 = vmatpush.bf16.msra.mxu1 %v6015_v46  ;;  %v6492_v46 = vld [vmem:[#allocation5 + $0x5e0] sm:$0xf0]  ;;  %v3927_v53 = vadd.f32 %v3926_v47, %v3914_v38  ;;  %v3939_v6 = vpop.f32.mrf.mxu3  ;;  %v8927_v38 = vld [vmem:[#allocation5 + $0x97c] sm:$0xf]  ;;  %v9077_v0 = vld [vmem:[#allocation5 + $0xe2c] sm:$0xf] }
 0x1a6   :  { %4178 = vmatpush.bf16.msra.mxu2 %v6335_v48  ;;  %v7771_v48 = vor.u32 %v9132_v35, %v7770_v11  ;;  %v6495_v61 = vor.u32 %v8807_v45, %v6492_v46  ;;  %v7015_v11 = vor.u32 %v8937_v25, %v7012_v26  ;;  %v7972_v35 = vld [vmem:[#allocation5 + $0x1170] sm:$0xf0]  ;;  %v7292_v45 = vld [vmem:[#allocation5 + $0xc20] sm:$0xf0]  ;;  %v9087_v46 = vld [vmem:[#allocation5 + $0xe7c] sm:$0xf] }
 0x1a7   :  { %4191 = vmatpush.bf16.msra.mxu3 %v6655_v56  ;;  %v6175_v56 = vor.u32 %v8727_v41, %v6172_v44  ;;  %v9678_v16 = vadd.f32 %v3939_v6, %v3927_v53  ;;  %v9007_v41 = vld [vmem:[#allocation5 + $0xbfc] sm:$0xf]  ;;  %v7612_v47 = vld [vmem:[#allocation5 + $0xea0] sm:$0xf0]  ;;  %v9157_v6 = vld [vmem:[#allocation5 + $0x10ac] sm:$0xf] }
 0x1a8   :  { %4153 = vmatpush.bf16.msra.mxu0 %v7891_v62  ;;  %v8717_v62 = vld [vmem:[#allocation5 + $0x2ec] sm:$0xf]  ;;  %v9167_v53 = vld [vmem:[#allocation5 + $0x10fc] sm:$0xf]  ;;  %v7615_v57 = vor.u32 %v9087_v46, %v7612_v47  ;;  %v6812_v46 = vld [vmem:[#allocation5 + $0x860] sm:$0xf0] }
 0x1a9   :  { %4166 = vmatpush.bf16.msra.mxu1 %v5975_v63  ;;  %v6132_v63 = vld [vmem:[#allocation5 + $0x310] sm:$0xf0]  ;;  %v9147_v26 = vld [vmem:[#allocation5 + $0x105c] sm:$0xf] }
 0x1aa   :  { %4179 = vmatpush.bf16.msra.mxu2 %v6295_v1  ;;  %v3915_v1 = vpop.f32.mrf.mxu1  ;;  %v8967_v47 = vld [vmem:[#allocation5 + $0xabc] sm:$0xf] }
 0x1ab   :  { %4192 = vmatpush.bf16.msra.mxu3 %v6615_v8  ;;  %v7731_v8 = vor.u32 %v9122_v18, %v7730_v52  ;;  %v7295_v18 = vor.u32 %v9007_v41, %v7292_v45  ;;  %v7572_v1 = vld [vmem:[#allocation5 + $0xe50] sm:$0xf0]  ;;  %v8887_v45 = vld [vmem:[#allocation5 + $0x83c] sm:$0xf] }
 0x1ac   :  { %4154 = vmatpush.bf16.msra.mxu0 %v7851_v12  ;;  %v6135_v12 = vor.u32 %v8717_v62, %v6132_v63  ;;  %v3928_v59 = vpop.f32.mrf.mxu2  ;;  %v8997_v62 = vld [vmem:[#allocation5 + $0xbac] sm:$0xf]  ;;  %v7252_v63 = vld [vmem:[#allocation5 + $0xbd0] sm:$0xf0]  ;;  %v7575_v10 = vor.u32 %v9077_v0, %v7572_v1 }
 0x1ad   :  { %4167 = vmatpush.bf16.msra.mxu1 %v5935_v20  ;;  %v5772_v20 = vld [vmem:[#allocation5 + $0x40] sm:$0xf0]  ;;  %v8897_v59 = vld [vmem:[#allocation5 + $0x88c] sm:$0xf]  ;;  %v6772_v0 = vld [vmem:[#allocation5 + $0x810] sm:$0xf0] }
 0x1ae   :  { %4180 = vmatpush.bf16.msra.mxu2 %v6255_v24  ;;  %v6092_v24 = vld [vmem:[#allocation5 + $0x2c0] sm:$0xf0]  ;;  %v5775_v31 = vor.u32 %v8627_v14, %v5772_v20  ;;  %v8957_v1 = vld [vmem:[#allocation5 + $0xa6c] sm:$0xf] }
 0x1af   :  { %4193 = vmatpush.bf16.msra.mxu3 %v6575_v27  ;;  %v9017_v27 = vld [vmem:[#allocation5 + $0xc4c] sm:$0xf]  ;;  %v6892_v14 = vld [vmem:[#allocation5 + $0x900] sm:$0xf0] }
 0x1b0   :  { %4155 = vmatpush.bf16.msra.mxu0 %v7811_v2  ;;  %v6412_v2 = vld [vmem:[#allocation5 + $0x540] sm:$0xf0]  ;;  %v7335_v54 = vor.u32 %v9017_v27, %v7332_v28  ;;  %v6895_v25 = vor.u32 %v8907_v13, %v6892_v14  ;;  %v9117_v13 = vld [vmem:[#allocation5 + $0xf6c] sm:$0xf] }
 0x1b1   :  { %4168 = vmatpush.bf16.msra.mxu1 %v5895_v33  ;;  %v6095_v33 = vor.u32 %v8707_v23, %v6092_v24  ;;  %v6415_v44 = vor.u32 %v8787_v32, %v6412_v2  ;;  %v7212_v20 = vld [vmem:[#allocation5 + $0xb80] sm:$0xf0]  ;;  %v9067_v23 = vld [vmem:[#allocation5 + $0xddc] sm:$0xf]  ;;  %v7172_v2 = vld [vmem:[#allocation5 + $0xb30] sm:$0xf0] }
 0x1b2   :  { %4181 = vmatpush.bf16.msra.mxu2 %v6215_v34  ;;  %v9177_v34 = vld [vmem:[#allocation5 + $0x114c] sm:$0xf]  ;;  %v7532_v24 = vld [vmem:[#allocation5 + $0xe00] sm:$0xf0] }
 0x1b3   :  { %4194 = vmatpush.bf16.msra.mxu3 %v6535_v40  ;;  %v6972_v40 = vld [vmem:[#allocation5 + $0x9a0] sm:$0xf0]  ;;  %v7535_v55 = vor.u32 %v9067_v23, %v7532_v24  ;;  %v7732_v23 = vld [vmem:[#allocation5 + $0xf90] sm:$0xf0]  ;;  %v8867_v24 = vld [vmem:[#allocation5 + $0x79c] sm:$0xf] }
 0x1b4   :  { %4156 = vmatpush.bf16.msra.mxu0 %v7771_v48  ;;  %v3941_v48 = vpop.f32.mrf.mxu3  ;;  %v6975_v52 = vor.u32 %v8927_v38, %v6972_v40  ;;  %v7852_v27 = vld [vmem:[#allocation5 + $0x1080] sm:$0xf0]  ;;  %v9137_v38 = vld [vmem:[#allocation5 + $0x100c] sm:$0xf]  ;;  %v7812_v40 = vld [vmem:[#allocation5 + $0x1030] sm:$0xf0] }
 0x1b5   :  { %4169 = vmatpush.bf16.msra.mxu1 %v5855_v50  ;;  %v7975_v50 = vor.u32 %v9177_v34, %v7972_v35  ;;  %v7855_v34 = vor.u32 %v9147_v26, %v7852_v27  ;;  %v7132_v48 = vld [vmem:[#allocation5 + $0xae0] sm:$0xf0]  ;;  %v8947_v27 = vld [vmem:[#allocation5 + $0xa1c] sm:$0xf] }
 0x1b6   :  { %4182 = vmatpush.bf16.msra.mxu2 %v6175_v56  ;;  %v7932_v56 = vld [vmem:[#allocation5 + $0x1120] sm:$0xf0] }
 0x1b7   :  { %4195 = vmatpush.bf16.msra.mxu3 %v6495_v61  ;;  %v6932_v61 = vld [vmem:[#allocation5 + $0x950] sm:$0xf0]  ;;  %v7935_v3 = vor.u32 %v9167_v53, %v7932_v56  ;;  %v6815_v56 = vor.u32 %v8887_v45, %v6812_v46  ;;  %v6018_v46 = vld [vmem:[#allocation5 + $0x200] sm:$0xf] }
 0x1b8   :  { %4157 = vmatpush.bf16.msra.mxu0 %v7731_v8  ;;  %v6935_v5 = vor.u32 %v8917_v58, %v6932_v61  ;;  %v7892_v8 = vld [vmem:[#allocation5 + $0x10d0] sm:$0xf0]  ;;  %v7135_v61 = vor.u32 %v8967_v47, %v7132_v48  ;;  %v8693_v47 = vld [vmem:[#allocation5 + $0x224] sm:$0xf0]  ;;  %v6338_v48 = vld [vmem:[#allocation5 + $0x480] sm:$0xf] }
 0x1b9   :  { %4170 = vmatpush.bf16.msra.mxu1 %v5815_v9  ;;  %v7255_v9 = vor.u32 %v8997_v62, %v7252_v63  ;;  %v8877_v63 = vld [vmem:[#allocation5 + $0x7ec] sm:$0xf] }
 0x1ba   :  { %4183 = vmatpush.bf16.msra.mxu2 %v6135_v12  ;;  %v8987_v12 = vld [vmem:[#allocation5 + $0xb5c] sm:$0xf] }
 0x1bb   :  { %4196 = vmatpush.bf16.msra.mxu3 %v6455_v51  ;;  %v7895_v51 = vor.u32 %v9157_v6, %v7892_v8  ;;  %v7215_v28 = vor.u32 %v8987_v12, %v7212_v20  ;;  %v9037_v6 = vld [vmem:[#allocation5 + $0xcec] sm:$0xf]  ;;  %v7412_v8 = vld [vmem:[#allocation5 + $0xd10] sm:$0xf0]  ;;  %v6775_v20 = vor.u32 %v8877_v63, %v6772_v0  ;;  %v8683_v0 = vld [vmem:[#allocation5 + $0x1d4] sm:$0xf0] }
 0x1bc   :  { %4158 = vmatpush.bf16.msra.mxu0 %v7691_v30  ;;  %v3952_v29 = vpop.f32.mrf.mxu0  ;;  %v6852_v30 = vld [vmem:[#allocation5 + $0x8b0] sm:$0xf0]  ;;  %v7415_v26 = vor.u32 %v9037_v6, %v7412_v8  ;;  %v8843_v6 = vld [vmem:[#allocation5 + $0x6d4] sm:$0xf0]  ;;  %v9694_v8 = vld [vmem:[#allocation7] sm:$0xff] }
 0x1bd   :  { %4171 = vmatpush.bf16.msra.mxu1 %v5775_v31  ;;  %v8977_v31 = vld [vmem:[#allocation5 + $0xb0c] sm:$0xf]  ;;  %v3953_v32 = vadd.f32 %v3952_v29, %v9678_v16  ;;  %v3965_v35 = vpop.f32.mrf.mxu1  ;;  %v9047_v16 = vld [vmem:[#allocation5 + $0xd3c] sm:$0xf]  ;;  %v7735_v29 = vor.u32 %v9117_v13, %v7732_v23  ;;  %v8923_v23 = vld [vmem:[#allocation5 + $0x954] sm:$0xf0] }
 0x1be   :  { %4184 = vmatpush.bf16.msra.mxu2 %v6095_v33  ;;  %v9057_v33 = vld [vmem:[#allocation5 + $0xd8c] sm:$0xf]  ;;  %v7175_v41 = vor.u32 %v8977_v31, %v7172_v2  ;;  %v6698_v31 = vld [vmem:[#allocation5 + $0x750] sm:$0xf]  ;;  %v8863_v2 = vld [vmem:[#allocation5 + $0x774] sm:$0xf0] }
 0x1bf   :  { %4197 = vmatpush.bf16.msra.mxu3 %v6415_v44  ;;  %4159 = vmatmul.bf16.vlgmr.msra.gmra.mxu0 %v9594_v39 }
 0x1c0   :  { %4203 = vmatpush.bf16.msrb.mxu0 %v7015_v11  ;;  %4172 = vmatmul.bf16.vlgmr.msra.gmra.mxu1 %v9585_v21  ;;  %v7492_v11 = vld [vmem:[#allocation5 + $0xdb0] sm:$0xf0] }
 0x1c1   :  { %4216 = vmatpush.bf16.msrb.mxu1 %v7335_v54  ;;  %4185 = vmatmul.bf16.vlgmr.msra.gmra.mxu2 %v9587_v22  ;;  %v3966_v54 = vadd.f32 %v3965_v35, %v3953_v32  ;;  %v7495_v44 = vor.u32 %v9057_v33, %v7492_v11  ;;  %v9107_v33 = vld [vmem:[#allocation5 + $0xf1c] sm:$0xf]  ;;  %v7692_v11 = vld [vmem:[#allocation5 + $0xf40] sm:$0xf0] }
 0x1c2   :  { %4229 = vmatpush.bf16.msrb.mxu2 %v7655_v36  ;;  %4198 = vmatmul.bf16.vlgmr.msra.gmra.mxu3 %v9580_v7  ;;  %v6855_v36 = vor.u32 %v8897_v59, %v6852_v30  ;;  %v6378_v59 = vld [vmem:[#allocation5 + $0x4d0] sm:$0xf]  ;;  %v8783_v30 = vld [vmem:[#allocation5 + $0x4f4] sm:$0xf0]  ;;  %v7695_v45 = vor.u32 %v9107_v33, %v7692_v11 }
 0x1c3   :  { %4242 = vmatpush.bf16.msrb.mxu3 %v7975_v50  ;;  %v7452_v50 = vld [vmem:[#allocation5 + $0xd60] sm:$0xf0]  ;;  %v8663_v33 = vld [vmem:[#allocation5 + $0x134] sm:$0xf0]  ;;  %v6218_v11 = vld [vmem:[#allocation5 + $0x390] sm:$0xf] }
 0x1c4   :  { %4204 = vmatpush.bf16.msrb.mxu0 %v6975_v52  ;;  %v7815_v52 = vor.u32 %v9137_v38, %v7812_v40  ;;  %v3978_v53 = vpop.f32.mrf.mxu2  ;;  %v7455_v62 = vor.u32 %v9047_v16, %v7452_v50  ;;  %v6379_v38 = vor.u32 %v8783_v30, %v6378_v59  ;;  %v7018_v40 = vld [vmem:[#allocation5 + $0x9d0] sm:$0xf]  ;;  %v8773_v50 = vld [vmem:[#allocation5 + $0x4a4] sm:$0xf0]  ;;  %v6898_v59 = vld [vmem:[#allocation5 + $0x8e0] sm:$0xf] }
 0x1c5   :  { %4217 = vmatpush.bf16.msrb.mxu1 %v7295_v18  ;;  %v9127_v18 = vld [vmem:[#allocation5 + $0xfbc] sm:$0xf]  ;;  %v3979_v58 = vadd.f32 %v3978_v53, %v3966_v54  ;;  %v3967_v14 = vpop.f32.mrf.mxu1  ;;  %v9690_v12 = vpop.f32.mrf.mxu3  ;;  %v7375_v54 = vor.u32 %v9027_v42, %v7372_v4  ;;  %v8853_v53 = vld [vmem:[#allocation5 + $0x724] sm:$0xf0]  ;;  %v6578_v42 = vld [vmem:[#allocation5 + $0x660] sm:$0xf] }
 0x1c6   :  { %4230 = vmatpush.bf16.msrb.mxu2 %v7615_v57  ;;  %v7772_v57 = vld [vmem:[#allocation5 + $0xfe0] sm:$0xf0]  ;;  %v8833_v4 = vld [vmem:[#allocation5 + $0x684] sm:$0xf0] }
 0x1c7   :  { %4243 = vmatpush.bf16.msrb.mxu3 %v7935_v3  ;;  %v3954_v3 = vpop.f32.mrf.mxu0  ;;  %v8913_v30 = vld [vmem:[#allocation5 + $0x904] sm:$0xf0] }
 0x1c8   :  { %4205 = vmatpush.bf16.msrb.mxu0 %v6935_v5  ;;  %v7092_v5 = vld [vmem:[#allocation5 + $0xa90] sm:$0xf0]  ;;  %v8763_v3 = vld [vmem:[#allocation5 + $0x454] sm:$0xf0] }
 0x1c9   :  { %4218 = vmatpush.bf16.msrb.mxu1 %v7255_v9  ;;  %v9688_v9 = vmax.f32 %v4437_v17, %v3979_v58  ;;  %v6058_v17 = vld [vmem:[#allocation5 + $0x250] sm:$0xf]  ;;  %v6978_v58 = vld [vmem:[#allocation5 + $0x980] sm:$0xf] }
 0x1ca   :  { %4231 = vmatpush.bf16.msrb.mxu2 %v7575_v10  ;;  %v7775_v10 = vor.u32 %v9127_v18, %v7772_v57  ;;  %v6019_v18 = vor.u32 %v8693_v47, %v6018_v46  ;;  %v5978_v57 = vld [vmem:[#allocation5 + $0x1b0] sm:$0xf]  ;;  %v8903_v46 = vld [vmem:[#allocation5 + $0x8b4] sm:$0xf0] }
 0x1cb   :  { %4244 = vmatpush.bf16.msrb.mxu3 %v7895_v51  ;;  %v6732_v51 = vld [vmem:[#allocation5 + $0x7c0] sm:$0xf0]  ;;  %v5979_v14 = vor.u32 %v8683_v0, %v5978_v57 }
 0x1cc   :  { %4206 = vmatpush.bf16.msrb.mxu0 %v6895_v25  ;;  %v7095_v25 = vor.u32 %v8957_v1, %v7092_v5  ;;  %v6735_v32 = vor.u32 %v8867_v24, %v6732_v51  ;;  %v6298_v1 = vld [vmem:[#allocation5 + $0x430] sm:$0xf] }
 0x1cd   :  { %4219 = vmatpush.bf16.msrb.mxu1 %v7215_v28  ;;  %v7052_v28 = vld [vmem:[#allocation5 + $0xa40] sm:$0xf0]  ;;  %v3993_v16 = vpop.f32.mrf.mxu3  ;;  %v6618_v5 = vld [vmem:[#allocation5 + $0x6b0] sm:$0xf]  ;;  %v6299_v24 = vor.u32 %v8763_v3, %v6298_v1 }
 0x1ce   :  { %4232 = vmatpush.bf16.msrb.mxu2 %v7535_v55  ;;  %v8703_v55 = vld [vmem:[#allocation5 + $0x274] sm:$0xf0]  ;;  %v7055_v35 = vor.u32 %v8947_v27, %v7052_v28  ;;  %v6619_v51 = vor.u32 %v8843_v6, %v6618_v5  ;;  %v6258_v27 = vld [vmem:[#allocation5 + $0x3e0] sm:$0xf]  ;;  %v8753_v28 = vld [vmem:[#allocation5 + $0x404] sm:$0xf0] }
 0x1cf   :  { %4245 = vmatpush.bf16.msrb.mxu3 %v7855_v34  ;;  %v3980_v34 = vpop.f32.mrf.mxu2  ;;  %v5858_v16 = vld [vmem:[#allocation5 + $0xc0] sm:$0xf]  ;;  %v5818_v3 = vld [vmem:[#allocation5 + $0x70] sm:$0xf]  ;;  %v8643_v5 = vld [vmem:[#allocation5 + $0x94] sm:$0xf0] }
 0x1d0   :  { %4207 = vmatpush.bf16.msrb.mxu0 %v6855_v36  ;;  %v6059_v36 = vor.u32 %v8703_v55, %v6058_v17  ;;  %v6138_v6 = vld [vmem:[#allocation5 + $0x2f0] sm:$0xf] }
 0x1d1   :  { %4220 = vmatpush.bf16.msrb.mxu1 %v7175_v41  ;;  %v8943_v41 = vld [vmem:[#allocation5 + $0x9f4] sm:$0xf0] }
 0x1d2   :  { %4233 = vmatpush.bf16.msrb.mxu2 %v7495_v44  ;;  %v6699_v44 = vor.u32 %v8863_v2, %v6698_v31  ;;  %v6259_v31 = vor.u32 %v8753_v28, %v6258_v27  ;;  %v5898_v2 = vld [vmem:[#allocation5 + $0x110] sm:$0xf]  ;;  %v5819_v28 = vor.u32 %v8643_v5, %v5818_v3 }
 0x1d3   :  { %4246 = vmatpush.bf16.msrb.mxu3 %v7815_v52  ;;  %v6658_v52 = vld [vmem:[#allocation5 + $0x700] sm:$0xf] }
 0x1d4   :  { %4208 = vmatpush.bf16.msrb.mxu0 %v6815_v56  ;;  %v7019_v56 = vor.u32 %v8943_v41, %v7018_v40  ;;  %v6659_v63 = vor.u32 %v8853_v53, %v6658_v52  ;;  %v5899_v41 = vor.u32 %v8663_v33, %v5898_v2  ;;  %v6178_v52 = vld [vmem:[#allocation5 + $0x340] sm:$0xf]  ;;  %v8733_v53 = vld [vmem:[#allocation5 + $0x364] sm:$0xf0]  ;;  %v7338_v2 = vld [vmem:[#allocation5 + $0xc50] sm:$0xf] }
 0x1d5   :  { %4221 = vmatpush.bf16.msrb.mxu1 %v7135_v61  ;;  %v8933_v61 = vld [vmem:[#allocation5 + $0x9a4] sm:$0xf0]  ;;  %v6179_v0 = vor.u32 %v8733_v53, %v6178_v52  ;;  %v9023_v33 = vld [vmem:[#allocation5 + $0xc74] sm:$0xf0] }
 0x1d6   :  { %4234 = vmatpush.bf16.msrb.mxu2 %v7455_v62  ;;  %v6339_v62 = vor.u32 %v8773_v50, %v6338_v48  ;;  %v6979_v13 = vor.u32 %v8933_v61, %v6978_v58  ;;  %v8653_v50 = vld [vmem:[#allocation5 + $0xe4] sm:$0xf0]  ;;  %v6818_v61 = vld [vmem:[#allocation5 + $0x840] sm:$0xf] }
 0x1d7   :  { %4247 = vmatpush.bf16.msrb.mxu3 %v7775_v10  ;;  %v687_v10 = vperm.slane %v9694_v8, 5  ;;  %v5859_v58 = vor.u32 %v8653_v50, %v5858_v16  ;;  %v7298_v50 = vld [vmem:[#allocation5 + $0xc00] sm:$0xf] }
 0x1d8   :  { %4209 = vmatpush.bf16.msrb.mxu0 %v6775_v20  ;;  %v6938_v20 = vld [vmem:[#allocation5 + $0x930] sm:$0xf] }
 0x1d9   :  { %4222 = vmatpush.bf16.msrb.mxu1 %v7095_v25  ;;  %v5938_v25 = vld [vmem:[#allocation5 + $0x160] sm:$0xf]  ;;  %v3992_v17 = vadd.f32 %v9690_v12, %v687_v10  ;;  %v6939_v55 = vor.u32 %v8923_v23, %v6938_v20  ;;  %v6899_v12 = vor.u32 %v8913_v30, %v6898_v59  ;;  %v6458_v20 = vld [vmem:[#allocation5 + $0x570] sm:$0xf]  ;;  %v8803_v23 = vld [vmem:[#allocation5 + $0x594] sm:$0xf0] }
 0x1da   :  { %4235 = vmatpush.bf16.msrb.mxu2 %v7415_v26  ;;  %v8673_v26 = vld [vmem:[#allocation5 + $0x184] sm:$0xf0]  ;;  %v6098_v59 = vld [vmem:[#allocation5 + $0x2a0] sm:$0xf] }
 0x1db   :  { %4248 = vmatpush.bf16.msrb.mxu3 %v7735_v29  ;;  %v5939_v29 = vor.u32 %v8673_v26, %v5938_v25  ;;  %v5778_v25 = vld [vmem:[#allocation5 + $0x20] sm:$0xf]  ;;  %v8713_v30 = vld [vmem:[#allocation5 + $0x2c4] sm:$0xf0] }
 0x1dc   :  { %4210 = vmatpush.bf16.msrb.mxu0 %v6735_v32  ;;  %v6579_v32 = vor.u32 %v8833_v4, %v6578_v42  ;;  %v4004_v34 = vpop.f32.mrf.mxu0  ;;  %v8633_v42 = vld [vmem:[#allocation5 + $0x44] sm:$0xf0]  ;;  %v6778_v4 = vld [vmem:[#allocation5 + $0x7f0] sm:$0xf] }
 0x1dd   :  { %4223 = vmatpush.bf16.msrb.mxu1 %v7055_v35  ;;  %v8743_v35 = vld [vmem:[#allocation5 + $0x3b4] sm:$0xf0]  ;;  %v4017_v40 = vpop.f32.mrf.mxu1 }
 0x1de   :  { %4236 = vmatpush.bf16.msrb.mxu2 %v7375_v54  ;;  %v6538_v54 = vld [vmem:[#allocation5 + $0x610] sm:$0xf]  ;;  %v6219_v47 = vor.u32 %v8743_v35, %v6218_v11 }
 0x1df   :  { %4249 = vmatpush.bf16.msrb.mxu3 %v7695_v45  ;;  %4211 = vmatmul.bf16.vlgmr.msrb.gmra.mxu0 %v9582_v15  ;;  %v6858_v45 = vld [vmem:[#allocation5 + $0x890] sm:$0xf] }
 0x1e0   :  { %4255 = vmatpush.bf16.msra.mxu0 %v6059_v36  ;;  %4224 = vmatmul.bf16.vlgmr.msrb.gmra.mxu1 %v9592_v37  ;;  %v8823_v36 = vld [vmem:[#allocation5 + $0x634] sm:$0xf0]  ;;  %v6859_v57 = vor.u32 %v8903_v46, %v6858_v45  ;;  %v7658_v11 = vld [vmem:[#allocation5 + $0xed0] sm:$0xf]  ;;  %v8698_v46 = vld [vmem:[#allocation5 + $0x254] sm:$0xf] }
 0x1e1   :  { %4268 = vmatpush.bf16.msra.mxu1 %v6379_v38  ;;  %4237 = vmatmul.bf16.vlgmr.msrb.gmra.mxu2 %v9596_v43  ;;  %v4005_v38 = vadd.f32 %v4004_v34, %v3992_v17  ;;  %v6539_v48 = vor.u32 %v8823_v36, %v6538_v54  ;;  %v8883_v17 = vld [vmem:[#allocation5 + $0x814] sm:$0xf0]  ;;  %v7978_v35 = vld [vmem:[#allocation5 + $0x1150] sm:$0xf]  ;;  %v5779_v36 = vor.u32 %v8633_v42, %v5778_v25  ;;  %v8678_v25 = vld [vmem:[#allocation5 + $0x1b4] sm:$0xf] }
 0x1e2   :  { %4281 = vmatpush.bf16.msra.mxu2 %v6699_v44  ;;  %4250 = vmatmul.bf16.vlgmr.msrb.gmra.mxu3 %v9594_v39  ;;  %v9103_v34 = vld [vmem:[#allocation5 + $0xef4] sm:$0xf0]  ;;  %v6779_v54 = vor.u32 %v8883_v17, %v6778_v4  ;;  %v7218_v4 = vld [vmem:[#allocation5 + $0xb60] sm:$0xf] }
 0x1e3   :  { %4294 = vmatpush.bf16.msra.mxu3 %v7019_v56  ;;  %v4018_v44 = vadd.f32 %v4017_v40, %v4005_v38  ;;  %v6498_v56 = vld [vmem:[#allocation5 + $0x5c0] sm:$0xf]  ;;  %v9183_v38 = vld [vmem:[#allocation5 + $0x1174] sm:$0xf0]  ;;  %v7659_v16 = vor.u32 %v9103_v34, %v7658_v11 }
 0x1e4   :  { %4256 = vmatpush.bf16.msra.mxu0 %v6019_v18  ;;  %v8813_v18 = vld [vmem:[#allocation5 + $0x5e4] sm:$0xf0]  ;;  %v4006_v10 = vpop.f32.mrf.mxu0  ;;  %v6738_v40 = vld [vmem:[#allocation5 + $0x7a0] sm:$0xf]  ;;  %v7979_v53 = vor.u32 %v9183_v38, %v7978_v35 }
 0x1e5   :  { %4269 = vmatpush.bf16.msra.mxu1 %v6339_v62  ;;  %v8893_v62 = vld [vmem:[#allocation5 + $0x864] sm:$0xf0]  ;;  %v6499_v1 = vor.u32 %v8813_v18, %v6498_v56  ;;  %v7618_v18 = vld [vmem:[#allocation5 + $0xe80] sm:$0xf] }
 0x1e6   :  { %4282 = vmatpush.bf16.msra.mxu2 %v6659_v63  ;;  %v4030_v63 = vpop.f32.mrf.mxu2  ;;  %v6819_v26 = vor.u32 %v8893_v62, %v6818_v61  ;;  %v9013_v56 = vld [vmem:[#allocation5 + $0xc24] sm:$0xf0]  ;;  %v7938_v61 = vld [vmem:[#allocation5 + $0x1100] sm:$0xf] }
 0x1e7   :  { %4295 = vmatpush.bf16.msra.mxu3 %v6979_v13  ;;  %v4031_v13 = vadd.f32 %v4030_v63, %v4018_v44  ;;  %v6099_v44 = vor.u32 %v8713_v30, %v6098_v59  ;;  %v9173_v62 = vld [vmem:[#allocation5 + $0x1124] sm:$0xf0]  ;;  %v7299_v3 = vor.u32 %v9013_v56, %v7298_v50  ;;  %v7858_v30 = vld [vmem:[#allocation5 + $0x1060] sm:$0xf]  ;;  %v5900_v50 = vld [vmem:[#allocation5 + $0x138] sm:$0xf0] }
 0x1e8   :  { %4257 = vmatpush.bf16.msra.mxu0 %v5979_v14  ;;  %v8723_v14 = vld [vmem:[#allocation5 + $0x314] sm:$0xf0]  ;;  %v7939_v10 = vor.u32 %v9173_v62, %v7938_v61  ;;  %v9073_v59 = vld [vmem:[#allocation5 + $0xe04] sm:$0xf0]  ;;  %v7138_v56 = vld [vmem:[#allocation5 + $0xac0] sm:$0xf] }
 0x1e9   :  { %4270 = vmatpush.bf16.msra.mxu1 %v6299_v24  ;;  %v4019_v24 = vpop.f32.mrf.mxu1  ;;  %v9053_v61 = vld [vmem:[#allocation5 + $0xd64] sm:$0xf0]  ;;  %v7778_v62 = vld [vmem:[#allocation5 + $0xfc0] sm:$0xf] }
 0x1ea   :  { %4283 = vmatpush.bf16.msra.mxu2 %v6619_v51  ;;  %v4043_v51 = vpop.f32.mrf.mxu3  ;;  %v9163_v24 = vld [vmem:[#allocation5 + $0x10d4] sm:$0xf0] }
 0x1eb   :  { %4296 = vmatpush.bf16.msra.mxu3 %v6939_v55  ;;  %v9700_v27 = vadd.f32 %v4043_v51, %v4031_v13  ;;  %v6139_v55 = vor.u32 %v8723_v14, %v6138_v6  ;;  %v7258_v6 = vld [vmem:[#allocation5 + $0xbb0] sm:$0xf]  ;;  %v9003_v13 = vld [vmem:[#allocation5 + $0xbd4] sm:$0xf0] }
 0x1ec   :  { %4258 = vmatpush.bf16.msra.mxu0 %v5939_v29  ;;  %v6459_v29 = vor.u32 %v8803_v23, %v6458_v20  ;;  %v7578_v14 = vld [vmem:[#allocation5 + $0xe30] sm:$0xf]  ;;  %v9083_v20 = vld [vmem:[#allocation5 + $0xe54] sm:$0xf0] }
 0x1ed   :  { %4271 = vmatpush.bf16.msra.mxu1 %v6259_v31  ;;  %v6418_v31 = vld [vmem:[#allocation5 + $0x520] sm:$0xf]  ;;  %v7898_v23 = vld [vmem:[#allocation5 + $0x10b0] sm:$0xf]  ;;  %v7579_v42 = vor.u32 %v9083_v20, %v7578_v14  ;;  %v8963_v14 = vld [vmem:[#allocation5 + $0xa94] sm:$0xf0] }
 0x1ee   :  { %4284 = vmatpush.bf16.msra.mxu2 %v6579_v32  ;;  %v8793_v32 = vld [vmem:[#allocation5 + $0x544] sm:$0xf0]  ;;  %v7899_v17 = vor.u32 %v9163_v24, %v7898_v23  ;;  %v7418_v20 = vld [vmem:[#allocation5 + $0xcf0] sm:$0xf]  ;;  %v9043_v23 = vld [vmem:[#allocation5 + $0xd14] sm:$0xf0] }
 0x1ef   :  { %4297 = vmatpush.bf16.msra.mxu3 %v6899_v12  ;;  %v8873_v12 = vld [vmem:[#allocation5 + $0x7c4] sm:$0xf0]  ;;  %v6419_v45 = vor.u32 %v8793_v32, %v6418_v31 }
 0x1f0   :  { %4259 = vmatpush.bf16.msra.mxu0 %v5899_v41  ;;  %v4032_v41 = vpop.f32.mrf.mxu2  ;;  %v9153_v31 = vld [vmem:[#allocation5 + $0x1084] sm:$0xf0] }
 0x1f1   :  { %4272 = vmatpush.bf16.msra.mxu1 %v6219_v47  ;;  %v6060_v47 = vld [vmem:[#allocation5 + $0x278] sm:$0xf0]  ;;  %v7859_v38 = vor.u32 %v9153_v31, %v7858_v30  ;;  %v7498_v41 = vld [vmem:[#allocation5 + $0xd90] sm:$0xf]  ;;  %v7058_v30 = vld [vmem:[#allocation5 + $0xa20] sm:$0xf] }
 0x1f2   :  { %4285 = vmatpush.bf16.msra.mxu2 %v6539_v48  ;;  %v7339_v48 = vor.u32 %v9023_v33, %v7338_v2  ;;  %v4045_v52 = vpop.f32.mrf.mxu3  ;;  %v6063_v63 = vor.u32 %v8698_v46, %v6060_v47  ;;  %v8668_v2 = vld [vmem:[#allocation5 + $0x164] sm:$0xf]  ;;  %v5940_v33 = vld [vmem:[#allocation5 + $0x188] sm:$0xf0]  ;;  %v9143_v46 = vld [vmem:[#allocation5 + $0x1034] sm:$0xf0] }
 0x1f3   :  { %4298 = vmatpush.bf16.msra.mxu3 %v6859_v57  ;;  %v9093_v57 = vld [vmem:[#allocation5 + $0xea4] sm:$0xf0]  ;;  %v5943_v47 = vor.u32 %v8668_v2, %v5940_v33 }
 0x1f4   :  { %4260 = vmatpush.bf16.msra.mxu0 %v5859_v58  ;;  %v6739_v58 = vor.u32 %v8873_v12, %v6738_v40  ;;  %v7619_v5 = vor.u32 %v9093_v57, %v7618_v18  ;;  %v8983_v12 = vld [vmem:[#allocation5 + $0xb34] sm:$0xf0]  ;;  %v8973_v57 = vld [vmem:[#allocation5 + $0xae4] sm:$0xf0] }
 0x1f5   :  { %4273 = vmatpush.bf16.msra.mxu1 %v6179_v0  ;;  %v8688_v0 = vld [vmem:[#allocation5 + $0x204] sm:$0xf]  ;;  %v8953_v31 = vld [vmem:[#allocation5 + $0xa44] sm:$0xf0] }
 0x1f6   :  { %4286 = vmatpush.bf16.msra.mxu2 %v6499_v1  ;;  %v6020_v1 = vld [vmem:[#allocation5 + $0x228] sm:$0xf0]  ;;  %v9033_v33 = vld [vmem:[#allocation5 + $0xcc4] sm:$0xf0] }
 0x1f7   :  { %4299 = vmatpush.bf16.msra.mxu3 %v6819_v26  ;;  %v6023_v51 = vor.u32 %v8688_v0, %v6020_v1  ;;  %v5980_v26 = vld [vmem:[#allocation5 + $0x1d8] sm:$0xf0]  ;;  %v688_v1 = vperm.slane %v9694_v8, 6 }
 0x1f8   :  { %4261 = vmatpush.bf16.msra.mxu0 %v5819_v28  ;;  %v7259_v28 = vor.u32 %v9003_v13, %v7258_v6  ;;  %v5983_v32 = vor.u32 %v8678_v25, %v5980_v26  ;;  %v7139_v6 = vor.u32 %v8973_v57, %v7138_v56  ;;  %v7098_v13 = vld [vmem:[#allocation5 + $0xa70] sm:$0xf]  ;;  %v9123_v26 = vld [vmem:[#allocation5 + $0xf94] sm:$0xf0] }
 0x1f9   :  { %4274 = vmatpush.bf16.msra.mxu1 %v6139_v55  ;;  %v8993_v55 = vld [vmem:[#allocation5 + $0xb84] sm:$0xf0]  ;;  %v7738_v25 = vld [vmem:[#allocation5 + $0xf70] sm:$0xf] }
 0x1fa   :  { %4287 = vmatpush.bf16.msra.mxu2 %v6459_v29  ;;  %v7538_v29 = vld [vmem:[#allocation5 + $0xde0] sm:$0xf]  ;;  %v7219_v34 = vor.u32 %v8993_v55, %v7218_v4  ;;  %v8638_v4 = vld [vmem:[#allocation5 + $0x74] sm:$0xf]  ;;  %v7739_v2 = vor.u32 %v9123_v26, %v7738_v25  ;;  %v8748_v26 = vld [vmem:[#allocation5 + $0x3e4] sm:$0xf] }
 0x1fb   :  { %4300 = vmatpush.bf16.msra.mxu3 %v6779_v54  ;;  %v7539_v35 = vor.u32 %v9073_v59, %v7538_v29  ;;  %v7178_v54 = vld [vmem:[#allocation5 + $0xb10] sm:$0xf]  ;;  %v7099_v29 = vor.u32 %v8963_v14, %v7098_v13  ;;  %v7419_v59 = vor.u32 %v9043_v23, %v7418_v20  ;;  %v9008_v14 = vld [vmem:[#allocation5 + $0xc04] sm:$0xf]  ;;  %v7300_v20 = vld [vmem:[#allocation5 + $0xc28] sm:$0xf0] }
 0x1fc   :  { %4262 = vmatpush.bf16.msra.mxu0 %v5779_v36  ;;  %v4056_v11 = vpop.f32.mrf.mxu0  ;;  %v7179_v52 = vor.u32 %v8983_v12, %v7178_v54  ;;  %v6380_v54 = vld [vmem:[#allocation5 + $0x4f8] sm:$0xf0]  ;;  %v8938_v12 = vld [vmem:[#allocation5 + $0x9d4] sm:$0xf] }
 0x1fd   :  { %4275 = vmatpush.bf16.msra.mxu1 %v6099_v44  ;;  %v4057_v36 = vadd.f32 %v4056_v11, %v9700_v27  ;;  %v4069_v40 = vpop.f32.mrf.mxu1  ;;  %v9063_v44 = vld [vmem:[#allocation5 + $0xdb4] sm:$0xf0]  ;;  %v7698_v11 = vld [vmem:[#allocation5 + $0xf20] sm:$0xf]  ;;  %v6620_v23 = vld [vmem:[#allocation5 + $0x6d8] sm:$0xf0] }
 0x1fe   :  { %4288 = vmatpush.bf16.msra.mxu2 %v6419_v45  ;;  %v7818_v45 = vld [vmem:[#allocation5 + $0x1010] sm:$0xf] }
 0x1ff   :  { %4301 = vmatpush.bf16.msra.mxu3 %v6739_v58  ;;  %4263 = vmatmul.bf16.vlgmr.msra.gmra.mxu0 %v9585_v21  ;;  %v7819_v18 = vor.u32 %v9143_v46, %v7818_v45  ;;  %v7458_v58 = vld [vmem:[#allocation5 + $0xd40] sm:$0xf]  ;;  %v8768_v46 = vld [vmem:[#allocation5 + $0x484] sm:$0xf] }
 0x200   :  { %4307 = vmatpush.bf16.msrb.mxu0 %v7339_v48  ;;  %4276 = vmatmul.bf16.vlgmr.msra.gmra.mxu1 %v9587_v22  ;;  %v4070_v48 = vadd.f32 %v4069_v40, %v4057_v36  ;;  %v8858_v36 = vld [vmem:[#allocation5 + $0x754] sm:$0xf]  ;;  %v6700_v40 = vld [vmem:[#allocation5 + $0x778] sm:$0xf0] }
 0x201   :  { %4320 = vmatpush.bf16.msrb.mxu1 %v7659_v16  ;;  %4289 = vmatmul.bf16.vlgmr.msra.gmra.mxu2 %v9580_v7  ;;  %v8658_v16 = vld [vmem:[#allocation5 + $0x114] sm:$0xf]  ;;  %v6703_v56 = vor.u32 %v8858_v36, %v6700_v40 }
 0x202   :  { %4333 = vmatpush.bf16.msrb.mxu2 %v7979_v53  ;;  %4302 = vmatmul.bf16.vlgmr.msra.gmra.mxu3 %v9582_v15  ;;  %v7499_v53 = vor.u32 %v9063_v44, %v7498_v41  ;;  %v9710_v27 = vmax.f32 %v4438_v60, %v4070_v48  ;;  %v5903_v0 = vor.u32 %v8658_v16, %v5900_v50  ;;  %v7020_v41 = vld [vmem:[#allocation5 + $0x9f8] sm:$0xf0]  ;;  %v6340_v50 = vld [vmem:[#allocation5 + $0x4a8] sm:$0xf0]  ;;  %v8818_v36 = vld [vmem:[#allocation5 + $0x614] sm:$0xf] }
 0x203   :  { %4346 = vmatpush.bf16.msrb.mxu3 %v6063_v63  ;;  %v9133_v63 = vld [vmem:[#allocation5 + $0xfe4] sm:$0xf0]  ;;  %v7059_v44 = vor.u32 %v8953_v31, %v7058_v30  ;;  %v7023_v57 = vor.u32 %v8938_v12, %v7020_v41  ;;  %v7260_v30 = vld [vmem:[#allocation5 + $0xbd8] sm:$0xf0]  ;;  %v6580_v31 = vld [vmem:[#allocation5 + $0x688] sm:$0xf0] }
 0x204   :  { %4308 = vmatpush.bf16.msrb.mxu0 %v7299_v3  ;;  %v8648_v3 = vld [vmem:[#allocation5 + $0xc4] sm:$0xf]  ;;  %v4058_v19 = vpop.f32.mrf.mxu0  ;;  %v4082_v49 = vpop.f32.mrf.mxu2  ;;  %v7779_v60 = vor.u32 %v9133_v63, %v7778_v62  ;;  %v6660_v63 = vld [vmem:[#allocation5 + $0x728] sm:$0xf0] }
 0x205   :  { %4321 = vmatpush.bf16.msrb.mxu1 %v7619_v5  ;;  %v5860_v5 = vld [vmem:[#allocation5 + $0xe8] sm:$0xf0]  ;;  %v4071_v24 = vpop.f32.mrf.mxu1  ;;  %v8988_v12 = vld [vmem:[#allocation5 + $0xb64] sm:$0xf] }
 0x206   :  { %4334 = vmatpush.bf16.msrb.mxu2 %v7939_v10  ;;  %v7459_v10 = vor.u32 %v9053_v61, %v7458_v58  ;;  %v9018_v58 = vld [vmem:[#allocation5 + $0xc54] sm:$0xf]  ;;  %v7340_v61 = vld [vmem:[#allocation5 + $0xc78] sm:$0xf0]  ;;  %v7220_v41 = vld [vmem:[#allocation5 + $0xb88] sm:$0xf0] }
 0x207   :  { %4347 = vmatpush.bf16.msrb.mxu3 %v6023_v51  ;;  %v4083_v51 = vadd.f32 %v4082_v49, %v688_v1  ;;  %v6980_v1 = vld [vmem:[#allocation5 + $0x9a8] sm:$0xf0]  ;;  %v7343_v13 = vor.u32 %v9018_v58, %v7340_v61  ;;  %v8838_v49 = vld [vmem:[#allocation5 + $0x6b4] sm:$0xf]  ;;  %v7180_v61 = vld [vmem:[#allocation5 + $0xb38] sm:$0xf0] }
 0x208   :  { %4309 = vmatpush.bf16.msrb.mxu0 %v7259_v28  ;;  %v5863_v28 = vor.u32 %v8648_v3, %v5860_v5  ;;  %v6343_v5 = vor.u32 %v8768_v46, %v6340_v50  ;;  %v8918_v24 = vld [vmem:[#allocation5 + $0x934] sm:$0xf]  ;;  %v6180_v50 = vld [vmem:[#allocation5 + $0x368] sm:$0xf0] }
 0x209   :  { %4322 = vmatpush.bf16.msrb.mxu1 %v7579_v42  ;;  %v4095_v42 = vpop.f32.mrf.mxu3  ;;  %v8898_v46 = vld [vmem:[#allocation5 + $0x894] sm:$0xf] }
 0x20a   :  { %4335 = vmatpush.bf16.msrb.mxu2 %v7899_v17  ;;  %v5820_v17 = vld [vmem:[#allocation5 + $0x98] sm:$0xf0]  ;;  %v9713_v55 = vadd.f32 %v4095_v42, %v4083_v51  ;;  %v7303_v42 = vor.u32 %v9008_v14, %v7300_v20  ;;  %v8978_v58 = vld [vmem:[#allocation5 + $0xb14] sm:$0xf]  ;;  %v7140_v14 = vld [vmem:[#allocation5 + $0xae8] sm:$0xf0] }
 0x20b   :  { %4348 = vmatpush.bf16.msrb.mxu3 %v5983_v32  ;;  %v7378_v32 = vld [vmem:[#allocation5 + $0xca0] sm:$0xf]  ;;  %v6940_v51 = vld [vmem:[#allocation5 + $0x958] sm:$0xf0] }
 0x20c   :  { %4310 = vmatpush.bf16.msrb.mxu0 %v7219_v34  ;;  %v9113_v34 = vld [vmem:[#allocation5 + $0xf44] sm:$0xf0]  ;;  %v7379_v45 = vor.u32 %v9033_v33, %v7378_v32  ;;  %v8908_v32 = vld [vmem:[#allocation5 + $0x8e4] sm:$0xf] }
 0x20d   :  { %4323 = vmatpush.bf16.msrb.mxu1 %v7539_v35  ;;  %v8778_v35 = vld [vmem:[#allocation5 + $0x4d4] sm:$0xf]  ;;  %v7699_v48 = vor.u32 %v9113_v34, %v7698_v11  ;;  %v6220_v34 = vld [vmem:[#allocation5 + $0x3b8] sm:$0xf0] }
 0x20e   :  { %4336 = vmatpush.bf16.msrb.mxu2 %v7859_v38  ;;  %v5823_v38 = vor.u32 %v8638_v4, %v5820_v17  ;;  %v6383_v16 = vor.u32 %v8778_v35, %v6380_v54  ;;  %v6623_v4 = vor.u32 %v8838_v49, %v6620_v23  ;;  %v8828_v17 = vld [vmem:[#allocation5 + $0x664] sm:$0xf]  ;;  %v8738_v11 = vld [vmem:[#allocation5 + $0x394] sm:$0xf]  ;;  %v6460_v23 = vld [vmem:[#allocation5 + $0x598] sm:$0xf0] }
 0x20f   :  { %4349 = vmatpush.bf16.msrb.mxu3 %v5943_v47  ;;  %v4084_v47 = vpop.f32.mrf.mxu2  ;;  %v6583_v54 = vor.u32 %v8828_v17, %v6580_v31  ;;  %v6100_v17 = vld [vmem:[#allocation5 + $0x2c8] sm:$0xf0] }
 0x210   :  { %4311 = vmatpush.bf16.msrb.mxu0 %v7179_v52  ;;  %v8628_v52 = vld [vmem:[#allocation5 + $0x24] sm:$0xf]  ;;  %v6860_v47 = vld [vmem:[#allocation5 + $0x8b8] sm:$0xf0]  ;;  %v6420_v31 = vld [vmem:[#allocation5 + $0x548] sm:$0xf0] }
 0x211   :  { %4324 = vmatpush.bf16.msrb.mxu1 %v7499_v53  ;;  %v5780_v53 = vld [vmem:[#allocation5 + $0x48] sm:$0xf0]  ;;  %v4097_v62 = vpop.f32.mrf.mxu3 }
 0x212   :  { %4337 = vmatpush.bf16.msrb.mxu2 %v7819_v18  ;;  %v8848_v18 = vld [vmem:[#allocation5 + $0x704] sm:$0xf]  ;;  %v5783_v3 = vor.u32 %v8628_v52, %v5780_v53  ;;  %v7223_v52 = vor.u32 %v8988_v12, %v7220_v41  ;;  %v6500_v62 = vld [vmem:[#allocation5 + $0x5e8] sm:$0xf0] }
 0x213   :  { %4350 = vmatpush.bf16.msrb.mxu3 %v5903_v0  ;;  %v8928_v0 = vld [vmem:[#allocation5 + $0x984] sm:$0xf]  ;;  %v6663_v19 = vor.u32 %v8848_v18, %v6660_v63 }
 0x214   :  { %4312 = vmatpush.bf16.msrb.mxu0 %v7139_v6  ;;  %v8758_v6 = vld [vmem:[#allocation5 + $0x434] sm:$0xf]  ;;  %v8808_v18 = vld [vmem:[#allocation5 + $0x5c4] sm:$0xf] }
 0x215   :  { %4325 = vmatpush.bf16.msrb.mxu1 %v7459_v10  ;;  %v6300_v10 = vld [vmem:[#allocation5 + $0x458] sm:$0xf0]  ;;  %v8888_v63 = vld [vmem:[#allocation5 + $0x844] sm:$0xf] }
 0x216   :  { %4338 = vmatpush.bf16.msrb.mxu2 %v7779_v60  ;;  %v6983_v60 = vor.u32 %v8928_v0, %v6980_v1  ;;  %v6303_v25 = vor.u32 %v8758_v6, %v6300_v10  ;;  %v8718_v1 = vld [vmem:[#allocation5 + $0x2f4] sm:$0xf]  ;;  %v6503_v10 = vor.u32 %v8808_v18, %v6500_v62  ;;  %v7580_v62 = vld [vmem:[#allocation5 + $0xe58] sm:$0xf0] }
 0x217   :  { %4351 = vmatpush.bf16.msrb.mxu3 %v5863_v28  ;;  %v6260_v28 = vld [vmem:[#allocation5 + $0x408] sm:$0xf0] }
 0x218   :  { %4313 = vmatpush.bf16.msrb.mxu0 %v7099_v29  ;;  %v6943_v29 = vor.u32 %v8918_v24, %v6940_v51  ;;  %v6263_v33 = vor.u32 %v8748_v26, %v6260_v28  ;;  %v8878_v24 = vld [vmem:[#allocation5 + $0x7f4] sm:$0xf]  ;;  %v6780_v51 = vld [vmem:[#allocation5 + $0x818] sm:$0xf0] }
 0x219   :  { %4326 = vmatpush.bf16.msrb.mxu1 %v7419_v59  ;;  %v8998_v59 = vld [vmem:[#allocation5 + $0xbb4] sm:$0xf] }
 0x21a   :  { %4339 = vmatpush.bf16.msrb.mxu2 %v7739_v2  ;;  %v6900_v2 = vld [vmem:[#allocation5 + $0x908] sm:$0xf0]  ;;  %v7263_v35 = vor.u32 %v8998_v59, %v7260_v30 }
 0x21b   :  { %4352 = vmatpush.bf16.msrb.mxu3 %v5823_v38  ;;  %v6903_v38 = vor.u32 %v8908_v32, %v6900_v2  ;;  %v6783_v32 = vor.u32 %v8878_v24, %v6780_v51  ;;  %v8958_v2 = vld [vmem:[#allocation5 + $0xa74] sm:$0xf] }
 0x21c   :  { %4314 = vmatpush.bf16.msrb.mxu0 %v7059_v44  ;;  %v4108_v40 = vpop.f32.mrf.mxu0  ;;  %v6540_v44 = vld [vmem:[#allocation5 + $0x638] sm:$0xf0] }
 0x21d   :  { %4327 = vmatpush.bf16.msrb.mxu1 %v7379_v45  ;;  %v4109_v45 = vadd.f32 %v4108_v40, %v9713_v55  ;;  %v6820_v55 = vld [vmem:[#allocation5 + $0x868] sm:$0xf0] }
 0x21e   :  { %4340 = vmatpush.bf16.msrb.mxu2 %v7699_v48  ;;  %v6223_v48 = vor.u32 %v8738_v11, %v6220_v34  ;;  %v9098_v11 = vld [vmem:[#allocation5 + $0xed4] sm:$0xf]  ;;  %v7660_v34 = vld [vmem:[#allocation5 + $0xef8] sm:$0xf0] }
 0x21f   :  { %4315 = vmatmul.bf16.vlgmr.msrb.gmra.mxu0 %v9592_v37  ;;  %4353 = vmatpush.bf16.msrb.mxu3 %v5783_v3  ;;  %v6140_v3 = vld [vmem:[#allocation5 + $0x318] sm:$0xf0] }
 0x220   :  { %4359 = vmatpush.bf16.msra.mxu0 %v6383_v16  ;;  %4328 = vmatmul.bf16.vlgmr.msrb.gmra.mxu1 %v9596_v43  ;;  %v8728_v16 = vld [vmem:[#allocation5 + $0x344] sm:$0xf] }
 0x221   :  { %4372 = vmatpush.bf16.msra.mxu1 %v6703_v56  ;;  %4341 = vmatmul.bf16.vlgmr.msrb.gmra.mxu2 %v9594_v39  ;;  %v6543_v56 = vor.u32 %v8818_v36, %v6540_v44  ;;  %v6183_v0 = vor.u32 %v8728_v16, %v6180_v50  ;;  %v8868_v36 = vld [vmem:[#allocation5 + $0x7a4] sm:$0xf]  ;;  %v7620_v16 = vld [vmem:[#allocation5 + $0xea8] sm:$0xf0] }
 0x222   :  { %4385 = vmatpush.bf16.msra.mxu2 %v7023_v57  ;;  %4354 = vmatmul.bf16.vlgmr.msrb.gmra.mxu3 %v9585_v21  ;;  %v4121_v21 = vpop.f32.mrf.mxu1  ;;  %v6863_v57 = vor.u32 %v8898_v46, %v6860_v47  ;;  %v8948_v46 = vld [vmem:[#allocation5 + $0xa24] sm:$0xf]  ;;  %v7060_v47 = vld [vmem:[#allocation5 + $0xa48] sm:$0xf0] }
 0x223   :  { %4398 = vmatpush.bf16.msra.mxu3 %v7343_v13  ;;  %v4122_v53 = vadd.f32 %v4121_v21, %v4109_v45  ;;  %v8798_v13 = vld [vmem:[#allocation5 + $0x574] sm:$0xf]  ;;  %v7663_v45 = vor.u32 %v9098_v11, %v7660_v34  ;;  %v7063_v18 = vor.u32 %v8948_v46, %v7060_v47  ;;  %v8266_v11 = vld [vmem:[#allocation8 + $0x230] sm:$0xf]  ;;  %v9259_v34 = vld [vmem:[#allocation8 + $0x254] sm:$0xf0] }
 0x224   :  { %4360 = vmatpush.bf16.msra.mxu0 %v6343_v5  ;;  %v7183_v5 = vor.u32 %v8978_v58, %v7180_v61  ;;  %v4134_v6 = vpop.f32.mrf.mxu2  ;;  %v4110_v49 = vpop.f32.mrf.mxu0  ;;  %v6463_v30 = vor.u32 %v8798_v13, %v6460_v23  ;;  %v9078_v61 = vld [vmem:[#allocation5 + $0xe34] sm:$0xf]  ;;  %v7380_v46 = vld [vmem:[#allocation5 + $0xcc8] sm:$0xf0]  ;;  %v9108_v47 = vld [vmem:[#allocation5 + $0xf24] sm:$0xf] }
 0x225   :  { %4373 = vmatpush.bf16.msra.mxu1 %v6663_v19  ;;  %v6823_v19 = vor.u32 %v8888_v63, %v6820_v55  ;;  %v4135_v20 = vadd.f32 %v4134_v6, %v4122_v53  ;;  %v9168_v53 = vld [vmem:[#allocation5 + $0x1104] sm:$0xf]  ;;  %v9158_v63 = vld [vmem:[#allocation5 + $0x10b4] sm:$0xf]  ;;  %v7900_v55 = vld [vmem:[#allocation5 + $0x10d8] sm:$0xf0] }
 0x226   :  { %4386 = vmatpush.bf16.msra.mxu2 %v6983_v60  ;;  %v8968_v60 = vld [vmem:[#allocation5 + $0xac4] sm:$0xf]  ;;  %v9058_v49 = vld [vmem:[#allocation5 + $0xd94] sm:$0xf] }
 0x227   :  { %4399 = vmatpush.bf16.msra.mxu3 %v7303_v42  ;;  %v6143_v42 = vor.u32 %v8718_v1, %v6140_v3  ;;  %v7143_v59 = vor.u32 %v8968_v60, %v7140_v14  ;;  %v7903_v1 = vor.u32 %v9158_v63, %v7900_v55  ;;  %v9068_v3 = vld [vmem:[#allocation5 + $0xde4] sm:$0xf]  ;;  %v689_v60 = vperm.slane %v9694_v8, 7 }
 0x228   :  { %4361 = vmatpush.bf16.msra.mxu0 %v6303_v25  ;;  %v4147_v25 = vpop.f32.mrf.mxu3  ;;  %v9148_v6 = vld [vmem:[#allocation5 + $0x1064] sm:$0xf] }
 0x229   :  { %4374 = vmatpush.bf16.msra.mxu1 %v6623_v4  ;;  %v9720_v28 = vadd.f32 %v4147_v25, %v4135_v20  ;;  %v8708_v4 = vld [vmem:[#allocation5 + $0x2a4] sm:$0xf]  ;;  %v7820_v20 = vld [vmem:[#allocation5 + $0x1038] sm:$0xf0] }
 0x22a   :  { %4387 = vmatpush.bf16.msra.mxu2 %v6943_v29  ;;  %v4123_v26 = vpop.f32.mrf.mxu1  ;;  %v8788_v29 = vld [vmem:[#allocation5 + $0x524] sm:$0xf]  ;;  %v6103_v40 = vor.u32 %v8708_v4, %v6100_v17  ;;  %v7780_v17 = vld [vmem:[#allocation5 + $0xfe8] sm:$0xf0] }
 0x22b   :  { %4400 = vmatpush.bf16.msra.mxu3 %v7263_v35  ;;  %v9178_v35 = vld [vmem:[#allocation5 + $0x1154] sm:$0xf]  ;;  %v6423_v44 = vor.u32 %v8788_v29, %v6420_v31  ;;  %v9048_v25 = vld [vmem:[#allocation5 + $0xd44] sm:$0xf]  ;;  %v7460_v26 = vld [vmem:[#allocation5 + $0xd68] sm:$0xf0] }
 0x22c   :  { %4362 = vmatpush.bf16.msra.mxu0 %v6263_v33  ;;  %v7100_v33 = vld [vmem:[#allocation5 + $0xa98] sm:$0xf0]  ;;  %v4136_v41 = vpop.f32.mrf.mxu2  ;;  %v9128_v4 = vld [vmem:[#allocation5 + $0xfc4] sm:$0xf]  ;;  %v7463_v8 = vor.u32 %v9048_v25, %v7460_v26  ;;  %v9118_v31 = vld [vmem:[#allocation5 + $0xf74] sm:$0xf] }
 0x22d   :  { %4375 = vmatpush.bf16.msra.mxu1 %v6583_v54  ;;  %v7980_v54 = vld [vmem:[#allocation5 + $0x1178] sm:$0xf0]  ;;  %v7103_v12 = vor.u32 %v8958_v2, %v7100_v33 }
 0x22e   :  { %4388 = vmatpush.bf16.msra.mxu2 %v6903_v38  ;;  %v6740_v38 = vld [vmem:[#allocation5 + $0x7c8] sm:$0xf0]  ;;  %v7983_v21 = vor.u32 %v9178_v35, %v7980_v54  ;;  %v7740_v33 = vld [vmem:[#allocation5 + $0xf98] sm:$0xf0] }
 0x22f   :  { %4401 = vmatpush.bf16.msra.mxu3 %v7223_v52  ;;  %v6743_v50 = vor.u32 %v8868_v36, %v6740_v38  ;;  %v8267_v36 = vor.u32 %v9259_v34, %v8266_v11  ;;  %v8226_v38 = vld [vmem:[#allocation8 + $0x1e0] sm:$0xf] }
 0x230   :  { %4363 = vmatpush.bf16.msra.mxu0 %v6223_v48  ;;  %v9088_v48 = vld [vmem:[#allocation5 + $0xe84] sm:$0xf]  ;;  %v4149_v52 = vpop.f32.mrf.mxu3 }
 0x231   :  { %4376 = vmatpush.bf16.msra.mxu1 %v6543_v56  ;;  %v7940_v56 = vld [vmem:[#allocation5 + $0x1128] sm:$0xf0]  ;;  %v8186_v52 = vld [vmem:[#allocation8 + $0x190] sm:$0xf] }
 0x232   :  { %4389 = vmatpush.bf16.msra.mxu2 %v6863_v57  ;;  %v7623_v57 = vor.u32 %v9088_v48, %v7620_v16  ;;  %v7943_v58 = vor.u32 %v9168_v53, %v7940_v56  ;;  %v7700_v48 = vld [vmem:[#allocation5 + $0xf48] sm:$0xf0]  ;;  %v9254_v16 = vld [vmem:[#allocation8 + $0x234] sm:$0xf]  ;;  %v9239_v53 = vld [vmem:[#allocation8 + $0x1b4] sm:$0xf0] }
 0x233   :  { %4402 = vmatpush.bf16.msra.mxu3 %v7183_v5  ;;  %v7540_v5 = vld [vmem:[#allocation5 + $0xe08] sm:$0xf0]  ;;  %v8187_v63 = vor.u32 %v9239_v53, %v8186_v52 }
 0x234   :  { %4364 = vmatpush.bf16.msra.mxu0 %v6183_v0  ;;  %v7583_v0 = vor.u32 %v9078_v61, %v7580_v62  ;;  %v7543_v13 = vor.u32 %v9068_v3, %v7540_v5  ;;  %v9244_v61 = vld [vmem:[#allocation8 + $0x1e4] sm:$0xf]  ;;  %v8228_v62 = vld [vmem:[#allocation8 + $0x208] sm:$0xf0]  ;;  %v9234_v5 = vld [vmem:[#allocation8 + $0x194] sm:$0xf] }
 0x235   :  { %4377 = vmatpush.bf16.msra.mxu1 %v6503_v10  ;;  %v7860_v10 = vld [vmem:[#allocation5 + $0x1088] sm:$0xf0]  ;;  %v8231_v3 = vor.u32 %v9244_v61, %v8228_v62  ;;  %v9245_v62 = vld [vmem:[#allocation8 + $0x1ec] sm:$0xf] }
 0x236   :  { %4390 = vmatpush.bf16.msra.mxu2 %v6823_v19  ;;  %v7863_v19 = vor.u32 %v9148_v6, %v7860_v10  ;;  %v8188_v6 = vld [vmem:[#allocation8 + $0x1b8] sm:$0xf0]  ;;  %v8276_v52 = vld [vmem:[#allocation8 + $0x260] sm:$0xf0] }
 0x237   :  { %4403 = vmatpush.bf16.msra.mxu3 %v7143_v59  ;;  %v9038_v59 = vld [vmem:[#allocation5 + $0xcf4] sm:$0xf] }
 0x238   :  { %4365 = vmatpush.bf16.msra.mxu0 %v6143_v42 }
 0x239   :  { %4378 = vmatpush.bf16.msra.mxu1 %v6463_v30  ;;  %v7420_v30 = vld [vmem:[#allocation5 + $0xd18] sm:$0xf0] }
 0x23a   :  { %4391 = vmatpush.bf16.msra.mxu2 %v6783_v32 }
 0x23b   :  { %4404 = vmatpush.bf16.msra.mxu3 %v7103_v12  ;;  %v7423_v12 = vor.u32 %v9038_v59, %v7420_v30  ;;  %v7986_v30 = vld [vmem:[#allocation8] sm:$0xf] }
 0x23c   :  { %4366 = vmatpush.bf16.msra.mxu0 %v6103_v40  ;;  %v9249_v40 = vld [vmem:[#allocation8 + $0x204] sm:$0xf0] }
 0x23d   :  { %4379 = vmatpush.bf16.msra.mxu1 %v6423_v44  ;;  %v4173_v23 = vpop.f32.mrf.mxu1  ;;  %v7743_v44 = vor.u32 %v9118_v31, %v7740_v33  ;;  %v9189_v31 = vld [vmem:[#allocation8 + $0x24] sm:$0xf0] }
 0x23e   :  { %4392 = vmatpush.bf16.msra.mxu2 %v6743_v50  ;;  %v4174_v42 = vadd.f32 %v4173_v23, %v689_v60  ;;  %v8268_v50 = vld [vmem:[#allocation8 + $0x258] sm:$0xf0] }
 0x23f   :  { %4367 = vmatmul.bf16.vlgmr.msra.gmra.mxu0 %v9587_v22  ;;  %4405 = vmatpush.bf16.msra.mxu3 %v7063_v18  ;;  %v4160_v22 = vpop.f32.mrf.mxu0 }
 0x240   :  { %4411 = vmatpush.bf16.msrb.mxu0 %v7663_v45  ;;  %4380 = vmatmul.bf16.vlgmr.msra.gmra.mxu1 %v9580_v7  ;;  %v7500_v7 = vld [vmem:[#allocation5 + $0xdb8] sm:$0xf0]  ;;  %v9728_v14 = vadd.f32 %v4160_v22, %v9720_v28  ;;  %v7783_v28 = vor.u32 %v9128_v4, %v7780_v17  ;;  %v9028_v45 = vld [vmem:[#allocation5 + $0xca4] sm:$0xf] }
 0x241   :  { %4424 = vmatpush.bf16.msrb.mxu1 %v7983_v21  ;;  %4393 = vmatmul.bf16.vlgmr.msra.gmra.mxu2 %v9582_v15  ;;  %v9138_v15 = vld [vmem:[#allocation5 + $0x1014] sm:$0xf]  ;;  %v8227_v21 = vor.u32 %v9249_v40, %v8226_v38  ;;  %v7383_v56 = vor.u32 %v9028_v45, %v7380_v46  ;;  %v9219_v22 = vld [vmem:[#allocation8 + $0x114] sm:$0xf0]  ;;  %v9250_v46 = vld [vmem:[#allocation8 + $0x20c] sm:$0xf0] }
 0x242   :  { %4406 = vmatmul.bf16.vlgmr.msra.gmra.mxu3 %v9592_v37  ;;  %v4441_v24 = vmax.f32 %v9688_v9, %v9728_v14  ;;  %v7503_v37 = vor.u32 %v9058_v49, %v7500_v7  ;;  %v7823_v51 = vor.u32 %v9138_v15, %v7820_v20  ;;  %5431 = vmatpush.bf16.msrb.mxu2 %v8267_v36  ;;  %v9224_v49 = vld [vmem:[#allocation8 + $0x144] sm:$0xf]  ;;  %v8148_v7 = vld [vmem:[#allocation8 + $0x168] sm:$0xf0]  ;;  %v8066_v15 = vld [vmem:[#allocation8 + $0xa0] sm:$0xf] }
 0x243   :  { %v9209_v20 = vld [vmem:[#allocation8 + $0xc4] sm:$0xf0]  ;;  %v8151_v23 = vor.u32 %v9224_v49, %v8148_v7  ;;  %v7987_v36 = vor.u32 %v9189_v31, %v7986_v30  ;;  %v9225_v7 = vld [vmem:[#allocation8 + $0x14c] sm:$0xf]  ;;  %v9339_v30 = vld [vmem:[#allocation8 + $0x4d4] sm:$0xf0] }
 0x244   :  { %4412 = vmatpush.bf16.msrb.mxu0 %v7623_v57  ;;  %v4186_v29 = vpop.f32.mrf.mxu2  ;;  %v7703_v57 = vor.u32 %v9108_v47, %v7700_v48  ;;  %v8067_v25 = vor.u32 %v9209_v20, %v8066_v15  ;;  %v8234_v45 = vld [vmem:[#allocation8 + $0x1e8] sm:$0xf]  ;;  %v9184_v48 = vld [vmem:[#allocation8 + $0x4] sm:$0xf]  ;;  %v8202_v9 = vld [vmem:[#allocation8 + $0x1a0] sm:$0xf] }
 0x245   :  { %4425 = vmatpush.bf16.msrb.mxu1 %v7943_v58  ;;  %v4187_v32 = vadd.f32 %v4186_v29, %v4174_v42  ;;  %v4199_v35 = vpop.f32.mrf.mxu3  ;;  %v4175_v54 = vpop.f32.mrf.mxu1  ;;  %v8271_v58 = vor.u32 %v9254_v16, %v8268_v50  ;;  %v9199_v42 = vld [vmem:[#allocation8 + $0x74] sm:$0xf0]  ;;  %v9204_v29 = vld [vmem:[#allocation8 + $0xa4] sm:$0xf]  ;;  %v7988_v16 = vld [vmem:[#allocation8 + $0x28] sm:$0xf0]  ;;  %v8235_v53 = vor.u32 %v9250_v46, %v8234_v45 }
 0x246   :  { %5432 = vmatpush.bf16.msrb.mxu2 %v8227_v21  ;;  %v8028_v54 = vld [vmem:[#allocation8 + $0x78] sm:$0xf0]  ;;  %v9329_v45 = vld [vmem:[#allocation8 + $0x484] sm:$0xf0] }
 0x247   :  { %v4162_v2 = vpop.f32.mrf.mxu0  ;;  %v4200_v41 = vadd.f32 %v4199_v35, %v4187_v32  ;;  %v8274_v32 = vld [vmem:[#allocation8 + $0x238] sm:$0xf]  ;;  %v9194_v35 = vld [vmem:[#allocation8 + $0x54] sm:$0xf]  ;;  %v9255_v50 = vld [vmem:[#allocation8 + $0x23c] sm:$0xf] }
 0x248   :  { %4413 = vmatpush.bf16.msrb.mxu0 %v7583_v0  ;;  %v8146_v0 = vld [vmem:[#allocation8 + $0x140] sm:$0xf]  ;;  %v8031_v47 = vor.u32 %v9194_v35, %v8028_v54  ;;  %v8279_v61 = vor.u32 %v9255_v50, %v8276_v52  ;;  %v8036_v35 = vld [vmem:[#allocation8 + $0x80] sm:$0xf0]  ;;  %v8548_v52 = vld [vmem:[#allocation8 + $0x488] sm:$0xf0] }
 0x249   :  { %4426 = vmatpush.bf16.msrb.mxu1 %v7903_v1  ;;  %v9229_v1 = vld [vmem:[#allocation8 + $0x164] sm:$0xf0]  ;;  %v9260_v2 = vld [vmem:[#allocation8 + $0x25c] sm:$0xf0]  ;;  %v9324_v50 = vld [vmem:[#allocation8 + $0x464] sm:$0xf] }
 0x24a   :  { %5433 = vmatpush.bf16.msrb.mxu2 %v8187_v63  ;;  %v8147_v10 = vor.u32 %v9229_v1, %v8146_v0  ;;  %v8236_v63 = vld [vmem:[#allocation8 + $0x210] sm:$0xf0]  ;;  %v8154_v1 = vld [vmem:[#allocation8 + $0x148] sm:$0xf] }
 0x24c   :  { %4414 = vmatpush.bf16.msrb.mxu0 %v7543_v13  ;;  %v4188_v18 = vpop.f32.mrf.mxu2  ;;  %v8106_v13 = vld [vmem:[#allocation8 + $0xf0] sm:$0xf] }
 0x24d   :  { %4427 = vmatpush.bf16.msrb.mxu1 %v7863_v19  ;;  %v4201_v55 = vpop.f32.mrf.mxu3  ;;  %v8191_v19 = vor.u32 %v9234_v5, %v8188_v6  ;;  %v8107_v60 = vor.u32 %v9219_v22, %v8106_v13  ;;  %v9240_v18 = vld [vmem:[#allocation8 + $0x1bc] sm:$0xf0]  ;;  %v8239_v5 = vor.u32 %v9245_v62, %v8236_v63  ;;  %v9235_v6 = vld [vmem:[#allocation8 + $0x19c] sm:$0xf]  ;;  %v8114_v22 = vld [vmem:[#allocation8 + $0xf8] sm:$0xf] }
 0x24e   :  { %5434 = vmatpush.bf16.msrb.mxu2 %v8147_v10  ;;  %v8196_v10 = vld [vmem:[#allocation8 + $0x1c0] sm:$0xf0]  ;;  %v9319_v62 = vld [vmem:[#allocation8 + $0x434] sm:$0xf0]  ;;  %v9314_v63 = vld [vmem:[#allocation8 + $0x414] sm:$0xf] }
 0x24f   :  { %v8199_v49 = vor.u32 %v9235_v6, %v8196_v10  ;;  %v8466_v10 = vld [vmem:[#allocation8 + $0x3c0] sm:$0xf] }
 0x250   :  { %4415 = vmatpush.bf16.msrb.mxu0 %v7503_v37  ;;  %v9214_v37 = vld [vmem:[#allocation8 + $0xf4] sm:$0xf] }
 0x251   :  { %4428 = vmatpush.bf16.msrb.mxu1 %v7823_v51  ;;  %v8108_v51 = vld [vmem:[#allocation8 + $0x118] sm:$0xf0] }
 0x252   :  { %5435 = vmatpush.bf16.msrb.mxu2 %v8107_v60  ;;  %v8156_v60 = vld [vmem:[#allocation8 + $0x170] sm:$0xf0] }
 0x253   :  { %v8159_v20 = vor.u32 %v9225_v7, %v8156_v60 }
 0x254   :  { %4416 = vmatpush.bf16.msrb.mxu0 %v7463_v8 }
 0x255   :  { %4429 = vmatpush.bf16.msrb.mxu1 %v7783_v28  ;;  %v8068_v28 = vld [vmem:[#allocation8 + $0xc8] sm:$0xf0] }
 0x256   :  { %5436 = vmatpush.bf16.msrb.mxu2 %v8067_v25  ;;  %v8071_v11 = vor.u32 %v9204_v29, %v8068_v28  ;;  %v9210_v25 = vld [vmem:[#allocation8 + $0xcc] sm:$0xf0]  ;;  %v9200_v29 = vld [vmem:[#allocation8 + $0x7c] sm:$0xf0] }
 0x258   :  { %4417 = vmatpush.bf16.msrb.mxu0 %v7423_v12  ;;  %v8275_v12 = vor.u32 %v9260_v2, %v8274_v32  ;;  %v9334_v2 = vld [vmem:[#allocation8 + $0x4b4] sm:$0xf] }
 0x259   :  { %4430 = vmatpush.bf16.msrb.mxu1 %v7743_v44 }
 0x25c   :  { %4418 = vmatpush.bf16.msrb.mxu0 %v7383_v56  ;;  %v4212_v26 = vpop.f32.mrf.mxu0  ;;  %v8194_v56 = vld [vmem:[#allocation8 + $0x198] sm:$0xf] }
 0x25d   :  { %4431 = vmatpush.bf16.msrb.mxu1 %v7703_v57  ;;  %v4213_v4 = vadd.f32 %v4212_v26, %v4200_v41  ;;  %v4225_v17 = vpop.f32.mrf.mxu1  ;;  %v8195_v0 = vor.u32 %v9240_v18, %v8194_v56  ;;  %v9185_v18 = vld [vmem:[#allocation8 + $0xc] sm:$0xf] }
 0x25f   :  { %4419 = vmatmul.bf16.vlgmr.msrb.gmra.mxu0 %v9596_v43  ;;  %v8026_v43 = vld [vmem:[#allocation8 + $0x50] sm:$0xf]  ;;  %v4226_v8 = vadd.f32 %v4225_v17, %v4213_v4  ;;  %v9205_v17 = vld [vmem:[#allocation8 + $0xac] sm:$0xf] }
 0x260   :  { %5457 = vmatpush.bf16.msra.mxu0 %v8271_v58  ;;  %4432 = vmatmul.bf16.vlgmr.msrb.gmra.mxu1 %v9594_v39  ;;  %v8111_v39 = vor.u32 %v9214_v37, %v8108_v51  ;;  %v8027_v59 = vor.u32 %v9199_v42, %v8026_v43  ;;  %v7991_v58 = vor.u32 %v9184_v48, %v7988_v16  ;;  %v8116_v37 = vld [vmem:[#allocation8 + $0x120] sm:$0xf0]  ;;  %v8074_v51 = vld [vmem:[#allocation8 + $0xa8] sm:$0xf] }
 0x261   :  { %v8075_v26 = vor.u32 %v9210_v25, %v8074_v51  ;;  %v8428_v25 = vld [vmem:[#allocation8 + $0x398] sm:$0xf0] }
 0x262   :  { %5437 = vmatpush.bf16.msrb.mxu2 %v8027_v59  ;;  %v8586_v59 = vld [vmem:[#allocation8 + $0x4b0] sm:$0xf] }
 0x263   :  { %v8587_v32 = vor.u32 %v9339_v30, %v8586_v59  ;;  %v8346_v59 = vld [vmem:[#allocation8 + $0x2d0] sm:$0xf]  ;;  %v9279_v30 = vld [vmem:[#allocation8 + $0x2f4] sm:$0xf0] }
 0x264   :  { %5458 = vmatpush.bf16.msra.mxu0 %v8231_v3  ;;  %v4238_v33 = vpop.f32.mrf.mxu2  ;;  %v4214_v40 = vpop.f32.mrf.mxu0  ;;  %v9230_v3 = vld [vmem:[#allocation8 + $0x16c] sm:$0xf0] }
 0x265   :  { %v4239_v34 = vadd.f32 %v4238_v33, %v4226_v8  ;;  %v4251_v38 = vpop.f32.mrf.mxu3  ;;  %v4227_v44 = vpop.f32.mrf.mxu1  ;;  %v8155_v13 = vor.u32 %v9230_v3, %v8154_v1  ;;  %v8034_v8 = vld [vmem:[#allocation8 + $0x58] sm:$0xf]  ;;  %v8588_v33 = vld [vmem:[#allocation8 + $0x4d8] sm:$0xf0]  ;;  %5444 = vmatpush.bf16.msrb.mxu3 %v8587_v32  ;;  %v9190_v40 = vld [vmem:[#allocation8 + $0x2c] sm:$0xf0] }
 0x266   :  { %5438 = vmatpush.bf16.msrb.mxu2 %v7987_v36  ;;  %v8035_v28 = vor.u32 %v9200_v29, %v8034_v8  ;;  %v8591_v54 = vor.u32 %v9334_v2, %v8588_v33  ;;  %v9738_v36 = vld [vmem:[#allocation7 + $0x8] sm:$0x3]  ;;  %v8546_v44 = vld [vmem:[#allocation8 + $0x460] sm:$0xf]  ;;  %v8388_v29 = vld [vmem:[#allocation8 + $0x348] sm:$0xf0]  ;;  %v8347_v2 = vor.u32 %v9279_v30, %v8346_v59 }
 0x267   :  { %v9734_v41 = vadd.f32 %v4251_v38, %v4239_v34  ;;  %v9195_v34 = vld [vmem:[#allocation8 + $0x5c] sm:$0xf]  ;;  %v7994_v38 = vld [vmem:[#allocation8 + $0x8] sm:$0xf]  ;;  %v8547_v16 = vor.u32 %v9329_v45, %v8546_v44  ;;  %v9274_v33 = vld [vmem:[#allocation8 + $0x2d4] sm:$0xf] }
 0x268   :  { %5459 = vmatpush.bf16.msra.mxu0 %v8191_v19  ;;  %v9220_v19 = vld [vmem:[#allocation8 + $0x11c] sm:$0xf0]  ;;  %5470 = vmatpush.bf16.msra.mxu1 %v8591_v54  ;;  %v8039_v48 = vor.u32 %v9195_v34, %v8036_v35  ;;  %v8508_v1 = vld [vmem:[#allocation8 + $0x438] sm:$0xf0]  ;;  %v8308_v45 = vld [vmem:[#allocation8 + $0x2a8] sm:$0xf0] }
 0x269   :  { %v4442_v21 = vmax.f32 %v9710_v27, %v9734_v41  ;;  %v8115_v15 = vor.u32 %v9220_v19, %v8114_v22  ;;  %5445 = vmatpush.bf16.msrb.mxu3 %v8547_v16  ;;  %v8511_v6 = vor.u32 %v9314_v63, %v8508_v1  ;;  %v9304_v22 = vld [vmem:[#allocation8 + $0x3c4] sm:$0xf]  ;;  %v8348_v34 = vld [vmem:[#allocation8 + $0x2f8] sm:$0xf0]  ;;  %v8306_v54 = vld [vmem:[#allocation8 + $0x280] sm:$0xf] }
 0x26a   :  { %5483 = vmatpush.bf16.msra.mxu2 %v8275_v12  ;;  %v7995_v12 = vor.u32 %v9190_v40, %v7994_v38  ;;  %v8351_v35 = vor.u32 %v9274_v33, %v8348_v34  ;;  %v9269_v38 = vld [vmem:[#allocation8 + $0x2a4] sm:$0xf0]  ;;  %v9264_v40 = vld [vmem:[#allocation8 + $0x284] sm:$0xf]  ;;  %v9335_v16 = vld [vmem:[#allocation8 + $0x4bc] sm:$0xf] }
 0x26b   :  { %v8307_v44 = vor.u32 %v9269_v38, %v8306_v54  ;;  %v9330_v1 = vld [vmem:[#allocation8 + $0x48c] sm:$0xf0]  ;;  %v9305_v59 = vld [vmem:[#allocation8 + $0x3cc] sm:$0xf]  ;;  %v9226_v54 = vld [vmem:[#allocation8 + $0x154] sm:$0xf] }
 0x26c   :  { %5460 = vmatpush.bf16.msra.mxu0 %v8151_v23  ;;  %v4240_v57 = vpop.f32.mrf.mxu2  ;;  %v9215_v23 = vld [vmem:[#allocation8 + $0xfc] sm:$0xf]  ;;  %v9263_v41 = vld [vmem:[#allocation8 + $0x274] sm:$0xf0] }
 0x26d   :  { %v4253_v55 = vpop.f32.mrf.mxu3  ;;  %v8119_v4 = vor.u32 %v9215_v23, %v8116_v37  ;;  %v7996_v57 = vld [vmem:[#allocation8 + $0x30] sm:$0xf0]  ;;  %v9299_v23 = vld [vmem:[#allocation8 + $0x394] sm:$0xf0]  ;;  %v8164_v38 = vld [vmem:[#allocation8 + $0x178] sm:$0xf0] }
 0x26e   :  { %5484 = vmatpush.bf16.msra.mxu2 %v8235_v53  ;;  %v690_v53 = vperm.slane %v9738_v36, 0  ;;  %v7999_v55 = vor.u32 %v9185_v18, %v7996_v57  ;;  %v9294_v37 = vld [vmem:[#allocation8 + $0x374] sm:$0xf] }
 0x270   :  { %5461 = vmatpush.bf16.msra.mxu0 %v8111_v39  ;;  %v8076_v39 = vld [vmem:[#allocation8 + $0xd0] sm:$0xf0] }
 0x271   :  { %v8079_v31 = vor.u32 %v9205_v17, %v8076_v39  ;;  %v9289_v17 = vld [vmem:[#allocation8 + $0x344] sm:$0xf0]  ;;  %v9284_v39 = vld [vmem:[#allocation8 + $0x324] sm:$0xf] }
 0x272   :  { %5485 = vmatpush.bf16.msra.mxu2 %v8195_v0 }
 0x274   :  { %5462 = vmatpush.bf16.msra.mxu0 %v8071_v11 }
 0x276   :  { %5486 = vmatpush.bf16.msra.mxu2 %v8155_v13  ;;  %v9309_v13 = vld [vmem:[#allocation8 + $0x3e4] sm:$0xf0] }
 0x277   :  { %v8467_v19 = vor.u32 %v9309_v13, %v8466_v10  ;;  %v8556_v13 = vld [vmem:[#allocation8 + $0x490] sm:$0xf0] }
 0x278   :  { %5463 = vmatpush.bf16.msra.mxu0 %v8031_v47 }
 0x27a   :  { %5487 = vmatpush.bf16.msra.mxu2 %v8115_v15 }
 0x27c   :  { %5464 = vmatpush.bf16.msra.mxu0 %v7991_v58  ;;  %v4264_v43 = vpop.f32.mrf.mxu0  ;;  %v8551_v58 = vor.u32 %v9324_v50, %v8548_v52  ;;  %v8596_v50 = vld [vmem:[#allocation8 + $0x4e0] sm:$0xf0] }
 0x27d   :  { %v4277_v42 = vpop.f32.mrf.mxu1  ;;  %v4265_v3 = vadd.f32 %v4264_v43, %v690_v53  ;;  %v8431_v43 = vor.u32 %v9294_v37, %v8428_v25  ;;  %v8282_v53 = vld [vmem:[#allocation8 + $0x240] sm:$0xf]  ;;  %v8599_v18 = vor.u32 %v9335_v16, %v8596_v50  ;;  %v8514_v37 = vld [vmem:[#allocation8 + $0x418] sm:$0xf]  ;;  %v9315_v25 = vld [vmem:[#allocation8 + $0x41c] sm:$0xf]  ;;  %v8167_v16 = vor.u32 %v9226_v54, %v8164_v38 }
 0x27e   :  { %5488 = vmatpush.bf16.msra.mxu2 %v8075_v26  ;;  %5471 = vmatpush.bf16.msra.mxu1 %v8551_v58  ;;  %v9261_v58 = vld [vmem:[#allocation8 + $0x264] sm:$0xf0]  ;;  %v8122_v50 = vld [vmem:[#allocation8 + $0x100] sm:$0xf] }
 0x27f   :  { %v4278_v7 = vadd.f32 %v4277_v42, %v4265_v3  ;;  %v8391_v42 = vor.u32 %v9284_v39, %v8388_v29  ;;  %v9325_v3 = vld [vmem:[#allocation8 + $0x46c] sm:$0xf] }
 0x280   :  { %5509 = vmatpush.bf16.msrb.mxu0 %v8279_v61  ;;  %v8506_v61 = vld [vmem:[#allocation8 + $0x410] sm:$0xf]  ;;  %v8204_v39 = vld [vmem:[#allocation8 + $0x1c8] sm:$0xf0] }
 0x281   :  { %v8507_v0 = vor.u32 %v9319_v62, %v8506_v61  ;;  %v9256_v61 = vld [vmem:[#allocation8 + $0x244] sm:$0xf]  ;;  %v8284_v62 = vld [vmem:[#allocation8 + $0x268] sm:$0xf0] }
 0x282   :  { %5489 = vmatpush.bf16.msra.mxu2 %v8035_v28  ;;  %5472 = vmatpush.bf16.msra.mxu1 %v8511_v6 }
 0x283   :  { %5446 = vmatpush.bf16.msrb.mxu3 %v8507_v0  ;;  %v8554_v0 = vld [vmem:[#allocation8 + $0x468] sm:$0xf] }
 0x284   :  { %5510 = vmatpush.bf16.msrb.mxu0 %v8239_v5  ;;  %v4290_v11 = vpop.f32.mrf.mxu2  ;;  %v4266_v46 = vpop.f32.mrf.mxu0  ;;  %v8555_v10 = vor.u32 %v9330_v1, %v8554_v0  ;;  %v8082_v0 = vld [vmem:[#allocation8 + $0xb0] sm:$0xf] }
 0x285   :  { %v4279_v47 = vpop.f32.mrf.mxu1  ;;  %v4303_v56 = vpop.f32.mrf.mxu3  ;;  %v4291_v26 = vadd.f32 %v4290_v11, %v4278_v7  ;;  %v8311_v46 = vor.u32 %v9264_v40, %v8308_v45  ;;  %v8559_v7 = vor.u32 %v9325_v3, %v8556_v13  ;;  %v8434_v40 = vld [vmem:[#allocation8 + $0x378] sm:$0xf] }
 0x286   :  { %5490 = vmatpush.bf16.msra.mxu2 %v7995_v12  ;;  %v8594_v47 = vld [vmem:[#allocation8 + $0x4b8] sm:$0xf] }
 0x287   :  { %5447 = vmatpush.bf16.msrb.mxu3 %v8467_v19  ;;  %v4304_v28 = vadd.f32 %v4303_v56, %v4291_v26  ;;  %v8287_v19 = vor.u32 %v9256_v61, %v8284_v62  ;;  %v8396_v62 = vld [vmem:[#allocation8 + $0x350] sm:$0xf0]  ;;  %v9211_v3 = vld [vmem:[#allocation8 + $0xd4] sm:$0xf0] }
 0x288   :  { %5511 = vmatpush.bf16.msrb.mxu0 %v8199_v49  ;;  %v8468_v49 = vld [vmem:[#allocation8 + $0x3e8] sm:$0xf0] }
 0x289   :  { %v8471_v60 = vor.u32 %v9304_v22, %v8468_v49  ;;  %v8283_v22 = vor.u32 %v9261_v58, %v8282_v53  ;;  %v8242_v49 = vld [vmem:[#allocation8 + $0x1f0] sm:$0xf]  ;;  %v9216_v53 = vld [vmem:[#allocation8 + $0x104] sm:$0xf]  ;;  %v9285_v58 = vld [vmem:[#allocation8 + $0x32c] sm:$0xf] }
 0x28a   :  { %v8399_v1 = vor.u32 %v9285_v58, %v8396_v62  ;;  %v9237_v58 = vld [vmem:[#allocation8 + $0x1ac] sm:$0xf] }
 0x28b   :  { %5473 = vmatpush.bf16.msra.mxu1 %v8471_v60 }
 0x28c   :  { %5512 = vmatpush.bf16.msrb.mxu0 %v8159_v20  ;;  %v4292_v5 = vpop.f32.mrf.mxu2  ;;  %v8426_v20 = vld [vmem:[#allocation8 + $0x370] sm:$0xf] }
 0x28d   :  { %v4305_v15 = vpop.f32.mrf.mxu3  ;;  %v8427_v51 = vor.u32 %v9299_v23, %v8426_v20  ;;  %v9246_v20 = vld [vmem:[#allocation8 + $0x1f4] sm:$0xf]  ;;  %v8244_v23 = vld [vmem:[#allocation8 + $0x218] sm:$0xf0] }
 0x28e   :  { %v9251_v15 = vld [vmem:[#allocation8 + $0x214] sm:$0xf0] }
 0x28f   :  { %5448 = vmatpush.bf16.msrb.mxu3 %v8427_v51  ;;  %5474 = vmatpush.bf16.msra.mxu1 %v8431_v43  ;;  %v9320_v51 = vld [vmem:[#allocation8 + $0x43c] sm:$0xf0]  ;;  %v8243_v26 = vor.u32 %v9251_v15, %v8242_v49  ;;  %v8247_v43 = vor.u32 %v9246_v20, %v8244_v23  ;;  %v9275_v49 = vld [vmem:[#allocation8 + $0x2dc] sm:$0xf]  ;;  %v8356_v20 = vld [vmem:[#allocation8 + $0x300] sm:$0xf0]  ;;  %v8083_v23 = vor.u32 %v9211_v3, %v8082_v0 }
 0x290   :  { %5513 = vmatpush.bf16.msrb.mxu0 %v8119_v4  ;;  %v8386_v4 = vld [vmem:[#allocation8 + $0x320] sm:$0xf]  ;;  %v8515_v14 = vor.u32 %v9320_v51, %v8514_v37  ;;  %v8170_v0 = vld [vmem:[#allocation8 + $0x158] sm:$0xf] }
 0x291   :  { %v8387_v8 = vor.u32 %v9289_v17, %v8386_v4  ;;  %v9241_v4 = vld [vmem:[#allocation8 + $0x1c4] sm:$0xf0]  ;;  %v9236_v17 = vld [vmem:[#allocation8 + $0x1a4] sm:$0xf]  ;;  %v8042_v51 = vld [vmem:[#allocation8 + $0x60] sm:$0xf] }
 0x292   :  { %v8203_v34 = vor.u32 %v9241_v4, %v8202_v9  ;;  %v9201_v9 = vld [vmem:[#allocation8 + $0x84] sm:$0xf0]  ;;  %v9265_v4 = vld [vmem:[#allocation8 + $0x28c] sm:$0xf]  ;;  %v9232_v3 = vld [vmem:[#allocation8 + $0x17c] sm:$0xf0] }
 0x293   :  { %5449 = vmatpush.bf16.msrb.mxu3 %v8387_v8  ;;  %5475 = vmatpush.bf16.msra.mxu1 %v8391_v42  ;;  %v9310_v42 = vld [vmem:[#allocation8 + $0x3ec] sm:$0xf0] }
 0x294   :  { %5514 = vmatpush.bf16.msrb.mxu0 %v8079_v31 }
 0x297   :  { %5450 = vmatpush.bf16.msrb.mxu3 %v8347_v2  ;;  %5476 = vmatpush.bf16.msra.mxu1 %v8351_v35  ;;  %v9231_v35 = vld [vmem:[#allocation8 + $0x174] sm:$0xf0] }
 0x298   :  { %5515 = vmatpush.bf16.msrb.mxu0 %v8039_v48  ;;  %v9340_v48 = vld [vmem:[#allocation8 + $0x4dc] sm:$0xf0] }
 0x299   :  { %v8595_v56 = vor.u32 %v9340_v48, %v8594_v47 }
 0x29b   :  { %5451 = vmatpush.bf16.msrb.mxu3 %v8307_v44  ;;  %5477 = vmatpush.bf16.msra.mxu1 %v8311_v46  ;;  %v9295_v44 = vld [vmem:[#allocation8 + $0x37c] sm:$0xf]  ;;  %v8436_v46 = vld [vmem:[#allocation8 + $0x3a0] sm:$0xf0] }
 0x29c   :  { %5516 = vmatpush.bf16.msrb.mxu0 %v7999_v55  ;;  %v4316_v31 = vpop.f32.mrf.mxu0  ;;  %v8439_v47 = vor.u32 %v9295_v44, %v8436_v46  ;;  %v8250_v46 = vld [vmem:[#allocation8 + $0x1f8] sm:$0xf] }
 0x29d   :  { %v4329_v32 = vpop.f32.mrf.mxu1  ;;  %v4317_v11 = vadd.f32 %v4316_v31, %v4304_v28  ;;  %v8474_v28 = vld [vmem:[#allocation8 + $0x3c8] sm:$0xf]  ;;  %v8476_v31 = vld [vmem:[#allocation8 + $0x3f0] sm:$0xf0] }
 0x29e   :  { %v8475_v30 = vor.u32 %v9310_v42, %v8474_v28  ;;  %v8479_v33 = vor.u32 %v9305_v59, %v8476_v31  ;;  %v8002_v42 = vld [vmem:[#allocation8 + $0x10] sm:$0xf]  ;;  %v9191_v59 = vld [vmem:[#allocation8 + $0x34] sm:$0xf0]  ;;  %v9186_v31 = vld [vmem:[#allocation8 + $0x14] sm:$0xf] }
 0x29f   :  { %v4330_v12 = vadd.f32 %v4329_v32, %v4317_v11  ;;  %5496 = vmatpush.bf16.msra.mxu3 %v8595_v56  ;;  %5522 = vmatpush.bf16.msrb.mxu1 %v8599_v18  ;;  %v8162_v32 = vld [vmem:[#allocation8 + $0x150] sm:$0xf]  ;;  %v8207_v11 = vor.u32 %v9236_v17, %v8204_v39  ;;  %v8124_v56 = vld [vmem:[#allocation8 + $0x128] sm:$0xf0]  ;;  %v8394_v18 = vld [vmem:[#allocation8 + $0x328] sm:$0xf] }
 0x2a0   :  { %v8163_v48 = vor.u32 %v9231_v35, %v8162_v32  ;;  %v8316_v39 = vld [vmem:[#allocation8 + $0x2b0] sm:$0xf0]  ;;  %v8004_v32 = vld [vmem:[#allocation8 + $0x38] sm:$0xf0] }
 0x2a1   :  { %v8292_v35 = vld [vmem:[#allocation8 + $0x270] sm:$0xf0] }
 0x2a3   :  { %5497 = vmatpush.bf16.msra.mxu3 %v8555_v10  ;;  %5523 = vmatpush.bf16.msrb.mxu1 %v8559_v7  ;;  %v8084_v10 = vld [vmem:[#allocation8 + $0xd8] sm:$0xf0] }
 0x2a4   :  { %v4342_v52 = vpop.f32.mrf.mxu2  ;;  %v4318_v63 = vpop.f32.mrf.mxu0 }
 0x2a5   :  { %v4343_v57 = vadd.f32 %v4342_v52, %v4330_v12  ;;  %v4331_v55 = vpop.f32.mrf.mxu1  ;;  %v9744_v6 = vpop.f32.mrf.mxu3  ;;  %v9300_v12 = vld [vmem:[#allocation8 + $0x39c] sm:$0xf0]  ;;  %v9221_v52 = vld [vmem:[#allocation8 + $0x124] sm:$0xf0] }
 0x2a6   :  { %v8435_v45 = vor.u32 %v9300_v12, %v8434_v40  ;;  %v8123_v63 = vor.u32 %v9221_v52, %v8122_v50  ;;  %v8127_v55 = vor.u32 %v9216_v53, %v8124_v56  ;;  %v8007_v40 = vor.u32 %v9186_v31, %v8004_v32  ;;  %v8252_v50 = vld [vmem:[#allocation8 + $0x220] sm:$0xf0]  ;;  %v8210_v56 = vld [vmem:[#allocation8 + $0x1a8] sm:$0xf] }
 0x2a7   :  { %v4443_v5 = vmax.f32 %v4441_v24, %v4343_v57  ;;  %v8516_v24 = vld [vmem:[#allocation8 + $0x440] sm:$0xf0]  ;;  %5498 = vmatpush.bf16.msra.mxu3 %v8515_v14  ;;  %v9290_v57 = vld [vmem:[#allocation8 + $0x34c] sm:$0xf0]  ;;  %v9341_v31 = vld [vmem:[#allocation8 + $0x4e4] sm:$0xf0] }
 0x2a8   :  { %v8519_v29 = vor.u32 %v9315_v25, %v8516_v24  ;;  %v8395_v61 = vor.u32 %v9290_v57, %v8394_v18  ;;  %v8359_v25 = vor.u32 %v9275_v49, %v8356_v20  ;;  %v9196_v14 = vld [vmem:[#allocation8 + $0x64] sm:$0xf]  ;;  %v8044_v24 = vld [vmem:[#allocation8 + $0x88] sm:$0xf0]  ;;  %v9242_v57 = vld [vmem:[#allocation8 + $0x1cc] sm:$0xf0] }
 0x2a9   :  { %v9746_v60 = vpack.c.bf16 %v4443_v5, %v4443_v5  ;;  %v9206_v5 = vld [vmem:[#allocation8 + $0xb4] sm:$0xf]  ;;  %v8047_v28 = vor.u32 %v9196_v14, %v8044_v24  ;;  %v9217_v20 = vld [vmem:[#allocation8 + $0x10c] sm:$0xf]  ;;  %v9212_v14 = vld [vmem:[#allocation8 + $0xdc] sm:$0xf0] }
 0x2aa   :  { %5524 = vmatpush.bf16.msrb.mxu1 %v8519_v29  ;;  %v8087_v37 = vor.u32 %v9206_v5, %v8084_v10  ;;  %v8043_v29 = vor.u32 %v9201_v9, %v8042_v51  ;;  %v9227_v5 = vld [vmem:[#allocation8 + $0x15c] sm:$0xf]  ;;  %v8172_v10 = vld [vmem:[#allocation8 + $0x180] sm:$0xf0] }
 0x2ab   :  { %5439 = vmatmul.bf16.vlgmr.msrb.gmra.mxu2 %v9746_v60  ;;  %5465 = vmatmul.bf16.vlgmr.msra.gmra.mxu0 %v9746_v60  ;;  %v8092_v24 = vld [vmem:[#allocation8 + $0xe0] sm:$0xf0] }
 0x2ac   :  { %5535 = vmatpush.bf16.msrb.mxu2 %v8283_v22  ;;  %5561 = vmatpush.bf16.msra.mxu0 %v8287_v19  ;;  %v4344_v8 = vpop.f32.mrf.mxu2  ;;  %v8354_v22 = vld [vmem:[#allocation8 + $0x2d8] sm:$0xf]  ;;  %v9280_v19 = vld [vmem:[#allocation8 + $0x2fc] sm:$0xf0]  ;;  %v9336_v32 = vld [vmem:[#allocation8 + $0x4c4] sm:$0xf] }
 0x2ad   :  { %v4357_v2 = vpop.f32.mrf.mxu3  ;;  %5499 = vmatpush.bf16.msra.mxu3 %v8475_v30  ;;  %v8355_v15 = vor.u32 %v9280_v19, %v8354_v22  ;;  %v691_v8 = vperm.slane %v9738_v36, 1  ;;  %v8319_v30 = vor.u32 %v9265_v4, %v8316_v39  ;;  %v8003_v36 = vor.u32 %v9191_v59, %v8002_v42  ;;  %v8130_v19 = vld [vmem:[#allocation8 + $0x108] sm:$0xf]  ;;  %v9197_v42 = vld [vmem:[#allocation8 + $0x6c] sm:$0xf] }
 0x2ae   :  { %5525 = vmatpush.bf16.msrb.mxu1 %v8479_v33  ;;  %v8290_v2 = vld [vmem:[#allocation8 + $0x248] sm:$0xf]  ;;  %v8175_v22 = vor.u32 %v9227_v5, %v8172_v10  ;;  %v8052_v59 = vld [vmem:[#allocation8 + $0x90] sm:$0xf0]  ;;  %v8260_v5 = vld [vmem:[#allocation8 + $0x228] sm:$0xf0] }
 0x2b0   :  { %5536 = vmatpush.bf16.msrb.mxu2 %v8243_v26  ;;  %5562 = vmatpush.bf16.msra.mxu0 %v8247_v43  ;;  %v8314_v26 = vld [vmem:[#allocation8 + $0x288] sm:$0xf]  ;;  %v9270_v43 = vld [vmem:[#allocation8 + $0x2ac] sm:$0xf0] }
 0x2b1   :  { %5500 = vmatpush.bf16.msra.mxu3 %v8435_v45  ;;  %v8315_v17 = vor.u32 %v9270_v43, %v8314_v26 }
 0x2b2   :  { %5526 = vmatpush.bf16.msrb.mxu1 %v8439_v47  ;;  %v4356_v47 = vadd.f32 %v9744_v6, %v691_v8  ;;  %v8050_v8 = vld [vmem:[#allocation8 + $0x68] sm:$0xf] }
 0x2b4   :  { %5537 = vmatpush.bf16.msrb.mxu2 %v8203_v34  ;;  %5563 = vmatpush.bf16.msra.mxu0 %v8207_v11  ;;  %v9262_v34 = vld [vmem:[#allocation8 + $0x26c] sm:$0xf0]  ;;  %v9257_v11 = vld [vmem:[#allocation8 + $0x24c] sm:$0xf] }
 0x2b5   :  { %5501 = vmatpush.bf16.msra.mxu3 %v8395_v61  ;;  %v8291_v44 = vor.u32 %v9262_v34, %v8290_v2  ;;  %v8295_v45 = vor.u32 %v9257_v11, %v8292_v35  ;;  %v8212_v61 = vld [vmem:[#allocation8 + $0x1d0] sm:$0xf0]  ;;  %v8604_v2 = vld [vmem:[#allocation8 + $0x4e8] sm:$0xf0]  ;;  %v8055_v11 = vor.u32 %v9197_v42, %v8052_v59  ;;  %v8010_v35 = vld [vmem:[#allocation8 + $0x18] sm:$0xf] }
 0x2b6   :  { %5527 = vmatpush.bf16.msrb.mxu1 %v8399_v1  ;;  %v8180_v42 = vld [vmem:[#allocation8 + $0x188] sm:$0xf0] }
 0x2b8   :  { %5538 = vmatpush.bf16.msrb.mxu2 %v8163_v48  ;;  %5564 = vmatpush.bf16.msra.mxu0 %v8167_v16  ;;  %v9252_v48 = vld [vmem:[#allocation8 + $0x21c] sm:$0xf0]  ;;  %v9247_v16 = vld [vmem:[#allocation8 + $0x1fc] sm:$0xf] }
 0x2b9   :  { %5502 = vmatpush.bf16.msra.mxu3 %v8355_v15  ;;  %v8251_v52 = vor.u32 %v9252_v48, %v8250_v46  ;;  %v8255_v53 = vor.u32 %v9247_v16, %v8252_v50  ;;  %v9222_v15 = vld [vmem:[#allocation8 + $0x12c] sm:$0xf0]  ;;  %v9331_v46 = vld [vmem:[#allocation8 + $0x494] sm:$0xf0]  ;;  %v9326_v48 = vld [vmem:[#allocation8 + $0x474] sm:$0xf] }
 0x2ba   :  { %5528 = vmatpush.bf16.msrb.mxu1 %v8359_v25  ;;  %v8090_v25 = vld [vmem:[#allocation8 + $0xb8] sm:$0xf]  ;;  %v8564_v16 = vld [vmem:[#allocation8 + $0x498] sm:$0xf0]  ;;  %v8298_v50 = vld [vmem:[#allocation8 + $0x250] sm:$0xf] }
 0x2bb   :  { %5491 = vmatmul.bf16.vlgmr.msra.gmra.mxu2 %v9746_v60  ;;  %5517 = vmatmul.bf16.vlgmr.msrb.gmra.mxu0 %v9746_v60 }
 0x2bc   :  { %v9750_v13 = vpop.f32.mrf.mxu0  ;;  %5539 = vmatpush.bf16.msrb.mxu2 %v8123_v63  ;;  %5565 = vmatpush.bf16.msra.mxu0 %v8127_v55  ;;  %v8211_v63 = vor.u32 %v9242_v57, %v8210_v56  ;;  %v8215_v55 = vor.u32 %v9237_v58, %v8212_v61  ;;  %v8567_v57 = vor.u32 %v9326_v48, %v8564_v16  ;;  %v8522_v58 = vld [vmem:[#allocation8 + $0x420] sm:$0xf]  ;;  %v9321_v61 = vld [vmem:[#allocation8 + $0x444] sm:$0xf0]  ;;  %v9276_v16 = vld [vmem:[#allocation8 + $0x2e4] sm:$0xf] }
 0x2bd   :  { %v9754_v7 = vpop.f32.mrf.mxu1  ;;  %5503 = vmatpush.bf16.msra.mxu3 %v8315_v17  ;;  %v4369_v18 = vadd.f32 %v9750_v13, %v4356_v47  ;;  %v8171_v13 = vor.u32 %v9232_v3, %v8170_v0  ;;  %v8091_v17 = vor.u32 %v9212_v14, %v8090_v25  ;;  %v8258_v0 = vld [vmem:[#allocation8 + $0x200] sm:$0xf]  ;;  %v9248_v3 = vld [vmem:[#allocation8 + $0x204] sm:$0xf]  ;;  %v8523_v10 = vor.u32 %v9321_v61, %v8522_v58  ;;  %v9238_v25 = vld [vmem:[#allocation8 + $0x1b4] sm:$0xf] }
 0x2be   :  { %5529 = vmatpush.bf16.msrb.mxu1 %v8319_v30  ;;  %v8602_v30 = vld [vmem:[#allocation8 + $0x4c0] sm:$0xf]  ;;  %v9266_v58 = vld [vmem:[#allocation8 + $0x294] sm:$0xf] }
 0x2bf   :  { %v4382_v1 = vadd.f32 %v9754_v7, %v4369_v18  ;;  %v9207_v7 = vld [vmem:[#allocation8 + $0xbc] sm:$0xf] }
 0x2c0   :  { %5540 = vmatpush.bf16.msrb.mxu2 %v8083_v23  ;;  %5566 = vmatpush.bf16.msra.mxu0 %v8087_v37  ;;  %v8132_v23 = vld [vmem:[#allocation8 + $0x130] sm:$0xf0]  ;;  %v8131_v37 = vor.u32 %v9222_v15, %v8130_v19  ;;  %v8095_v39 = vor.u32 %v9207_v7, %v8092_v24  ;;  %v9311_v19 = vld [vmem:[#allocation8 + $0x3f4] sm:$0xf0]  ;;  %v8263_v15 = vor.u32 %v9248_v3, %v8260_v5  ;;  %v8442_v24 = vld [vmem:[#allocation8 + $0x380] sm:$0xf] }
 0x2c1   :  { %v8135_v51 = vor.u32 %v9217_v20, %v8132_v23  ;;  %v9306_v20 = vld [vmem:[#allocation8 + $0x3d4] sm:$0xf]  ;;  %v8484_v23 = vld [vmem:[#allocation8 + $0x3f8] sm:$0xf0]  ;;  %v8610_v3 = vld [vmem:[#allocation8 + $0x4c8] sm:$0xf] }
 0x2c2   :  { %v8487_v7 = vor.u32 %v9306_v20, %v8484_v23  ;;  %v9342_v5 = vld [vmem:[#allocation8 + $0x4ec] sm:$0xf0]  ;;  %v8018_v20 = vld [vmem:[#allocation8 + $0x20] sm:$0xf]  ;;  %v9193_v23 = vld [vmem:[#allocation8 + $0x44] sm:$0xf0] }
 0x2c4   :  { %v4370_v33 = vpop.f32.mrf.mxu0  ;;  %v4394_v54 = vpop.f32.mrf.mxu2  ;;  %5541 = vmatpush.bf16.msrb.mxu2 %v8043_v29  ;;  %5567 = vmatpush.bf16.msra.mxu0 %v8047_v28  ;;  %v9202_v29 = vld [vmem:[#allocation8 + $0x8c] sm:$0xf0] }
 0x2c5   :  { %v4383_v38 = vpop.f32.mrf.mxu1  ;;  %v4407_v12 = vpop.f32.mrf.mxu3  ;;  %v4395_v49 = vadd.f32 %v4394_v54, %v4382_v1  ;;  %v8051_v34 = vor.u32 %v9202_v29, %v8050_v8  ;;  %v9192_v54 = vld [vmem:[#allocation8 + $0x3c] sm:$0xf0]  ;;  %v9253_v1 = vld [vmem:[#allocation8 + $0x224] sm:$0xf0] }
 0x2c6   :  { %v9187_v38 = vld [vmem:[#allocation8 + $0x1c] sm:$0xf]  ;;  %v8178_v8 = vld [vmem:[#allocation8 + $0x160] sm:$0xf]  ;;  %v9233_v29 = vld [vmem:[#allocation8 + $0x184] sm:$0xf0] }
 0x2c7   :  { %v4408_v9 = vadd.f32 %v4407_v12, %v4395_v49  ;;  %v8607_v12 = vor.u32 %v9336_v32, %v8604_v2  ;;  %v8259_v49 = vor.u32 %v9253_v1, %v8258_v0  ;;  %v9291_v32 = vld [vmem:[#allocation8 + $0x354] sm:$0xf0]  ;;  %v8179_v2 = vor.u32 %v9233_v29, %v8178_v8  ;;  %v9198_v0 = vld [vmem:[#allocation8 + $0x74] sm:$0xf]  ;;  %v8060_v1 = vld [vmem:[#allocation8 + $0x98] sm:$0xf0] }
 0x2c8   :  { %5542 = vmatpush.bf16.msrb.mxu2 %v8003_v36  ;;  %5568 = vmatpush.bf16.msra.mxu0 %v8007_v40  ;;  %v8603_v40 = vor.u32 %v9341_v31, %v8602_v30  ;;  %v8402_v31 = vld [vmem:[#allocation8 + $0x330] sm:$0xf]  ;;  %v8530_v8 = vld [vmem:[#allocation8 + $0x428] sm:$0xf] }
 0x2c9   :  { %v9322_v29 = vld [vmem:[#allocation8 + $0x44c] sm:$0xf0] }
 0x2cb   :  { %5543 = vmatmul.bf16.vlgmr.msrb.gmra.mxu2 %v9746_v60  ;;  %5569 = vmatmul.bf16.vlgmr.msra.gmra.mxu0 %v9746_v60 }
 0x2cc   :  { %5587 = vmatpush.bf16.msra.mxu2 %v8291_v44  ;;  %5613 = vmatpush.bf16.msrb.mxu0 %v8295_v45  ;;  %v4396_v62 = vpop.f32.mrf.mxu2  ;;  %v8012_v44 = vld [vmem:[#allocation8 + $0x40] sm:$0xf0]  ;;  %v8562_v45 = vld [vmem:[#allocation8 + $0x470] sm:$0xf] }
 0x2cd   :  { %v4409_v6 = vpop.f32.mrf.mxu3  ;;  %v8015_v56 = vor.u32 %v9187_v38, %v8012_v44  ;;  %v8563_v18 = vor.u32 %v9331_v46, %v8562_v45  ;;  %v8299_v62 = vor.u32 %v9263_v41, %v8298_v50  ;;  %v9218_v38 = vld [vmem:[#allocation8 + $0x114] sm:$0xf]  ;;  %v8362_v45 = vld [vmem:[#allocation8 + $0x2e0] sm:$0xf]  ;;  %v9281_v46 = vld [vmem:[#allocation8 + $0x304] sm:$0xf0] }
 0x2ce   :  { %v8364_v50 = vld [vmem:[#allocation8 + $0x308] sm:$0xf0]  ;;  %v9213_v41 = vld [vmem:[#allocation8 + $0xe4] sm:$0xf0] }
 0x2d0   :  { %5588 = vmatpush.bf16.msra.mxu2 %v8251_v52  ;;  %5614 = vmatpush.bf16.msrb.mxu0 %v8255_v53  ;;  %v8300_v52 = vld [vmem:[#allocation8 + $0x278] sm:$0xf0]  ;;  %v8011_v53 = vor.u32 %v9192_v54, %v8010_v35  ;;  %v8138_v35 = vld [vmem:[#allocation8 + $0x110] sm:$0xf]  ;;  %v9223_v54 = vld [vmem:[#allocation8 + $0x134] sm:$0xf0] }
 0x2d4   :  { %5589 = vmatpush.bf16.msra.mxu2 %v8211_v63  ;;  %5615 = vmatpush.bf16.msrb.mxu0 %v8215_v55  ;;  %v9316_v63 = vld [vmem:[#allocation8 + $0x424] sm:$0xf]  ;;  %v8524_v55 = vld [vmem:[#allocation8 + $0x448] sm:$0xf0] }
 0x2d8   :  { %5590 = vmatpush.bf16.msra.mxu2 %v8171_v13  ;;  %5616 = vmatpush.bf16.msrb.mxu0 %v8175_v22  ;;  %v8527_v13 = vor.u32 %v9316_v63, %v8524_v55  ;;  %v8482_v22 = vld [vmem:[#allocation8 + $0x3d0] sm:$0xf]  ;;  %v9203_v55 = vld [vmem:[#allocation8 + $0x94] sm:$0xf0] }
 0x2d9   :  { %v8483_v14 = vor.u32 %v9311_v19, %v8482_v22  ;;  %v8058_v63 = vld [vmem:[#allocation8 + $0x70] sm:$0xf] }
 0x2dc   :  { %v4420_v26 = vpop.f32.mrf.mxu0  ;;  %5591 = vmatpush.bf16.msra.mxu2 %v8131_v37  ;;  %5617 = vmatpush.bf16.msrb.mxu0 %v8135_v51  ;;  %v8218_v37 = vld [vmem:[#allocation8 + $0x1b0] sm:$0xf]  ;;  %v9243_v51 = vld [vmem:[#allocation8 + $0x1d4] sm:$0xf0] }
 0x2dd   :  { %v4421_v43 = vadd.f32 %v4420_v26, %v4408_v9  ;;  %v4433_v4 = vpop.f32.mrf.mxu1  ;;  %v8220_v9 = vld [vmem:[#allocation8 + $0x1d8] sm:$0xf0]  ;;  %v9301_v26 = vld [vmem:[#allocation8 + $0x3a4] sm:$0xf0] }
 0x2de   :  { %v8443_v59 = vor.u32 %v9301_v26, %v8442_v24  ;;  %v9327_v24 = vld [vmem:[#allocation8 + $0x47c] sm:$0xf]  ;;  %v8572_v26 = vld [vmem:[#allocation8 + $0x4a0] sm:$0xf0] }
 0x2df   :  { %v4434_v28 = vadd.f32 %v4433_v4, %v4421_v43  ;;  %v8219_v43 = vor.u32 %v9243_v51, %v8218_v37  ;;  %v8223_v4 = vor.u32 %v9238_v25, %v8220_v9  ;;  %v8611_v37 = vor.u32 %v9342_v5, %v8610_v3  ;;  %v9188_v25 = vld [vmem:[#allocation8 + $0x24] sm:$0xf]  ;;  %v8020_v9 = vld [vmem:[#allocation8 + $0x48] sm:$0xf0]  ;;  %v8578_v5 = vld [vmem:[#allocation8 + $0x480] sm:$0xf] }
 0x2e0   :  { %5592 = vmatpush.bf16.msra.mxu2 %v8091_v17  ;;  %5618 = vmatpush.bf16.msrb.mxu0 %v8095_v39  ;;  %v9296_v17 = vld [vmem:[#allocation8 + $0x384] sm:$0xf]  ;;  %v8444_v39 = vld [vmem:[#allocation8 + $0x3a8] sm:$0xf0] }
 0x2e1   :  { %v4444_v33 = vmax.f32 %v4442_v21, %v4434_v28  ;;  %v9258_v21 = vld [vmem:[#allocation8 + $0x254] sm:$0xf]  ;;  %v9228_v28 = vld [vmem:[#allocation8 + $0x164] sm:$0xf]  ;;  %v8447_v30 = vor.u32 %v9296_v17, %v8444_v39  ;;  %v8575_v39 = vor.u32 %v9327_v24, %v8572_v26  ;;  %v8500_v24 = vld [vmem:[#allocation8 + $0x408] sm:$0xf0] }
 0x2e2   :  { %v8303_v6 = vor.u32 %v9258_v21, %v8300_v52  ;;  %v9208_v21 = vld [vmem:[#allocation8 + $0xc4] sm:$0xf]  ;;  %v8100_v52 = vld [vmem:[#allocation8 + $0xe8] sm:$0xf0] }
 0x2e3   :  { %v9765_v36 = vpack.c.bf16 %v4444_v33, %v4444_v33  ;;  %v8183_v33 = vor.u32 %v9228_v28, %v8180_v42  ;;  %v9317_v28 = vld [vmem:[#allocation8 + $0x42c] sm:$0xf]  ;;  %v8532_v42 = vld [vmem:[#allocation8 + $0x450] sm:$0xf0] }
 0x2e4   :  { %v4422_v47 = vpop.f32.mrf.mxu0  ;;  %5593 = vmatpush.bf16.msra.mxu2 %v8051_v34  ;;  %5619 = vmatpush.bf16.msrb.mxu0 %v8055_v11  ;;  %v9286_v34 = vld [vmem:[#allocation8 + $0x334] sm:$0xf]  ;;  %v8404_v11 = vld [vmem:[#allocation8 + $0x358] sm:$0xf0] }
 0x2e5   :  { %v4435_v27 = vpop.f32.mrf.mxu1  ;;  %5452 = vmatmul.bf16.vlgmr.msrb.gmra.mxu3 %v9765_v36  ;;  %5478 = vmatmul.bf16.vlgmr.msra.gmra.mxu1 %v9765_v36  ;;  %v8407_v44 = vor.u32 %v9286_v34, %v8404_v11  ;;  %v8139_v47 = vor.u32 %v9223_v54, %v8138_v35  ;;  %v8450_v35 = vld [vmem:[#allocation8 + $0x388] sm:$0xf]  ;;  %v9302_v54 = vld [vmem:[#allocation8 + $0x3ac] sm:$0xf0] }
 0x2e6   :  { %5548 = vmatpush.bf16.msrb.mxu3 %v8603_v40  ;;  %5574 = vmatpush.bf16.msra.mxu1 %v8607_v12  ;;  %v8140_v40 = vld [vmem:[#allocation8 + $0x138] sm:$0xf0]  ;;  %v8403_v12 = vor.u32 %v9291_v32, %v8402_v31  ;;  %v8098_v27 = vld [vmem:[#allocation8 + $0xc0] sm:$0xf]  ;;  %v8490_v31 = vld [vmem:[#allocation8 + $0x3d8] sm:$0xf] }
 0x2e7   :  { %v8143_v48 = vor.u32 %v9218_v38, %v8140_v40  ;;  %v8099_v61 = vor.u32 %v9213_v41, %v8098_v27  ;;  %v9312_v32 = vld [vmem:[#allocation8 + $0x3fc] sm:$0xf0]  ;;  %v9297_v38 = vld [vmem:[#allocation8 + $0x38c] sm:$0xf]  ;;  %v8452_v40 = vld [vmem:[#allocation8 + $0x3b0] sm:$0xf0] }
 0x2e8   :  { %5594 = vmatpush.bf16.msra.mxu2 %v8011_v53  ;;  %5620 = vmatpush.bf16.msrb.mxu0 %v8015_v56  ;;  %v8363_v53 = vor.u32 %v9281_v46, %v8362_v45  ;;  %v8367_v56 = vor.u32 %v9276_v16, %v8364_v50  ;;  %v8491_v34 = vor.u32 %v9312_v32, %v8490_v31  ;;  %v8410_v45 = vld [vmem:[#allocation8 + $0x338] sm:$0xf]  ;;  %v9292_v46 = vld [vmem:[#allocation8 + $0x35c] sm:$0xf0]  ;;  %v8370_v50 = vld [vmem:[#allocation8 + $0x2e8] sm:$0xf] }
 0x2e9   :  { %v8411_v16 = vor.u32 %v9292_v46, %v8410_v45  ;;  %v9282_v27 = vld [vmem:[#allocation8 + $0x30c] sm:$0xf0]  ;;  %v9277_v41 = vld [vmem:[#allocation8 + $0x2ec] sm:$0xf]  ;;  %v9288_v31 = vld [vmem:[#allocation8 + $0x344] sm:$0xf] }
 0x2ea   :  { %5549 = vmatpush.bf16.msrb.mxu3 %v8563_v18  ;;  %5575 = vmatpush.bf16.msra.mxu1 %v8567_v57  ;;  %v8322_v18 = vld [vmem:[#allocation8 + $0x290] sm:$0xf]  ;;  %v9271_v57 = vld [vmem:[#allocation8 + $0x2b4] sm:$0xf0]  ;;  %v8420_v32 = vld [vmem:[#allocation8 + $0x368] sm:$0xf0] }
 0x2eb   :  { %5595 = vmatmul.bf16.vlgmr.msra.gmra.mxu2 %v9746_v60  ;;  %5621 = vmatmul.bf16.vlgmr.msrb.gmra.mxu0 %v9746_v60  ;;  %v8323_v22 = vor.u32 %v9271_v57, %v8322_v18  ;;  %v9272_v18 = vld [vmem:[#allocation8 + $0x2bc] sm:$0xf0]  ;;  %v9267_v57 = vld [vmem:[#allocation8 + $0x29c] sm:$0xf]  ;;  %v9273_v46 = vld [vmem:[#allocation8 + $0x2c4] sm:$0xf0] }
 0x2ec   :  { %5639 = vmatpush.bf16.msrb.mxu2 %v8299_v62  ;;  %5665 = vmatpush.bf16.msra.mxu0 %v8303_v6  ;;  %v8103_v62 = vor.u32 %v9208_v21, %v8100_v52  ;;  %v8324_v6 = vld [vmem:[#allocation8 + $0x2b8] sm:$0xf0]  ;;  %v8372_v21 = vld [vmem:[#allocation8 + $0x310] sm:$0xf0]  ;;  %v8371_v52 = vor.u32 %v9282_v27, %v8370_v50  ;;  %v8338_v45 = vld [vmem:[#allocation8 + $0x2a0] sm:$0xf] }
 0x2ed   :  { %v8327_v19 = vor.u32 %v9266_v58, %v8324_v6  ;;  %v8332_v58 = vld [vmem:[#allocation8 + $0x2c0] sm:$0xf0]  ;;  %v9338_v6 = vld [vmem:[#allocation8 + $0x4d4] sm:$0xf] }
 0x2ee   :  { %5550 = vmatpush.bf16.msrb.mxu3 %v8523_v10  ;;  %5576 = vmatpush.bf16.msra.mxu1 %v8527_v13  ;;  %v9337_v10 = vld [vmem:[#allocation8 + $0x4cc] sm:$0xf]  ;;  %v8612_v13 = vld [vmem:[#allocation8 + $0x4f0] sm:$0xf0] }
 0x2ef   :  { %v8615_v51 = vor.u32 %v9337_v10, %v8612_v13  ;;  %v9333_v10 = vld [vmem:[#allocation8 + $0x4a4] sm:$0xf0]  ;;  %v9328_v13 = vld [vmem:[#allocation8 + $0x484] sm:$0xf] }
 0x2f0   :  { %5640 = vmatpush.bf16.msrb.mxu2 %v8259_v49  ;;  %5666 = vmatpush.bf16.msra.mxu0 %v8263_v15  ;;  %v8059_v49 = vor.u32 %v9203_v55, %v8058_v63  ;;  %v8063_v15 = vor.u32 %v9198_v0, %v8060_v1  ;;  %v8620_v63 = vld [vmem:[#allocation8 + $0x4f8] sm:$0xf0]  ;;  %v8335_v0 = vor.u32 %v9267_v57, %v8332_v58  ;;  %v4607_v57 = vld [vmem:[#allocation10] sm:$0xff] }
 0x2f1   :  { %v8623_v3 = vor.u32 %v9338_v6, %v8620_v63  ;;  %v4611_v63 = vperm.slane %v4607_v57, 0 }
 0x2f2   :  { %5551 = vmatpush.bf16.msrb.mxu3 %v8483_v14  ;;  %5577 = vmatpush.bf16.msra.mxu1 %v8487_v7  ;;  %v8570_v14 = vld [vmem:[#allocation8 + $0x478] sm:$0xf]  ;;  %v9332_v7 = vld [vmem:[#allocation8 + $0x49c] sm:$0xf0] }
 0x2f3   :  { %v8571_v17 = vor.u32 %v9332_v7, %v8570_v14  ;;  %v9313_v14 = vld [vmem:[#allocation8 + $0x404] sm:$0xf0]  ;;  %v9308_v7 = vld [vmem:[#allocation8 + $0x3e4] sm:$0xf] }
 0x2f4   :  { %5641 = vmatpush.bf16.msrb.mxu2 %v8219_v43  ;;  %5667 = vmatpush.bf16.msra.mxu0 %v8223_v4  ;;  %v8019_v43 = vor.u32 %v9193_v23, %v8018_v20  ;;  %v8023_v4 = vor.u32 %v9188_v25, %v8020_v9  ;;  %v9323_v20 = vld [vmem:[#allocation8 + $0x454] sm:$0xf0]  ;;  %v9318_v23 = vld [vmem:[#allocation8 + $0x434] sm:$0xf]  ;;  %v8498_v9 = vld [vmem:[#allocation8 + $0x3e0] sm:$0xf] }
 0x2f5   :  { %5504 = vmatmul.bf16.vlgmr.msra.gmra.mxu3 %v9765_v36  ;;  %5530 = vmatmul.bf16.vlgmr.msrb.gmra.mxu1 %v9765_v36  ;;  %v8499_v26 = vor.u32 %v9313_v14, %v8498_v9 }
 0x2f6   :  { %5552 = vmatpush.bf16.msrb.mxu3 %v8443_v59  ;;  %5578 = vmatpush.bf16.msra.mxu1 %v8447_v30  ;;  %v8531_v59 = vor.u32 %v9322_v29, %v8530_v8  ;;  %v8535_v30 = vor.u32 %v9317_v28, %v8532_v42  ;;  %v8460_v8 = vld [vmem:[#allocation8 + $0x3b8] sm:$0xf0] }
 0x2f8   :  { %5642 = vmatpush.bf16.msrb.mxu2 %v8179_v2  ;;  %5668 = vmatpush.bf16.msra.mxu0 %v8183_v33  ;;  %v9307_v2 = vld [vmem:[#allocation8 + $0x3dc] sm:$0xf]  ;;  %v8492_v33 = vld [vmem:[#allocation8 + $0x400] sm:$0xf0] }
 0x2f9   :  { %v8495_v11 = vor.u32 %v9307_v2, %v8492_v33  ;;  %v8423_v33 = vor.u32 %v9288_v31, %v8420_v32 }
 0x2fa   :  { %5553 = vmatpush.bf16.msrb.mxu3 %v8403_v12  ;;  %5579 = vmatpush.bf16.msra.mxu1 %v8407_v44  ;;  %v8451_v12 = vor.u32 %v9302_v54, %v8450_v35  ;;  %v8455_v44 = vor.u32 %v9297_v38, %v8452_v40  ;;  %v9283_v35 = vld [vmem:[#allocation8 + $0x314] sm:$0xf0]  ;;  %v9278_v54 = vld [vmem:[#allocation8 + $0x2f4] sm:$0xf]  ;;  %v8380_v38 = vld [vmem:[#allocation8 + $0x318] sm:$0xf0] }
 0x2fc   :  { %5643 = vmatpush.bf16.msrb.mxu2 %v8139_v47  ;;  %5669 = vmatpush.bf16.msra.mxu0 %v8143_v48  ;;  %v9287_v47 = vld [vmem:[#allocation8 + $0x33c] sm:$0xf]  ;;  %v8412_v48 = vld [vmem:[#allocation8 + $0x360] sm:$0xf0] }
 0x2fe   :  { %5554 = vmatpush.bf16.msrb.mxu3 %v8363_v53  ;;  %5580 = vmatpush.bf16.msra.mxu1 %v8367_v56  ;;  %v8375_v53 = vor.u32 %v9277_v41, %v8372_v21  ;;  %v8330_v56 = vld [vmem:[#allocation8 + $0x298] sm:$0xf] }
 0x2ff   :  { %v8331_v55 = vor.u32 %v9272_v18, %v8330_v56 }
 0x300   :  { %5644 = vmatpush.bf16.msrb.mxu2 %v8099_v61  ;;  %5670 = vmatpush.bf16.msra.mxu0 %v8103_v62  ;;  %v8618_v61 = vld [vmem:[#allocation8 + $0x4d0] sm:$0xf]  ;;  %v9343_v62 = vld [vmem:[#allocation8 + $0x4f4] sm:$0xf0] }
 0x301   :  { %v8619_v1 = vor.u32 %v9343_v62, %v8618_v61  ;;  %v4612_v61 = vperm.slane %v4607_v57, 1 }
 0x302   :  { %5555 = vmatpush.bf16.msrb.mxu3 %v8323_v22  ;;  %5581 = vmatpush.bf16.msra.mxu1 %v8327_v19  ;;  %v8580_v22 = vld [vmem:[#allocation8 + $0x4a8] sm:$0xf0]  ;;  %v8579_v19 = vor.u32 %v9333_v10, %v8578_v5 }
 0x304   :  { %5645 = vmatpush.bf16.msrb.mxu2 %v8059_v49  ;;  %5671 = vmatpush.bf16.msra.mxu0 %v8063_v15  ;;  %v8583_v49 = vor.u32 %v9328_v13, %v8580_v22  ;;  %v8538_v15 = vld [vmem:[#allocation8 + $0x430] sm:$0xf]  ;;  %v4614_v13 = vperm.slane %v4607_v57, 3 }
 0x305   :  { %5556 = vmatmul.bf16.vlgmr.msrb.gmra.mxu3 %v9765_v36  ;;  %5582 = vmatmul.bf16.vlgmr.msra.gmra.mxu1 %v9765_v36 }
 0x306   :  { %5600 = vmatpush.bf16.msra.mxu3 %v8611_v37  ;;  %5626 = vmatpush.bf16.msrb.mxu1 %v8615_v51  ;;  %v8540_v37 = vld [vmem:[#allocation8 + $0x458] sm:$0xf0]  ;;  %v8539_v51 = vor.u32 %v9323_v20, %v8538_v15  ;;  %v4613_v20 = vperm.slane %v4607_v57, 2 }
 0x307   :  { %v8543_v25 = vor.u32 %v9318_v23, %v8540_v37 }
 0x308   :  { %5646 = vmatpush.bf16.msrb.mxu2 %v8019_v43  ;;  %5672 = vmatpush.bf16.msra.mxu0 %v8023_v4  ;;  %v8503_v43 = vor.u32 %v9308_v7, %v8500_v24  ;;  %v8458_v4 = vld [vmem:[#allocation8 + $0x390] sm:$0xf] }
 0x30a   :  { %5601 = vmatpush.bf16.msra.mxu3 %v8571_v17  ;;  %5627 = vmatpush.bf16.msrb.mxu1 %v8575_v39  ;;  %v9303_v17 = vld [vmem:[#allocation8 + $0x3b4] sm:$0xf0]  ;;  %v9298_v39 = vld [vmem:[#allocation8 + $0x394] sm:$0xf] }
 0x30b   :  { %5647 = vmatmul.bf16.vlgmr.msrb.gmra.mxu2 %v9746_v60  ;;  %5673 = vmatmul.bf16.vlgmr.msra.gmra.mxu0 %v9746_v60  ;;  %v8415_v60 = vor.u32 %v9287_v47, %v8412_v48  ;;  %v8459_v28 = vor.u32 %v9303_v17, %v8458_v4  ;;  %v8463_v42 = vor.u32 %v9298_v39, %v8460_v8  ;;  %v9268_v47 = vld [vmem:[#allocation8 + $0x2a4] sm:$0xf]  ;;  %v8340_v48 = vld [vmem:[#allocation8 + $0x2c8] sm:$0xf0]  ;;  %v4615_v39 = vperm.slane %v4607_v57, 4 }
 0x30e   :  { %5602 = vmatpush.bf16.msra.mxu3 %v8531_v59  ;;  %5628 = vmatpush.bf16.msrb.mxu1 %v8535_v30  ;;  %v8418_v59 = vld [vmem:[#allocation8 + $0x340] sm:$0xf]  ;;  %v9293_v30 = vld [vmem:[#allocation8 + $0x364] sm:$0xf0] }
 0x30f   :  { %v8419_v2 = vor.u32 %v9293_v30, %v8418_v59 }
 0x312   :  { %5603 = vmatpush.bf16.msra.mxu3 %v8491_v34  ;;  %5629 = vmatpush.bf16.msrb.mxu1 %v8495_v11  ;;  %v8378_v34 = vld [vmem:[#allocation8 + $0x2f0] sm:$0xf] }
 0x316   :  { %5604 = vmatpush.bf16.msra.mxu3 %v8451_v12  ;;  %5630 = vmatpush.bf16.msrb.mxu1 %v8455_v44  ;;  %v8379_v12 = vor.u32 %v9283_v35, %v8378_v34  ;;  %v8383_v44 = vor.u32 %v9278_v54, %v8380_v38  ;;  %v4618_v35 = vperm.slane %v4607_v57, 7 }
 0x31a   :  { %5605 = vmatpush.bf16.msra.mxu3 %v8411_v16  ;;  %5631 = vmatpush.bf16.msrb.mxu1 %v8415_v60  ;;  %v8339_v16 = vor.u32 %v9273_v46, %v8338_v45  ;;  %v8343_v60 = vor.u32 %v9268_v47, %v8340_v48 }
 0x31e   :  { %5606 = vmatpush.bf16.msra.mxu3 %v8371_v52  ;;  %5632 = vmatpush.bf16.msrb.mxu1 %v8375_v53 }
 0x322   :  { %5607 = vmatpush.bf16.msra.mxu3 %v8331_v55  ;;  %5633 = vmatpush.bf16.msrb.mxu1 %v8335_v0 }
 0x325   :  { %5608 = vmatmul.bf16.vlgmr.msra.gmra.mxu3 %v9765_v36  ;;  %5634 = vmatmul.bf16.vlgmr.msrb.gmra.mxu1 %v9765_v36 }
 0x326   :  { %5652 = vmatpush.bf16.msrb.mxu3 %v8619_v1  ;;  %5678 = vmatpush.bf16.msra.mxu1 %v8623_v3 }
 0x328   :  { %v5466_v29 = vpop.f32.mrf.mxu0 }
 0x329   :  { %v5467_v62 = vadd.f32 %v5466_v29, %v4612_v61 }
 0x32a   :  { %5653 = vmatpush.bf16.msrb.mxu3 %v8579_v19  ;;  %5679 = vmatpush.bf16.msra.mxu1 %v8583_v49 }
 0x32e   :  { %5654 = vmatpush.bf16.msrb.mxu3 %v8539_v51  ;;  %5680 = vmatpush.bf16.msra.mxu1 %v8543_v25  ;;  %v5440_v11 = vpop.f32.mrf.mxu2 }
 0x32f   :  { %v5441_v0 = vadd.f32 %v5440_v11, %v4611_v63 }
 0x330   :  { %v5468_v40 = vpop.f32.mrf.mxu0 }
 0x331   :  { %v4617_v40 = vperm.slane %v4607_v57, 6 }
 0x332   :  { %5655 = vmatpush.bf16.msrb.mxu3 %v8499_v26  ;;  %5681 = vmatpush.bf16.msra.mxu1 %v8503_v43  ;;  %v4616_v26 = vperm.slane %v4607_v57, 5 }
 0x336   :  { %5656 = vmatpush.bf16.msrb.mxu3 %v8459_v28  ;;  %5682 = vmatpush.bf16.msra.mxu1 %v8463_v42  ;;  %v5442_v50 = vpop.f32.mrf.mxu2 }
 0x337   :  { %v4608_v50 = vld [vmem:[#allocation10 + $0x8] sm:$0x3] }
 0x338   :  { %v5518_v27 = vpop.f32.mrf.mxu0 }
 0x339   :  { %v5519_v19 = vadd.f32 %v5518_v27, %v4614_v13  ;;  %v4620_v27 = vperm.slane %v4608_v50, 1 }
 0x33a   :  { %5657 = vmatpush.bf16.msrb.mxu3 %v8419_v2  ;;  %5683 = vmatpush.bf16.msra.mxu1 %v8423_v33 }
 0x33e   :  { %5658 = vmatpush.bf16.msrb.mxu3 %v8379_v12  ;;  %5684 = vmatpush.bf16.msra.mxu1 %v8383_v44  ;;  %v5492_v41 = vpop.f32.mrf.mxu2 }
 0x33f   :  { %v5493_v51 = vadd.f32 %v5492_v41, %v4613_v20 }
 0x340   :  { %v5520_v21 = vpop.f32.mrf.mxu0 }
 0x342   :  { %5659 = vmatpush.bf16.msrb.mxu3 %v8339_v16  ;;  %5685 = vmatpush.bf16.msra.mxu1 %v8343_v60 }
 0x345   :  { %5660 = vmatmul.bf16.vlgmr.msrb.gmra.mxu3 %v9765_v36  ;;  %5686 = vmatmul.bf16.vlgmr.msra.gmra.mxu1 %v9765_v36 }
 0x346   :  { %v5494_v52 = vpop.f32.mrf.mxu2 }
 0x347   :  { %v4619_v52 = vperm.slane %v4608_v50, 0 }
 0x348   :  { %v5570_v53 = vpop.f32.mrf.mxu0 }
 0x349   :  { %v5571_v4 = vadd.f32 %v5570_v53, %v4616_v26 }
 0x34e   :  { %v5544_v56 = vpop.f32.mrf.mxu2 }
 0x34f   :  { %v5545_v28 = vadd.f32 %v5544_v56, %v4615_v39  ;;  %v5699_v56 = vld [vmem:[#allocation11] sm:$0x3] }
 0x350   :  { %v5572_v18 = vpop.f32.mrf.mxu0  ;;  %v5701_v57 = vperm.slane %v5699_v56, 0 }
 0x356   :  { %v5546_v58 = vpop.f32.mrf.mxu2 }
 0x362   :  { %v5479_v6 = vpop.f32.mrf.mxu1 }
 0x363   :  { %v5480_v55 = vadd.f32 %v5479_v6, %v5467_v62  ;;  %v5702_v6 = vperm.slane %v5699_v56, 1 }
 0x368   :  { %v5453_v1 = vpop.f32.mrf.mxu3  ;;  %v5622_v5 = vpop.f32.mrf.mxu0 }
 0x369   :  { %v5454_v3 = vadd.f32 %v5453_v1, %v5441_v0  ;;  %v5623_v54 = vadd.f32 %v5622_v5, %v4618_v35 }
 0x36a   :  { %v5481_v10 = vpop.f32.mrf.mxu1 }
 0x36b   :  { %v9352_v10 = vld [vmem:[#allocation2] ss:$0 sm:$0xff] }
 0x36e   :  { %v5596_v36 = vpop.f32.mrf.mxu2 }
 0x36f   :  { %v5597_v45 = vadd.f32 %v5596_v36, %v4617_v40 }
 0x370   :  { %v5455_v22 = vpop.f32.mrf.mxu3  ;;  %v5624_v49 = vpop.f32.mrf.mxu0 }
 0x372   :  { %v5531_v15 = vpop.f32.mrf.mxu1 }
 0x373   :  { %v5532_v23 = vadd.f32 %v5531_v15, %v5519_v19 }
 0x375   :  { %v5692_v37 = vmax.f32 %v5480_v55, %v5532_v23 }
 0x376   :  { %v5598_v25 = vpop.f32.mrf.mxu2 }
 0x378   :  { %v5505_v9 = vpop.f32.mrf.mxu3 }
 0x379   :  { %v5506_v14 = vadd.f32 %v5505_v9, %v5493_v51 }
 0x37a   :  { %v5533_v7 = vpop.f32.mrf.mxu1 }
 0x37b   :  { %v5691_v24 = vmax.f32 %v5454_v3, %v5506_v14 }
 0x380   :  { %v5507_v43 = vpop.f32.mrf.mxu3 }
 0x382   :  { %v5583_v17 = vpop.f32.mrf.mxu1 }
 0x383   :  { %v5584_v8 = vadd.f32 %v5583_v17, %v5571_v4 }
 0x385   :  { %v5694_v29 = vmax.f32 %v5692_v37, %v5584_v8 }
 0x388   :  { %v5674_v42 = vpop.f32.mrf.mxu0  ;;  %v5557_v59 = vpop.f32.mrf.mxu3 }
 0x389   :  { %v5558_v30 = vadd.f32 %v5557_v59, %v5545_v28  ;;  %v5675_v21 = vadd.f32 %v5674_v42, %v4620_v27 }
 0x38a   :  { %v5585_v31 = vpop.f32.mrf.mxu1 }
 0x38b   :  { %v5693_v32 = vmax.f32 %v5691_v24, %v5558_v30 }
 0x38e   :  { %v5648_v2 = vpop.f32.mrf.mxu2 }
 0x38f   :  { %v5649_v18 = vadd.f32 %v5648_v2, %v4619_v52 }
 0x390   :  { %v5676_v33 = vpop.f32.mrf.mxu0  ;;  %v5559_v34 = vpop.f32.mrf.mxu3 }
 0x396   :  { %v5650_v11 = vpop.f32.mrf.mxu2 }
 0x3a2   :  { %v5635_v38 = vpop.f32.mrf.mxu1 }
 0x3a3   :  { %v5636_v12 = vadd.f32 %v5635_v38, %v5623_v54 }
 0x3a5   :  { %v5696_v44 = vmax.f32 %v5694_v29, %v5636_v12 }
 0x3a8   :  { %v5609_v46 = vpop.f32.mrf.mxu3 }
 0x3a9   :  { %v5610_v47 = vadd.f32 %v5609_v46, %v5597_v45 }
 0x3aa   :  { %v5637_v48 = vpop.f32.mrf.mxu1 }
 0x3ab   :  { %v5695_v16 = vmax.f32 %v5693_v32, %v5610_v47 }
 0x3b0   :  { %v5611_v60 = vpop.f32.mrf.mxu3 }
 0x3c2   :  { %v5687_v41 = vpop.f32.mrf.mxu1 }
 0x3c3   :  { %v5688_v53 = vadd.f32 %v5687_v41, %v5675_v21 }
 0x3c5   :  { %v5698_v61 = vmax.f32 %v5696_v44, %v5688_v53 }
 0x3c7   :  { %v5706_v1 = vmul.f32 %v5702_v6, %v5698_v61 }
 0x3c8   :  { %v5661_v58 = vpop.f32.mrf.mxu3 }
 0x3c9   :  { %v5662_v62 = vadd.f32 %v5661_v58, %v5649_v18 }
 0x3ca   :  { %v5689_v63 = vpop.f32.mrf.mxu1 }
 0x3cb   :  { %v5697_v55 = vmax.f32 %v5695_v16, %v5662_v62 }
 0x3cd   :  { %v5705_v0 = vmul.f32 %v5701_v57, %v5697_v55 }
 0x3cf   :  { %v5707_v3 = vadd.f32 %v5706_v1, %v5705_v0 }
 0x3d0   :  { %v5663_v5 = vpop.f32.mrf.mxu3 }
 0x3d1   :  { %5708 = vadd.xlane.f32.xlu0 %v5707_v3 }
 0x444   :  { %v5709_v13 = vpop.xlane.xlu0 %5708 }
 0x445   :  { %v5714_v36 = vadd.f32 %v9352_v10, %v5709_v13 }
 0x447   :  { %v5715_v22 = vsub.f32 0.0, %v5714_v36 }
 0x449   :  { %v5716_v19 = vmul.f32 1.442695, %v5715_v22 }
 0x44b   :  { %9353 = vpow2.f32 %v5716_v19 }
 0x451   :  { %v9354_v49 = vpop.eup %9353 }
 0x452   :  { %v5718_v15 = vadd.f32 1.0, %v9354_v49 }
 0x454   :  { %9355 = vrcp.f32 %v5718_v15  ;;  %v5730_v51 = vand.u32 2147483648, %v5718_v15  ;;  %v5728_v9 = vand.u32 2147483647, %v5718_v15  ;;  %vm5724_vm1 = vweird.f32 %v5718_v15 }
 0x456   :  { %v5731_v7 = vor.u32 1.1754944e-38, %v5730_v51  ;;  %vm5729_vm4 = vcmp.eq.f32.partialorder %v5728_v9, 8.507059e+37 }
 0x45a   :  { %v9356_v20 = vpop.eup %9355 }
 0x45b   :  { %v5720_v23 = vmul.f32 %v9356_v20, %v5718_v15  ;;  %vm5725_vm0 = vweird.f32 %v9356_v20 }
 0x45c   :  { %vm5726_vm2 = vmor %vm5724_vm1, %vm5725_vm0 }
 0x45d   :  { %v5721_v37 = vsub.f32 1.0, %v5720_v23 }
 0x45f   :  { %v5722_v25 = vmul.f32 %v9356_v20, %v5721_v37 }
 0x461   :  { %v5723_v14 = vadd.f32 %v9356_v20, %v5722_v25 }
 0x463   :  { %v5727_v24 = vsel %vm5726_vm2, %v9356_v20, %v5723_v14 }
 0x464   :  { %v5732_v26 = vsel %vm5729_vm4, %v5731_v7, %v5727_v24 }
 0x465   :  { %5735 = vst.msk [vmem:[%s9791_s7] sm:$0xff] %vm5734_vm3, %v5732_v26 }
 0x466   :  { %5740 = vsyncpa [#allocation4], 1 }
 0x467   :  { %5741 = vsyncpa [#allocation6], 1 }
 0x468   :  { %5742 = vsyncpa [#allocation9], 1 }
 0x469   :  { %5743 = vsyncpa [#allocation12], 1 }

</bundles_post_ra>
